<compile_context>
chip_gen: v7x
topology: tpu7x:2x2x1
jax: 0.10.0
libtpu: 0.0.40
codegen_flags: <defaults>
</compile_context>

<pallas_src>
import functools
import math

import jax
import jax.numpy as jnp
from jax import lax
from jax.experimental import pallas as pl
from jax.experimental.pallas import tpu as pltpu

# ----------------------------- static config --------------------------------
CHANNELS  = 4                 # coupling channels (must be even)
HALF      = CHANNELS // 2
HIDDEN    = 32                # hidden_channels
FILTER    = 64                # filter_channels of the FFN
N_HEADS   = 2
N_LAYERS  = 2
KSIZE     = 3                 # FFN causal conv kernel size
K_CH      = HIDDEN // N_HEADS
T         = 16                # sequence length
B         = 2                 # batch
BT        = B * T
LN_EPS    = 1e-5              # VITS modules.LayerNorm default eps
MASK_FILL = -1e4              # VITS attentions.MultiHeadAttention masked_fill value
MEAN_ONLY = False
POST_OUT  = HALF * (2 - int(MEAN_ONLY))

# TODO(synk): speaker conditioning (g / cond_layer / cond_pre, gin_channels>0)
# is omitted -- the reference forward is exercised with speaker_id_embedded=None.
# Dropout is p_dropout=0 (identity) so it is omitted as well.
# TODO(synk): if B/T grow, reintroduce a parallel grid over B (v7x has 2 TCs)
# and a kv-blocked online softmax before the (T,T) buffers matter.

# ---- packed "small vectors" parameter layout: (VEC_ROWS, 128) f32 ----------
VEC_LANES   = 128
ROW_PRE_W   = 0                         # rows [0, HALF)          lanes [0, HIDDEN)
ROW_PRE_B   = ROW_PRE_W + HALF          # 1 row                   lanes [0, HIDDEN)
ROW_POST_B  = ROW_PRE_B + 1             # 1 row                   lanes [0, POST_OUT)
ROW_POST_WT = ROW_POST_B + 1            # rows [.., ..+POST_OUT)  lanes [0, HIDDEN)  (post_w^T)
ROW_LAYER0  = ROW_POST_WT + POST_OUT
LAYER_ROWS  = 3
# per-layer rows:
#   +0: qkv_b [0, 3H)   (q part pre-scaled by 1/sqrt(d_k))
#   +1: bo [0,H) | ln0_g [H,2H) | ln0_b [2H,3H) | ffn_b2 [3H,4H)
#   +2: ffn_b1 [0,FILTER) | ln1_g [FILTER,FILTER+H) | ln1_b [FILTER+H,FILTER+2H)
VEC_ROWS    = ROW_LAYER0 + N_LAYERS * LAYER_ROWS

assert 3 * HIDDEN <= VEC_LANES
assert 4 * HIDDEN <= VEC_LANES
assert FILTER + 2 * HIDDEN <= VEC_LANES


# --------------------------------- kernel ------------------------------------
def _coupling_kernel(x_ref, mask_ref, qkv_w_ref, o_w_ref,
                     ffn_w1_ref, ffn_w2_ref, vec_ref, out_ref, *, reverse):
    f32, bf16 = jnp.float32, jnp.bfloat16
    x    = x_ref[...]                            # (BT, CHANNELS) f32
    mask = mask_ref[...]                         # (BT, 1) f32
    vec  = vec_ref[...]                          # (VEC_ROWS, 128) f32

    x0 = x[:, :HALF]                             # (BT, HALF)
    x1 = x[:, HALF:CHANNELS]                     # (BT, HALF)

    # ----- hoisted iota-based masks (built once, reused in every layer/tap) --
    r_t = lax.broadcasted_iota(jnp.int32, (T, T), 0)
    c_t = lax.broadcasted_iota(jnp.int32, (T, T), 1)
    causal = c_t <= r_t                                         # (T, T) per-batch mask
    pos = lax.broadcasted_iota(jnp.int32, (BT, 1), 0) % T       # within-seq position
    keep = {s: pos >= s for s in range(1, KSIZE)}               # shift validity masks

    # ----- pre: 1x1 conv (contraction dim = HALF = 2) on the VPU ------------
    pre_w = vec[ROW_PRE_W:ROW_PRE_W + HALF, :HIDDEN]            # (HALF, HIDDEN)
    pre_b = vec[ROW_PRE_B:ROW_PRE_B + 1, :HIDDEN]               # (1, HIDDEN)
    acc = x0[:, 0:1] * pre_w[0:1, :]
    for c in range(1, HALF):
        acc = acc + x0[:, c:c + 1] * pre_w[c:c + 1, :]
    h = (acc + pre_b) * mask                                    # (BT, HIDDEN)

    # ----- helpers -----------------------------------------------------------
    def layer_norm(v, gamma, beta):
        # one-pass LN: the two XLU reductions issue back-to-back
        mu  = jnp.mean(v, axis=-1, keepdims=True)
        ex2 = jnp.mean(v * v, axis=-1, keepdims=True)
        var = jnp.maximum(ex2 - mu * mu, 0.0)
        return (v - mu) * lax.rsqrt(var + LN_EPS) * gamma + beta

    def causal_conv(v, w_ref, layer, b):
        # per-tap matmul + accumulate; tap KSIZE-1 multiplies the current frame
        out = jnp.dot(v.astype(bf16), w_ref[layer * KSIZE + KSIZE - 1],
                      preferred_element_type=f32)
        for s in range(1, KSIZE):
            shifted = jnp.where(keep[s], pltpu.roll(v, shift=s, axis=0), 0.0)
            out = out + jnp.dot(shifted.astype(bf16),
                                w_ref[layer * KSIZE + KSIZE - 1 - s],
                                preferred_element_type=f32)
        return out + b

    # ----- FFT encoder (g=None path). h is already masked, so the encoder's
    # initial x*x_mask is a no-op. ---------------------------------------------
    e = h
    for l in range(N_LAYERS):
        base   = ROW_LAYER0 + l * LAYER_ROWS
        qkv_b  = vec[base:base + 1, :3 * HIDDEN]
        bo     = vec[base + 1:base + 2, 0:HIDDEN]
        ln0_g  = vec[base + 1:base + 2, HIDDEN:2 * HIDDEN]
        ln0_b  = vec[base + 1:base + 2, 2 * HIDDEN:3 * HIDDEN]
        ffn_b2 = vec[base + 1:base + 2, 3 * HIDDEN:4 * HIDDEN]
        ffn_b1 = vec[base + 2:base + 3, 0:FILTER]
        ln1_g  = vec[base + 2:base + 3, FILTER:FILTER + HIDDEN]
        ln1_b  = vec[base + 2:base + 3, FILTER + HIDDEN:FILTER + 2 * HIDDEN]

        # --- fused QKV projection (1/sqrt(d_k) folded into Wq/bq at pack time)
        qkv = jnp.dot(e.astype(bf16), qkv_w_ref[l],
                      preferred_element_type=f32) + qkv_b             # (BT, 3H)
        wo_l = o_w_ref[l]                                             # (H, H) bf16

        # --- per-batch causal multi-head self-attention -----------------------
        y_parts = []
        for bi in range(B):
            r0 = bi * T
            yb = None
            for hd in range(N_HEADS):
                q = qkv[r0:r0 + T, hd * K_CH:(hd + 1) * K_CH]
                k = qkv[r0:r0 + T, HIDDEN + hd * K_CH:HIDDEN + (hd + 1) * K_CH]
                v = qkv[r0:r0 + T, 2 * HIDDEN + hd * K_CH:2 * HIDDEN + (hd + 1) * K_CH]
                sc = lax.dot_general(q.astype(bf16), k.astype(bf16),
                                     (((1,), (1,)), ((), ())),
                                     preferred_element_type=f32)      # (T, T)
                sc = jnp.where(causal, sc, jnp.float32(MASK_FILL))    # masked_fill
                sc = sc - jnp.max(sc, axis=-1, keepdims=True)
                p = jnp.exp(sc)
                # approx reciprocal (EUP slot): ~2^-12 relative error in norm
                p = p * pl.reciprocal(jnp.sum(p, axis=-1, keepdims=True), approx=True)
                pv = jnp.dot(p.astype(bf16), v.astype(bf16),
                             preferred_element_type=f32)              # (T, K_CH)
                # per-head Wo slice + accumulate (no lane concat of heads)
                contrib = jnp.dot(pv.astype(bf16),
                                  wo_l[hd * K_CH:(hd + 1) * K_CH, :],
                                  preferred_element_type=f32)         # (T, H)
                yb = contrib if yb is None else yb + contrib
            y_parts.append(yb)
        y = jnp.concatenate(y_parts, axis=0) + bo                     # (BT, H)
        e = layer_norm(e + y, ln0_g, ln0_b)

        # --- causal FFN (relu) ------------------------------------------------
        f = causal_conv(e * mask, ffn_w1_ref, l, ffn_b1)              # (BT, FILTER)
        f = jnp.maximum(f, 0.0)
        f = causal_conv(f * mask, ffn_w2_ref, l, ffn_b2) * mask       # (BT, HIDDEN)
        e = layer_norm(e + f, ln1_g, ln1_b)
    e = e * mask

    h_sum = e + h

    # ----- post: fused mean/log-scale 1x1 conv, masked ------------------------
    post_wT = vec[ROW_POST_WT:ROW_POST_WT + POST_OUT, :HIDDEN]        # (POST_OUT, H)
    post_b  = vec[ROW_POST_B:ROW_POST_B + 1, :POST_OUT]               # (1, POST_OUT)
    stats = lax.dot_general(h_sum, post_wT, (((1,), (1,)), ((), ())),
                            preferred_element_type=f32)
    stats = (stats + post_b) * mask                                   # (BT, POST_OUT)
    m = stats[:, :HALF]
    if MEAN_ONLY:
        logs = jnp.zeros_like(m)
    else:
        logs = stats[:, HALF:2 * HALF]

    if not reverse:
        x1_new = m + x1 * jnp.exp(logs) * mask
    else:
        x1_new = (x1 - m) * jnp.exp(-logs) * mask

    out_ref[...] = jnp.concatenate([x0, x1_new], axis=-1).astype(out_ref.dtype)


# ------------------------------ parameter packing -----------------------------
def pack_params(p):
    """Pack the module's weights into 5 kernel arrays. Call ONCE (hoisted off the
    per-step path).  Orientation notes for importing real PyTorch weights:
      * 1x1 Conv1d weight (Cout, Cin, 1)  -> stored here as (Cin, Cout)
      * K-tap Conv1d weight (Cout, Cin, K)-> stored here as (K, Cin, Cout),
        tap K-1 multiplies the current frame (causal left padding of K-1).
    """
    scale = 1.0 / math.sqrt(K_CH)
    wq = p["wq"] * scale                    # fold attention scale into Wq / bq
    bq = p["bq"] * scale
    qkv_w  = jnp.concatenate([wq, p["wk"], p["wv"]], axis=-1).astype(jnp.bfloat16)   # (L,H,3H)
    o_w    = p["wo"].astype(jnp.bfloat16)                                            # (L,H,H)
    ffn_w1 = p["ffn_w1"].reshape(N_LAYERS * KSIZE, HIDDEN, FILTER).astype(jnp.bfloat16)
    ffn_w2 = p["ffn_w2"].reshape(N_LAYERS * KSIZE, FILTER, HIDDEN).astype(jnp.bfloat16)

    post_w = jnp.concatenate([p["post_wm"], p["post_ws"]], axis=-1)   # (H, POST_OUT)
    post_b = jnp.concatenate([p["post_bm"], p["post_bs"]], axis=-1)   # (1, POST_OUT)

    vec = jnp.zeros((VEC_ROWS, VEC_LANES), jnp.float32)
    vec = vec.at[ROW_PRE_W:ROW_PRE_W + HALF, :HIDDEN].set(p["pre_w"])
    vec = vec.at[ROW_PRE_B, :HIDDEN].set(p["pre_b"][0])
    vec = vec.at[ROW_POST_B, :POST_OUT].set(post_b[0])
    vec = vec.at[ROW_POST_WT:ROW_POST_WT + POST_OUT, :HIDDEN].set(post_w.T)
    for l in range(N_LAYERS):
        base = ROW_LAYER0 + l * LAYER_ROWS
        qkv_b = jnp.concatenate([bq[l], p["bk"][l], p["bv"][l]], axis=-1)[0]
        vec = vec.at[base, :3 * HIDDEN].set(qkv_b)
        vec = vec.at[base + 1, 0:HIDDEN].set(p["bo"][l][0])
        vec = vec.at[base + 1, HIDDEN:2 * HIDDEN].set(p["ln0_g"][l][0])
        vec = vec.at[base + 1, 2 * HIDDEN:3 * HIDDEN].set(p["ln0_b"][l][0])
        vec = vec.at[base + 1, 3 * HIDDEN:4 * HIDDEN].set(p["ffn_b2"][l][0])
        vec = vec.at[base + 2, 0:FILTER].set(p["ffn_b1"][l][0])
        vec = vec.at[base + 2, FILTER:FILTER + HIDDEN].set(p["ln1_g"][l][0])
        vec = vec.at[base + 2, FILTER + HIDDEN:FILTER + 2 * HIDDEN].set(p["ln1_b"][l][0])
    return qkv_w, o_w, ffn_w1, ffn_w2, vec


# --------------------------------- wrapper ------------------------------------
@functools.partial(jax.jit, static_argnames=("reverse",))
def fft_coupling_forward(x_nct, x_mask, packed, reverse=False):
    """x_nct: (B, C, T) f32 (PyTorch layout); x_mask: (B, 1, T) f32;
    packed: the result of pack_params (computed once)."""
    b, c, t = x_nct.shape
    assert (b, c, t) == (B, CHANNELS, T)
    # fold batch into the sublane axis: (B*T, C); fused into the jit
    x_flat = jnp.transpose(x_nct, (0, 2, 1)).reshape(b * t, c)
    m_flat = jnp.transpose(x_mask, (0, 2, 1)).reshape(b * t, 1)

    vspec = pl.BlockSpec(memory_space=pltpu.MemorySpace.VMEM)
    out_flat = pl.pallas_call(
        functools.partial(_coupling_kernel, reverse=reverse),
        out_shape=jax.ShapeDtypeStruct((b * t, c), jnp.float32),
        in_specs=[vspec] * (2 + len(packed)),
        out_specs=vspec,
        input_output_aliases={0: 0},          # reuse x's HBM buffer for the output
    )(x_flat, m_flat, *packed)

    return jnp.transpose(out_flat.reshape(b, t, c), (0, 2, 1))        # back to (B,C,T)


# --------------------------- pure-JAX f32 reference ---------------------------
def _ref_layer_norm(v, g, b):
    mu = jnp.mean(v, axis=-1, keepdims=True)
    var = jnp.mean(jnp.square(v - mu), axis=-1, keepdims=True)
    return (v - mu) / jnp.sqrt(var + LN_EPS) * g + b


def _ref_causal_conv(v, w, b):
    # v: (T, Cin), w: (K, Cin, Cout); causal left pad of K-1
    vp = jnp.concatenate([jnp.zeros((KSIZE - 1, v.shape[1]), v.dtype), v], axis=0)
    out = b
    for k in range(KSIZE):
        out = out + vp[k:k + v.shape[0], :] @ w[k]
    return out


def reference_forward(x_nct, x_mask, p, reverse=False):
    """Plain-jnp f32 reference of the PyTorch forward (g=None, p_dropout=0)."""
    scale = 1.0 / math.sqrt(K_CH)
    causal = jnp.tril(jnp.ones((T, T), bool))
    outs = []
    for bi in range(B):
        xb = x_nct[bi].T                       # (T, C)
        mb = x_mask[bi].T                      # (T, 1)
        x0, x1 = xb[:, :HALF], xb[:, HALF:]
        h = (x0 @ p["pre_w"] + p["pre_b"]) * mb
        e = h * mb
        for l in range(N_LAYERS):
            q_all = e @ p["wq"][l] + p["bq"][l]
            k_all = e @ p["wk"][l] + p["bk"][l]
            v_all = e @ p["wv"][l] + p["bv"][l]
            heads = []
            for hd in range(N_HEADS):
                sl = slice(hd * K_CH, (hd + 1) * K_CH)
                sc = (q_all[:, sl] * scale) @ k_all[:, sl].T
                sc = jnp.where(causal, sc, MASK_FILL)
                heads.append(jax.nn.softmax(sc, axis=-1) @ v_all[:, sl])
            y = jnp.concatenate(heads, axis=-1) @ p["wo"][l] + p["bo"][l]
            e = _ref_layer_norm(e + y, p["ln0_g"][l], p["ln0_b"][l])
            f = _ref_causal_conv(e * mb, p["ffn_w1"][l], p["ffn_b1"][l])
            f = jnp.maximum(f, 0.0)
            f = _ref_causal_conv(f * mb, p["ffn_w2"][l], p["ffn_b2"][l]) * mb
            e = _ref_layer_norm(e + f, p["ln1_g"][l], p["ln1_b"][l])
        e = e * mb
        hs = e + h
        stats = (hs @ jnp.concatenate([p["post_wm"], p["post_ws"]], axis=-1)
                 + jnp.concatenate([p["post_bm"], p["post_bs"]], axis=-1)) * mb
        m, logs = stats[:, :HALF], stats[:, HALF:]
        if not reverse:
            x1n = m + x1 * jnp.exp(logs) * mb
        else:
            x1n = (x1 - m) * jnp.exp(-logs) * mb
        outs.append(jnp.concatenate([x0, x1n], axis=-1).T)
    return jnp.stack(outs, axis=0)


# ------------------------------ parameter init --------------------------------
def init_params(key):
    ks = iter(jax.random.split(key, 24))

    def rnd(shape, scale=0.2):
        return (scale * jax.random.normal(next(ks), shape)).astype(jnp.float32)

    return {
        "pre_w": rnd((HALF, HIDDEN)),
        "pre_b": rnd((1, HIDDEN), 0.05),
        "wq": rnd((N_LAYERS, HIDDEN, HIDDEN)),
        "bq": rnd((N_LAYERS, 1, HIDDEN), 0.02),
        "wk": rnd((N_LAYERS, HIDDEN, HIDDEN)),
        "bk": rnd((N_LAYERS, 1, HIDDEN), 0.02),
        "wv": rnd((N_LAYERS, HIDDEN, HIDDEN)),
        "bv": rnd((N_LAYERS, 1, HIDDEN), 0.02),
        "wo": rnd((N_LAYERS, HIDDEN, HIDDEN)),
        "bo": rnd((N_LAYERS, 1, HIDDEN), 0.02),
        "ln0_g": jnp.ones((N_LAYERS, 1, HIDDEN), jnp.float32),
        "ln0_b": jnp.zeros((N_LAYERS, 1, HIDDEN), jnp.float32),
        "ffn_w1": rnd((N_LAYERS, KSIZE, HIDDEN, FILTER), 0.1),
        "ffn_b1": rnd((N_LAYERS, 1, FILTER), 0.02),
        "ffn_w2": rnd((N_LAYERS, KSIZE, FILTER, HIDDEN), 0.1),
        "ffn_b2": rnd((N_LAYERS, 1, HIDDEN), 0.02),
        "ln1_g": jnp.ones((N_LAYERS, 1, HIDDEN), jnp.float32),
        "ln1_b": jnp.zeros((N_LAYERS, 1, HIDDEN), jnp.float32),
        # self.post is zero-initialized in the PyTorch module __init__
        "post_wm": jnp.zeros((HIDDEN, HALF), jnp.float32),
        "post_bm": jnp.zeros((1, HALF), jnp.float32),
        "post_ws": jnp.zeros((HIDDEN, HALF), jnp.float32),
        "post_bs": jnp.zeros((1, HALF), jnp.float32),
    }


# ----------------------------------- main --------------------------------------
if __name__ == "__main__":
    key = jax.random.PRNGKey(0)
    k_x, k_p, k_post = jax.random.split(key, 3)

    x = jax.random.normal(k_x, (B, CHANNELS, T), jnp.float32)           # NCT layout
    lengths = jnp.array([T, T - 4], jnp.int32)
    x_mask = (jnp.arange(T)[None, None, :] < lengths[:, None, None]).astype(
        jnp.float32)                                                    # (B, 1, T)

    params = init_params(k_p)
    packed = pack_params(params)            # packed ONCE (hoisted off hot path)

    # (1) faithful config: post is zero-initialized => m = 0, logs = 0, so the
    #     flow output must be exactly [x0, x1 * mask] (forward and inverse).
    out = jax.block_until_ready(fft_coupling_forward(x, x_mask, packed))
    assert out.shape == (B, CHANNELS, T), out.shape
    expected_x1 = x[:, HALF:, :] * x_mask
    assert bool(jnp.allclose(out[:, :HALF, :], x[:, :HALF, :], atol=1e-6))
    assert bool(jnp.allclose(out[:, HALF:, :], expected_x1, atol=1e-6))
    out_r = jax.block_until_ready(
        fft_coupling_forward(x, x_mask, packed, reverse=True))
    assert bool(jnp.allclose(out_r[:, HALF:, :], expected_x1, atol=1e-6))

    # (2) non-zero post weights: exercise the full encoder/post datapath and
    #     validate against the pure-JAX f32 reference (kernel uses bf16 matmuls
    #     + approx softmax reciprocal -> loose tolerance).
    p2 = dict(params)
    p2["post_wm"] = 0.10 * jax.random.normal(k_post, (HIDDEN, HALF), jnp.float32)
    p2["post_ws"] = 0.05 * jax.random.normal(jax.random.fold_in(k_post, 1),
                                             (HIDDEN, HALF), jnp.float32)
    p2["post_bm"] = jnp.full((1, HALF), 0.01, jnp.float32)
    p2["post_bs"] = jnp.full((1, HALF), -0.01, jnp.float32)
    packed2 = pack_params(p2)
    out2 = jax.block_until_ready(fft_coupling_forward(x, x_mask, packed2))
    assert out2.shape == (B, CHANNELS, T)
    assert bool(jnp.all(jnp.isfinite(out2)))
    ref2 = reference_forward(x, x_mask, p2)
    max_diff = float(jnp.max(jnp.abs(out2 - ref2)))
    assert max_diff < 0.15, f"kernel vs reference mismatch: max|diff|={max_diff}"

    # (3) forward -> inverse round trip recovers x1 * mask.
    rt = jax.block_until_ready(
        fft_coupling_forward(out2, x_mask, packed2, reverse=True))
    assert bool(jnp.allclose(rt[:, HALF:, :], expected_x1, atol=1e-4))

    print("KERNEL_OK")
</pallas_src>

<mosaic_0001>
module attributes {stable_mosaic.version = 11 : i64} {
  func.func @_coupling_kernel(%arg0: memref<32x4xf32, #tpu.memory_space<vmem>>, %arg1: memref<32x1xf32, #tpu.memory_space<vmem>>, %arg2: memref<2x32x96xbf16, #tpu.memory_space<vmem>>, %arg3: memref<2x32x32xbf16, #tpu.memory_space<vmem>>, %arg4: memref<6x32x64xbf16, #tpu.memory_space<vmem>>, %arg5: memref<6x64x32xbf16, #tpu.memory_space<vmem>>, %arg6: memref<14x128xf32, #tpu.memory_space<vmem>>, %arg7: memref<32x4xf32, #tpu.memory_space<vmem>>) attributes {dimension_semantics = [], scalar_prefetch = 0 : i64, scratch_operands = 0 : i64, tpu.core_type = #tpu.core_type<tc>} {
    %c0 = arith.constant 0 : index
    %c0_0 = arith.constant 0 : index
    %0 = vector.load %arg0[%c0, %c0_0] : memref<32x4xf32, #tpu.memory_space<vmem>>, vector<32x4xf32>
    %c0_1 = arith.constant 0 : index
    %c0_2 = arith.constant 0 : index
    %1 = vector.load %arg1[%c0_1, %c0_2] : memref<32x1xf32, #tpu.memory_space<vmem>>, vector<32x1xf32>
    %c0_3 = arith.constant 0 : index
    %c0_4 = arith.constant 0 : index
    %2 = vector.load %arg6[%c0_3, %c0_4] : memref<14x128xf32, #tpu.memory_space<vmem>>, vector<14x128xf32>
    %3 = vector.extract_strided_slice %0 {offsets = [0, 0], sizes = [32, 2], strides = [1, 1]} : vector<32x4xf32> to vector<32x2xf32>
    %4 = vector.extract_strided_slice %0 {offsets = [0, 2], sizes = [32, 2], strides = [1, 1]} : vector<32x4xf32> to vector<32x2xf32>
    %5 = tpu.iota {dimensions = array<i32: 0>} : vector<16x16xi32>
    %6 = tpu.iota {dimensions = array<i32: 1>} : vector<16x16xi32>
    %7 = arith.cmpi sle, %6, %5 : vector<16x16xi32>
    %8 = tpu.iota {dimensions = array<i32: 0>} : vector<32x1xi32>
    %c16_i32 = arith.constant 16 : i32
    %c0_i32 = arith.constant 0 : i32
    %9 = arith.cmpi eq, %c16_i32, %c0_i32 : i32
    %c1_i32 = arith.constant 1 : i32
    %10 = arith.select %9, %c1_i32, %c16_i32 : i32
    %11 = vector.broadcast %10 : i32 to vector<32x1xi32>
    %12 = arith.remsi %8, %11 : vector<32x1xi32>
    %c0_i32_5 = arith.constant 0 : i32
    %13 = vector.broadcast %c0_i32_5 : i32 to vector<32x1xi32>
    %14 = arith.cmpi ne, %12, %13 : vector<32x1xi32>
    %c0_i32_6 = arith.constant 0 : i32
    %15 = vector.broadcast %c0_i32_6 : i32 to vector<32x1xi32>
    %16 = arith.cmpi slt, %12, %15 : vector<32x1xi32>
    %c0_i32_7 = arith.constant 0 : i32
    %17 = arith.cmpi slt, %10, %c0_i32_7 : i32
    %18 = vector.broadcast %17 : i1 to vector<32x1xi1>
    %19 = vector.broadcast %18 : vector<32x1xi1> to vector<32x1xi1>
    %20 = arith.xori %16, %19 : vector<32x1xi1>
    %21 = arith.andi %20, %14 : vector<32x1xi1>
    %22 = vector.broadcast %10 : i32 to vector<32x1xi32>
    %23 = arith.addi %12, %22 : vector<32x1xi32>
    %24 = arith.select %21, %23, %12 : vector<32x1xi1>, vector<32x1xi32>
    %c1_i32_8 = arith.constant 1 : i32
    %25 = vector.broadcast %c1_i32_8 : i32 to vector<32x1xi32>
    %26 = arith.cmpi sge, %24, %25 : vector<32x1xi32>
    %c2_i32 = arith.constant 2 : i32
    %27 = vector.broadcast %c2_i32 : i32 to vector<32x1xi32>
    %28 = arith.cmpi sge, %24, %27 : vector<32x1xi32>
    %29 = vector.extract_strided_slice %2 {offsets = [0, 0], sizes = [2, 32], strides = [1, 1]} : vector<14x128xf32> to vector<2x32xf32>
    %30 = vector.extract_strided_slice %2 {offsets = [2, 0], sizes = [1, 32], strides = [1, 1]} : vector<14x128xf32> to vector<1x32xf32>
    %31 = vector.extract_strided_slice %3 {offsets = [0, 0], sizes = [32, 1], strides = [1, 1]} : vector<32x2xf32> to vector<32x1xf32>
    %32 = vector.extract_strided_slice %29 {offsets = [0, 0], sizes = [1, 32], strides = [1, 1]} : vector<2x32xf32> to vector<1x32xf32>
    %33 = vector.broadcast %31 : vector<32x1xf32> to vector<32x32xf32>
    %34 = vector.broadcast %32 : vector<1x32xf32> to vector<32x32xf32>
    %35 = arith.mulf %33, %34 : vector<32x32xf32>
    %36 = vector.extract_strided_slice %3 {offsets = [0, 1], sizes = [32, 1], strides = [1, 1]} : vector<32x2xf32> to vector<32x1xf32>
    %37 = vector.extract_strided_slice %29 {offsets = [1, 0], sizes = [1, 32], strides = [1, 1]} : vector<2x32xf32> to vector<1x32xf32>
    %38 = vector.broadcast %36 : vector<32x1xf32> to vector<32x32xf32>
    %39 = vector.broadcast %37 : vector<1x32xf32> to vector<32x32xf32>
    %40 = arith.mulf %38, %39 : vector<32x32xf32>
    %41 = arith.addf %35, %40 : vector<32x32xf32>
    %42 = vector.broadcast %30 : vector<1x32xf32> to vector<32x32xf32>
    %43 = arith.addf %41, %42 : vector<32x32xf32>
    %44 = vector.broadcast %1 : vector<32x1xf32> to vector<32x32xf32>
    %45 = arith.mulf %43, %44 : vector<32x32xf32>
    %46 = vector.extract_strided_slice %2 {offsets = [8, 0], sizes = [1, 96], strides = [1, 1]} : vector<14x128xf32> to vector<1x96xf32>
    %47 = vector.extract_strided_slice %2 {offsets = [9, 0], sizes = [1, 32], strides = [1, 1]} : vector<14x128xf32> to vector<1x32xf32>
    %48 = vector.extract_strided_slice %2 {offsets = [9, 32], sizes = [1, 32], strides = [1, 1]} : vector<14x128xf32> to vector<1x32xf32>
    %49 = vector.extract_strided_slice %2 {offsets = [9, 64], sizes = [1, 32], strides = [1, 1]} : vector<14x128xf32> to vector<1x32xf32>
    %50 = vector.extract_strided_slice %2 {offsets = [9, 96], sizes = [1, 32], strides = [1, 1]} : vector<14x128xf32> to vector<1x32xf32>
    %51 = vector.extract_strided_slice %2 {offsets = [10, 0], sizes = [1, 64], strides = [1, 1]} : vector<14x128xf32> to vector<1x64xf32>
    %52 = vector.extract_strided_slice %2 {offsets = [10, 64], sizes = [1, 32], strides = [1, 1]} : vector<14x128xf32> to vector<1x32xf32>
    %53 = vector.extract_strided_slice %2 {offsets = [10, 96], sizes = [1, 32], strides = [1, 1]} : vector<14x128xf32> to vector<1x32xf32>
    %54 = arith.truncf %45 : vector<32x32xf32> to vector<32x32xbf16>
    %c0_9 = arith.constant 0 : index
    %c0_10 = arith.constant 0 : index
    %c0_11 = arith.constant 0 : index
    %55 = vector.load %arg2[%c0_9, %c0_10, %c0_11] : memref<2x32x96xbf16, #tpu.memory_space<vmem>>, vector<1x32x96xbf16>
    %56 = vector.shape_cast %55 : vector<1x32x96xbf16> to vector<32x96xbf16>
    %cst = arith.constant dense<0.000000e+00> : vector<32x96xf32>
    %57 = tpu.matmul %54, %56, %cst {dimension_numbers = #tpu.dot_dimension_numbers<[1], [0], [0], [1], [0, 0, 1, 1], [], []>} : vector<32x32xbf16>, vector<32x96xbf16>, vector<32x96xf32> -> vector<32x96xf32>
    %58 = vector.broadcast %46 : vector<1x96xf32> to vector<32x96xf32>
    %59 = arith.addf %57, %58 : vector<32x96xf32>
    %c0_12 = arith.constant 0 : index
    %c0_13 = arith.constant 0 : index
    %c0_14 = arith.constant 0 : index
    %60 = vector.load %arg3[%c0_12, %c0_13, %c0_14] : memref<2x32x32xbf16, #tpu.memory_space<vmem>>, vector<1x32x32xbf16>
    %61 = vector.shape_cast %60 : vector<1x32x32xbf16> to vector<32x32xbf16>
    %62 = vector.extract_strided_slice %59 {offsets = [0, 0], sizes = [16, 16], strides = [1, 1]} : vector<32x96xf32> to vector<16x16xf32>
    %63 = vector.extract_strided_slice %59 {offsets = [0, 32], sizes = [16, 16], strides = [1, 1]} : vector<32x96xf32> to vector<16x16xf32>
    %64 = vector.extract_strided_slice %59 {offsets = [0, 64], sizes = [16, 16], strides = [1, 1]} : vector<32x96xf32> to vector<16x16xf32>
    %65 = arith.truncf %62 : vector<16x16xf32> to vector<16x16xbf16>
    %66 = arith.truncf %63 : vector<16x16xf32> to vector<16x16xbf16>
    %cst_15 = arith.constant dense<0.000000e+00> : vector<16x16xf32>
    %67 = tpu.matmul %65, %66, %cst_15 {dimension_numbers = #tpu.dot_dimension_numbers<[1], [1], [0], [0], [0, 0, 1, 0], [], []>} : vector<16x16xbf16>, vector<16x16xbf16>, vector<16x16xf32> -> vector<16x16xf32>
    %cst_16 = arith.constant -1.000000e+04 : f32
    %68 = vector.broadcast %cst_16 : f32 to vector<16x16xf32>
    %69 = arith.select %7, %67, %68 : vector<16x16xi1>, vector<16x16xf32>
    %cst_17 = arith.constant dense<0xFF800000> : vector<16xf32>
    %70 = vector.multi_reduction <maximumf>, %69, %cst_17 [1] : vector<16x16xf32> to vector<16xf32>
    %71 = vector.shape_cast %70 : vector<16xf32> to vector<16x1xf32>
    %72 = vector.broadcast %71 : vector<16x1xf32> to vector<16x16xf32>
    %73 = arith.subf %69, %72 : vector<16x16xf32>
    %74 = math.exp %73 : vector<16x16xf32>
    %cst_18 = arith.constant dense<0.000000e+00> : vector<16xf32>
    %75 = vector.multi_reduction <add>, %74, %cst_18 [1] : vector<16x16xf32> to vector<16xf32>
    %76 = vector.shape_cast %75 : vector<16xf32> to vector<16x1xf32>
    %77 = tpu.reciprocal %76 {approx = true} : vector<16x1xf32> -> vector<16x1xf32>
    %78 = vector.broadcast %77 : vector<16x1xf32> to vector<16x16xf32>
    %79 = arith.mulf %74, %78 : vector<16x16xf32>
    %80 = arith.truncf %79 : vector<16x16xf32> to vector<16x16xbf16>
    %81 = arith.truncf %64 : vector<16x16xf32> to vector<16x16xbf16>
    %cst_19 = arith.constant dense<0.000000e+00> : vector<16x16xf32>
    %82 = tpu.matmul %80, %81, %cst_19 {dimension_numbers = #tpu.dot_dimension_numbers<[1], [0], [0], [1], [0, 0, 1, 1], [], []>} : vector<16x16xbf16>, vector<16x16xbf16>, vector<16x16xf32> -> vector<16x16xf32>
    %83 = arith.truncf %82 : vector<16x16xf32> to vector<16x16xbf16>
    %84 = vector.extract_strided_slice %61 {offsets = [0, 0], sizes = [16, 32], strides = [1, 1]} : vector<32x32xbf16> to vector<16x32xbf16>
    %cst_20 = arith.constant dense<0.000000e+00> : vector<16x32xf32>
    %85 = tpu.matmul %83, %84, %cst_20 {dimension_numbers = #tpu.dot_dimension_numbers<[1], [0], [0], [1], [0, 0, 1, 1], [], []>} : vector<16x16xbf16>, vector<16x32xbf16>, vector<16x32xf32> -> vector<16x32xf32>
    %86 = vector.extract_strided_slice %59 {offsets = [0, 16], sizes = [16, 16], strides = [1, 1]} : vector<32x96xf32> to vector<16x16xf32>
    %87 = vector.extract_strided_slice %59 {offsets = [0, 48], sizes = [16, 16], strides = [1, 1]} : vector<32x96xf32> to vector<16x16xf32>
    %88 = vector.extract_strided_slice %59 {offsets = [0, 80], sizes = [16, 16], strides = [1, 1]} : vector<32x96xf32> to vector<16x16xf32>
    %89 = arith.truncf %86 : vector<16x16xf32> to vector<16x16xbf16>
    %90 = arith.truncf %87 : vector<16x16xf32> to vector<16x16xbf16>
    %cst_21 = arith.constant dense<0.000000e+00> : vector<16x16xf32>
    %91 = tpu.matmul %89, %90, %cst_21 {dimension_numbers = #tpu.dot_dimension_numbers<[1], [1], [0], [0], [0, 0, 1, 0], [], []>} : vector<16x16xbf16>, vector<16x16xbf16>, vector<16x16xf32> -> vector<16x16xf32>
    %cst_22 = arith.constant -1.000000e+04 : f32
    %92 = vector.broadcast %cst_22 : f32 to vector<16x16xf32>
    %93 = arith.select %7, %91, %92 : vector<16x16xi1>, vector<16x16xf32>
    %cst_23 = arith.constant dense<0xFF800000> : vector<16xf32>
    %94 = vector.multi_reduction <maximumf>, %93, %cst_23 [1] : vector<16x16xf32> to vector<16xf32>
    %95 = vector.shape_cast %94 : vector<16xf32> to vector<16x1xf32>
    %96 = vector.broadcast %95 : vector<16x1xf32> to vector<16x16xf32>
    %97 = arith.subf %93, %96 : vector<16x16xf32>
    %98 = math.exp %97 : vector<16x16xf32>
    %cst_24 = arith.constant dense<0.000000e+00> : vector<16xf32>
    %99 = vector.multi_reduction <add>, %98, %cst_24 [1] : vector<16x16xf32> to vector<16xf32>
    %100 = vector.shape_cast %99 : vector<16xf32> to vector<16x1xf32>
    %101 = tpu.reciprocal %100 {approx = true} : vector<16x1xf32> -> vector<16x1xf32>
    %102 = vector.broadcast %101 : vector<16x1xf32> to vector<16x16xf32>
    %103 = arith.mulf %98, %102 : vector<16x16xf32>
    %104 = arith.truncf %103 : vector<16x16xf32> to vector<16x16xbf16>
    %105 = arith.truncf %88 : vector<16x16xf32> to vector<16x16xbf16>
    %cst_25 = arith.constant dense<0.000000e+00> : vector<16x16xf32>
    %106 = tpu.matmul %104, %105, %cst_25 {dimension_numbers = #tpu.dot_dimension_numbers<[1], [0], [0], [1], [0, 0, 1, 1], [], []>} : vector<16x16xbf16>, vector<16x16xbf16>, vector<16x16xf32> -> vector<16x16xf32>
    %107 = arith.truncf %106 : vector<16x16xf32> to vector<16x16xbf16>
    %108 = vector.extract_strided_slice %61 {offsets = [16, 0], sizes = [16, 32], strides = [1, 1]} : vector<32x32xbf16> to vector<16x32xbf16>
    %cst_26 = arith.constant dense<0.000000e+00> : vector<16x32xf32>
    %109 = tpu.matmul %107, %108, %cst_26 {dimension_numbers = #tpu.dot_dimension_numbers<[1], [0], [0], [1], [0, 0, 1, 1], [], []>} : vector<16x16xbf16>, vector<16x32xbf16>, vector<16x32xf32> -> vector<16x32xf32>
    %110 = arith.addf %85, %109 : vector<16x32xf32>
    %111 = vector.extract_strided_slice %59 {offsets = [16, 0], sizes = [16, 16], strides = [1, 1]} : vector<32x96xf32> to vector<16x16xf32>
    %112 = vector.extract_strided_slice %59 {offsets = [16, 32], sizes = [16, 16], strides = [1, 1]} : vector<32x96xf32> to vector<16x16xf32>
    %113 = vector.extract_strided_slice %59 {offsets = [16, 64], sizes = [16, 16], strides = [1, 1]} : vector<32x96xf32> to vector<16x16xf32>
    %114 = arith.truncf %111 : vector<16x16xf32> to vector<16x16xbf16>
    %115 = arith.truncf %112 : vector<16x16xf32> to vector<16x16xbf16>
    %cst_27 = arith.constant dense<0.000000e+00> : vector<16x16xf32>
    %116 = tpu.matmul %114, %115, %cst_27 {dimension_numbers = #tpu.dot_dimension_numbers<[1], [1], [0], [0], [0, 0, 1, 0], [], []>} : vector<16x16xbf16>, vector<16x16xbf16>, vector<16x16xf32> -> vector<16x16xf32>
    %cst_28 = arith.constant -1.000000e+04 : f32
    %117 = vector.broadcast %cst_28 : f32 to vector<16x16xf32>
    %118 = arith.select %7, %116, %117 : vector<16x16xi1>, vector<16x16xf32>
    %cst_29 = arith.constant dense<0xFF800000> : vector<16xf32>
    %119 = vector.multi_reduction <maximumf>, %118, %cst_29 [1] : vector<16x16xf32> to vector<16xf32>
    %120 = vector.shape_cast %119 : vector<16xf32> to vector<16x1xf32>
    %121 = vector.broadcast %120 : vector<16x1xf32> to vector<16x16xf32>
    %122 = arith.subf %118, %121 : vector<16x16xf32>
    %123 = math.exp %122 : vector<16x16xf32>
    %cst_30 = arith.constant dense<0.000000e+00> : vector<16xf32>
    %124 = vector.multi_reduction <add>, %123, %cst_30 [1] : vector<16x16xf32> to vector<16xf32>
    %125 = vector.shape_cast %124 : vector<16xf32> to vector<16x1xf32>
    %126 = tpu.reciprocal %125 {approx = true} : vector<16x1xf32> -> vector<16x1xf32>
    %127 = vector.broadcast %126 : vector<16x1xf32> to vector<16x16xf32>
    %128 = arith.mulf %123, %127 : vector<16x16xf32>
    %129 = arith.truncf %128 : vector<16x16xf32> to vector<16x16xbf16>
    %130 = arith.truncf %113 : vector<16x16xf32> to vector<16x16xbf16>
    %cst_31 = arith.constant dense<0.000000e+00> : vector<16x16xf32>
    %131 = tpu.matmul %129, %130, %cst_31 {dimension_numbers = #tpu.dot_dimension_numbers<[1], [0], [0], [1], [0, 0, 1, 1], [], []>} : vector<16x16xbf16>, vector<16x16xbf16>, vector<16x16xf32> -> vector<16x16xf32>
    %132 = arith.truncf %131 : vector<16x16xf32> to vector<16x16xbf16>
    %133 = vector.extract_strided_slice %61 {offsets = [0, 0], sizes = [16, 32], strides = [1, 1]} : vector<32x32xbf16> to vector<16x32xbf16>
    %cst_32 = arith.constant dense<0.000000e+00> : vector<16x32xf32>
    %134 = tpu.matmul %132, %133, %cst_32 {dimension_numbers = #tpu.dot_dimension_numbers<[1], [0], [0], [1], [0, 0, 1, 1], [], []>} : vector<16x16xbf16>, vector<16x32xbf16>, vector<16x32xf32> -> vector<16x32xf32>
    %135 = vector.extract_strided_slice %59 {offsets = [16, 16], sizes = [16, 16], strides = [1, 1]} : vector<32x96xf32> to vector<16x16xf32>
    %136 = vector.extract_strided_slice %59 {offsets = [16, 48], sizes = [16, 16], strides = [1, 1]} : vector<32x96xf32> to vector<16x16xf32>
    %137 = vector.extract_strided_slice %59 {offsets = [16, 80], sizes = [16, 16], strides = [1, 1]} : vector<32x96xf32> to vector<16x16xf32>
    %138 = arith.truncf %135 : vector<16x16xf32> to vector<16x16xbf16>
    %139 = arith.truncf %136 : vector<16x16xf32> to vector<16x16xbf16>
    %cst_33 = arith.constant dense<0.000000e+00> : vector<16x16xf32>
    %140 = tpu.matmul %138, %139, %cst_33 {dimension_numbers = #tpu.dot_dimension_numbers<[1], [1], [0], [0], [0, 0, 1, 0], [], []>} : vector<16x16xbf16>, vector<16x16xbf16>, vector<16x16xf32> -> vector<16x16xf32>
    %cst_34 = arith.constant -1.000000e+04 : f32
    %141 = vector.broadcast %cst_34 : f32 to vector<16x16xf32>
    %142 = arith.select %7, %140, %141 : vector<16x16xi1>, vector<16x16xf32>
    %cst_35 = arith.constant dense<0xFF800000> : vector<16xf32>
    %143 = vector.multi_reduction <maximumf>, %142, %cst_35 [1] : vector<16x16xf32> to vector<16xf32>
    %144 = vector.shape_cast %143 : vector<16xf32> to vector<16x1xf32>
    %145 = vector.broadcast %144 : vector<16x1xf32> to vector<16x16xf32>
    %146 = arith.subf %142, %145 : vector<16x16xf32>
    %147 = math.exp %146 : vector<16x16xf32>
    %cst_36 = arith.constant dense<0.000000e+00> : vector<16xf32>
    %148 = vector.multi_reduction <add>, %147, %cst_36 [1] : vector<16x16xf32> to vector<16xf32>
    %149 = vector.shape_cast %148 : vector<16xf32> to vector<16x1xf32>
    %150 = tpu.reciprocal %149 {approx = true} : vector<16x1xf32> -> vector<16x1xf32>
    %151 = vector.broadcast %150 : vector<16x1xf32> to vector<16x16xf32>
    %152 = arith.mulf %147, %151 : vector<16x16xf32>
    %153 = arith.truncf %152 : vector<16x16xf32> to vector<16x16xbf16>
    %154 = arith.truncf %137 : vector<16x16xf32> to vector<16x16xbf16>
    %cst_37 = arith.constant dense<0.000000e+00> : vector<16x16xf32>
    %155 = tpu.matmul %153, %154, %cst_37 {dimension_numbers = #tpu.dot_dimension_numbers<[1], [0], [0], [1], [0, 0, 1, 1], [], []>} : vector<16x16xbf16>, vector<16x16xbf16>, vector<16x16xf32> -> vector<16x16xf32>
    %156 = arith.truncf %155 : vector<16x16xf32> to vector<16x16xbf16>
    %157 = vector.extract_strided_slice %61 {offsets = [16, 0], sizes = [16, 32], strides = [1, 1]} : vector<32x32xbf16> to vector<16x32xbf16>
    %cst_38 = arith.constant dense<0.000000e+00> : vector<16x32xf32>
    %158 = tpu.matmul %156, %157, %cst_38 {dimension_numbers = #tpu.dot_dimension_numbers<[1], [0], [0], [1], [0, 0, 1, 1], [], []>} : vector<16x16xbf16>, vector<16x32xbf16>, vector<16x32xf32> -> vector<16x32xf32>
    %159 = arith.addf %134, %158 : vector<16x32xf32>
    %160 = tpu.concatenate %110, %159 in 0 : vector<16x32xf32>, vector<16x32xf32> -> vector<32x32xf32>
    %161 = vector.broadcast %47 : vector<1x32xf32> to vector<32x32xf32>
    %162 = arith.addf %160, %161 : vector<32x32xf32>
    %163 = arith.addf %45, %162 : vector<32x32xf32>
    %cst_39 = arith.constant dense<0.000000e+00> : vector<32xf32>
    %164 = vector.multi_reduction <add>, %163, %cst_39 [1] : vector<32x32xf32> to vector<32xf32>
    %165 = vector.shape_cast %164 : vector<32xf32> to vector<32x1xf32>
    %cst_40 = arith.constant 3.200000e+01 : f32
    %166 = vector.broadcast %cst_40 : f32 to vector<32x1xf32>
    %167 = arith.divf %165, %166 : vector<32x1xf32>
    %168 = arith.mulf %163, %163 : vector<32x32xf32>
    %cst_41 = arith.constant dense<0.000000e+00> : vector<32xf32>
    %169 = vector.multi_reduction <add>, %168, %cst_41 [1] : vector<32x32xf32> to vector<32xf32>
    %170 = vector.shape_cast %169 : vector<32xf32> to vector<32x1xf32>
    %cst_42 = arith.constant 3.200000e+01 : f32
    %171 = vector.broadcast %cst_42 : f32 to vector<32x1xf32>
    %172 = arith.divf %170, %171 : vector<32x1xf32>
    %173 = arith.mulf %167, %167 : vector<32x1xf32>
    %174 = arith.subf %172, %173 : vector<32x1xf32>
    %cst_43 = arith.constant 0.000000e+00 : f32
    %175 = vector.broadcast %cst_43 : f32 to vector<32x1xf32>
    %176 = arith.maximumf %174, %175 : vector<32x1xf32>
    %177 = vector.broadcast %167 : vector<32x1xf32> to vector<32x32xf32>
    %178 = arith.subf %163, %177 : vector<32x32xf32>
    %cst_44 = arith.constant 9.99999974E-6 : f32
    %179 = vector.broadcast %cst_44 : f32 to vector<32x1xf32>
    %180 = arith.addf %176, %179 : vector<32x1xf32>
    %181 = math.rsqrt %180 : vector<32x1xf32>
    %182 = vector.broadcast %181 : vector<32x1xf32> to vector<32x32xf32>
    %183 = arith.mulf %178, %182 : vector<32x32xf32>
    %184 = vector.broadcast %48 : vector<1x32xf32> to vector<32x32xf32>
    %185 = arith.mulf %183, %184 : vector<32x32xf32>
    %186 = vector.broadcast %49 : vector<1x32xf32> to vector<32x32xf32>
    %187 = arith.addf %185, %186 : vector<32x32xf32>
    %188 = vector.broadcast %1 : vector<32x1xf32> to vector<32x32xf32>
    %189 = arith.mulf %187, %188 : vector<32x32xf32>
    %190 = arith.truncf %189 : vector<32x32xf32> to vector<32x32xbf16>
    %c2 = arith.constant 2 : index
    %c0_45 = arith.constant 0 : index
    %c0_46 = arith.constant 0 : index
    %191 = vector.load %arg4[%c2, %c0_45, %c0_46] : memref<6x32x64xbf16, #tpu.memory_space<vmem>>, vector<1x32x64xbf16>
    %192 = vector.shape_cast %191 : vector<1x32x64xbf16> to vector<32x64xbf16>
    %cst_47 = arith.constant dense<0.000000e+00> : vector<32x64xf32>
    %193 = tpu.matmul %190, %192, %cst_47 {dimension_numbers = #tpu.dot_dimension_numbers<[1], [0], [0], [1], [0, 0, 1, 1], [], []>} : vector<32x32xbf16>, vector<32x64xbf16>, vector<32x64xf32> -> vector<32x64xf32>
    %c1_i32_48 = arith.constant 1 : i32
    %194 = tpu.dynamic_rotate %189 by %c1_i32_48 dim 0 : vector<32x32xf32>, i32 -> vector<32x32xf32>
    %cst_49 = arith.constant 0.000000e+00 : f32
    %195 = vector.shape_cast %26 : vector<32x1xi1> to vector<32x1xi1>
    %196 = vector.broadcast %195 : vector<32x1xi1> to vector<32x32xi1>
    %197 = vector.broadcast %cst_49 : f32 to vector<32x32xf32>
    %198 = arith.select %196, %194, %197 : vector<32x32xi1>, vector<32x32xf32>
    %199 = arith.truncf %198 : vector<32x32xf32> to vector<32x32xbf16>
    %c1 = arith.constant 1 : index
    %c0_50 = arith.constant 0 : index
    %c0_51 = arith.constant 0 : index
    %200 = vector.load %arg4[%c1, %c0_50, %c0_51] : memref<6x32x64xbf16, #tpu.memory_space<vmem>>, vector<1x32x64xbf16>
    %201 = vector.shape_cast %200 : vector<1x32x64xbf16> to vector<32x64xbf16>
    %cst_52 = arith.constant dense<0.000000e+00> : vector<32x64xf32>
    %202 = tpu.matmul %199, %201, %cst_52 {dimension_numbers = #tpu.dot_dimension_numbers<[1], [0], [0], [1], [0, 0, 1, 1], [], []>} : vector<32x32xbf16>, vector<32x64xbf16>, vector<32x64xf32> -> vector<32x64xf32>
    %203 = arith.addf %193, %202 : vector<32x64xf32>
    %c2_i32_53 = arith.constant 2 : i32
    %204 = tpu.dynamic_rotate %189 by %c2_i32_53 dim 0 : vector<32x32xf32>, i32 -> vector<32x32xf32>
    %cst_54 = arith.constant 0.000000e+00 : f32
    %205 = vector.shape_cast %28 : vector<32x1xi1> to vector<32x1xi1>
    %206 = vector.broadcast %205 : vector<32x1xi1> to vector<32x32xi1>
    %207 = vector.broadcast %cst_54 : f32 to vector<32x32xf32>
    %208 = arith.select %206, %204, %207 : vector<32x32xi1>, vector<32x32xf32>
    %209 = arith.truncf %208 : vector<32x32xf32> to vector<32x32xbf16>
    %c0_55 = arith.constant 0 : index
    %c0_56 = arith.constant 0 : index
    %c0_57 = arith.constant 0 : index
    %210 = vector.load %arg4[%c0_55, %c0_56, %c0_57] : memref<6x32x64xbf16, #tpu.memory_space<vmem>>, vector<1x32x64xbf16>
    %211 = vector.shape_cast %210 : vector<1x32x64xbf16> to vector<32x64xbf16>
    %cst_58 = arith.constant dense<0.000000e+00> : vector<32x64xf32>
    %212 = tpu.matmul %209, %211, %cst_58 {dimension_numbers = #tpu.dot_dimension_numbers<[1], [0], [0], [1], [0, 0, 1, 1], [], []>} : vector<32x32xbf16>, vector<32x64xbf16>, vector<32x64xf32> -> vector<32x64xf32>
    %213 = arith.addf %203, %212 : vector<32x64xf32>
    %214 = vector.broadcast %51 : vector<1x64xf32> to vector<32x64xf32>
    %215 = arith.addf %213, %214 : vector<32x64xf32>
    %cst_59 = arith.constant 0.000000e+00 : f32
    %216 = vector.broadcast %cst_59 : f32 to vector<32x64xf32>
    %217 = arith.maximumf %215, %216 : vector<32x64xf32>
    %218 = vector.broadcast %1 : vector<32x1xf32> to vector<32x64xf32>
    %219 = arith.mulf %217, %218 : vector<32x64xf32>
    %220 = arith.truncf %219 : vector<32x64xf32> to vector<32x64xbf16>
    %c2_60 = arith.constant 2 : index
    %c0_61 = arith.constant 0 : index
    %c0_62 = arith.constant 0 : index
    %221 = vector.load %arg5[%c2_60, %c0_61, %c0_62] : memref<6x64x32xbf16, #tpu.memory_space<vmem>>, vector<1x64x32xbf16>
    %222 = vector.shape_cast %221 : vector<1x64x32xbf16> to vector<64x32xbf16>
    %cst_63 = arith.constant dense<0.000000e+00> : vector<32x32xf32>
    %223 = tpu.matmul %220, %222, %cst_63 {dimension_numbers = #tpu.dot_dimension_numbers<[1], [0], [0], [1], [0, 0, 1, 1], [], []>} : vector<32x64xbf16>, vector<64x32xbf16>, vector<32x32xf32> -> vector<32x32xf32>
    %c1_i32_64 = arith.constant 1 : i32
    %224 = tpu.dynamic_rotate %219 by %c1_i32_64 dim 0 : vector<32x64xf32>, i32 -> vector<32x64xf32>
    %cst_65 = arith.constant 0.000000e+00 : f32
    %225 = vector.shape_cast %26 : vector<32x1xi1> to vector<32x1xi1>
    %226 = vector.broadcast %225 : vector<32x1xi1> to vector<32x64xi1>
    %227 = vector.broadcast %cst_65 : f32 to vector<32x64xf32>
    %228 = arith.select %226, %224, %227 : vector<32x64xi1>, vector<32x64xf32>
    %229 = arith.truncf %228 : vector<32x64xf32> to vector<32x64xbf16>
    %c1_66 = arith.constant 1 : index
    %c0_67 = arith.constant 0 : index
    %c0_68 = arith.constant 0 : index
    %230 = vector.load %arg5[%c1_66, %c0_67, %c0_68] : memref<6x64x32xbf16, #tpu.memory_space<vmem>>, vector<1x64x32xbf16>
    %231 = vector.shape_cast %230 : vector<1x64x32xbf16> to vector<64x32xbf16>
    %cst_69 = arith.constant dense<0.000000e+00> : vector<32x32xf32>
    %232 = tpu.matmul %229, %231, %cst_69 {dimension_numbers = #tpu.dot_dimension_numbers<[1], [0], [0], [1], [0, 0, 1, 1], [], []>} : vector<32x64xbf16>, vector<64x32xbf16>, vector<32x32xf32> -> vector<32x32xf32>
    %233 = arith.addf %223, %232 : vector<32x32xf32>
    %c2_i32_70 = arith.constant 2 : i32
    %234 = tpu.dynamic_rotate %219 by %c2_i32_70 dim 0 : vector<32x64xf32>, i32 -> vector<32x64xf32>
    %cst_71 = arith.constant 0.000000e+00 : f32
    %235 = vector.shape_cast %28 : vector<32x1xi1> to vector<32x1xi1>
    %236 = vector.broadcast %235 : vector<32x1xi1> to vector<32x64xi1>
    %237 = vector.broadcast %cst_71 : f32 to vector<32x64xf32>
    %238 = arith.select %236, %234, %237 : vector<32x64xi1>, vector<32x64xf32>
    %239 = arith.truncf %238 : vector<32x64xf32> to vector<32x64xbf16>
    %c0_72 = arith.constant 0 : index
    %c0_73 = arith.constant 0 : index
    %c0_74 = arith.constant 0 : index
    %240 = vector.load %arg5[%c0_72, %c0_73, %c0_74] : memref<6x64x32xbf16, #tpu.memory_space<vmem>>, vector<1x64x32xbf16>
    %241 = vector.shape_cast %240 : vector<1x64x32xbf16> to vector<64x32xbf16>
    %cst_75 = arith.constant dense<0.000000e+00> : vector<32x32xf32>
    %242 = tpu.matmul %239, %241, %cst_75 {dimension_numbers = #tpu.dot_dimension_numbers<[1], [0], [0], [1], [0, 0, 1, 1], [], []>} : vector<32x64xbf16>, vector<64x32xbf16>, vector<32x32xf32> -> vector<32x32xf32>
    %243 = arith.addf %233, %242 : vector<32x32xf32>
    %244 = vector.broadcast %50 : vector<1x32xf32> to vector<32x32xf32>
    %245 = arith.addf %243, %244 : vector<32x32xf32>
    %246 = vector.broadcast %1 : vector<32x1xf32> to vector<32x32xf32>
    %247 = arith.mulf %245, %246 : vector<32x32xf32>
    %248 = arith.addf %187, %247 : vector<32x32xf32>
    %cst_76 = arith.constant dense<0.000000e+00> : vector<32xf32>
    %249 = vector.multi_reduction <add>, %248, %cst_76 [1] : vector<32x32xf32> to vector<32xf32>
    %250 = vector.shape_cast %249 : vector<32xf32> to vector<32x1xf32>
    %cst_77 = arith.constant 3.200000e+01 : f32
    %251 = vector.broadcast %cst_77 : f32 to vector<32x1xf32>
    %252 = arith.divf %250, %251 : vector<32x1xf32>
    %253 = arith.mulf %248, %248 : vector<32x32xf32>
    %cst_78 = arith.constant dense<0.000000e+00> : vector<32xf32>
    %254 = vector.multi_reduction <add>, %253, %cst_78 [1] : vector<32x32xf32> to vector<32xf32>
    %255 = vector.shape_cast %254 : vector<32xf32> to vector<32x1xf32>
    %cst_79 = arith.constant 3.200000e+01 : f32
    %256 = vector.broadcast %cst_79 : f32 to vector<32x1xf32>
    %257 = arith.divf %255, %256 : vector<32x1xf32>
    %258 = arith.mulf %252, %252 : vector<32x1xf32>
    %259 = arith.subf %257, %258 : vector<32x1xf32>
    %cst_80 = arith.constant 0.000000e+00 : f32
    %260 = vector.broadcast %cst_80 : f32 to vector<32x1xf32>
    %261 = arith.maximumf %259, %260 : vector<32x1xf32>
    %262 = vector.broadcast %252 : vector<32x1xf32> to vector<32x32xf32>
    %263 = arith.subf %248, %262 : vector<32x32xf32>
    %cst_81 = arith.constant 9.99999974E-6 : f32
    %264 = vector.broadcast %cst_81 : f32 to vector<32x1xf32>
    %265 = arith.addf %261, %264 : vector<32x1xf32>
    %266 = math.rsqrt %265 : vector<32x1xf32>
    %267 = vector.broadcast %266 : vector<32x1xf32> to vector<32x32xf32>
    %268 = arith.mulf %263, %267 : vector<32x32xf32>
    %269 = vector.broadcast %52 : vector<1x32xf32> to vector<32x32xf32>
    %270 = arith.mulf %268, %269 : vector<32x32xf32>
    %271 = vector.broadcast %53 : vector<1x32xf32> to vector<32x32xf32>
    %272 = arith.addf %270, %271 : vector<32x32xf32>
    %273 = vector.extract_strided_slice %2 {offsets = [11, 0], sizes = [1, 96], strides = [1, 1]} : vector<14x128xf32> to vector<1x96xf32>
    %274 = vector.extract_strided_slice %2 {offsets = [12, 0], sizes = [1, 32], strides = [1, 1]} : vector<14x128xf32> to vector<1x32xf32>
    %275 = vector.extract_strided_slice %2 {offsets = [12, 32], sizes = [1, 32], strides = [1, 1]} : vector<14x128xf32> to vector<1x32xf32>
    %276 = vector.extract_strided_slice %2 {offsets = [12, 64], sizes = [1, 32], strides = [1, 1]} : vector<14x128xf32> to vector<1x32xf32>
    %277 = vector.extract_strided_slice %2 {offsets = [12, 96], sizes = [1, 32], strides = [1, 1]} : vector<14x128xf32> to vector<1x32xf32>
    %278 = vector.extract_strided_slice %2 {offsets = [13, 0], sizes = [1, 64], strides = [1, 1]} : vector<14x128xf32> to vector<1x64xf32>
    %279 = vector.extract_strided_slice %2 {offsets = [13, 64], sizes = [1, 32], strides = [1, 1]} : vector<14x128xf32> to vector<1x32xf32>
    %280 = vector.extract_strided_slice %2 {offsets = [13, 96], sizes = [1, 32], strides = [1, 1]} : vector<14x128xf32> to vector<1x32xf32>
    %281 = arith.truncf %272 : vector<32x32xf32> to vector<32x32xbf16>
    %c1_82 = arith.constant 1 : index
    %c0_83 = arith.constant 0 : index
    %c0_84 = arith.constant 0 : index
    %282 = vector.load %arg2[%c1_82, %c0_83, %c0_84] : memref<2x32x96xbf16, #tpu.memory_space<vmem>>, vector<1x32x96xbf16>
    %283 = vector.shape_cast %282 : vector<1x32x96xbf16> to vector<32x96xbf16>
    %cst_85 = arith.constant dense<0.000000e+00> : vector<32x96xf32>
    %284 = tpu.matmul %281, %283, %cst_85 {dimension_numbers = #tpu.dot_dimension_numbers<[1], [0], [0], [1], [0, 0, 1, 1], [], []>} : vector<32x32xbf16>, vector<32x96xbf16>, vector<32x96xf32> -> vector<32x96xf32>
    %285 = vector.broadcast %273 : vector<1x96xf32> to vector<32x96xf32>
    %286 = arith.addf %284, %285 : vector<32x96xf32>
    %c1_86 = arith.constant 1 : index
    %c0_87 = arith.constant 0 : index
    %c0_88 = arith.constant 0 : index
    %287 = vector.load %arg3[%c1_86, %c0_87, %c0_88] : memref<2x32x32xbf16, #tpu.memory_space<vmem>>, vector<1x32x32xbf16>
    %288 = vector.shape_cast %287 : vector<1x32x32xbf16> to vector<32x32xbf16>
    %289 = vector.extract_strided_slice %286 {offsets = [0, 0], sizes = [16, 16], strides = [1, 1]} : vector<32x96xf32> to vector<16x16xf32>
    %290 = vector.extract_strided_slice %286 {offsets = [0, 32], sizes = [16, 16], strides = [1, 1]} : vector<32x96xf32> to vector<16x16xf32>
    %291 = vector.extract_strided_slice %286 {offsets = [0, 64], sizes = [16, 16], strides = [1, 1]} : vector<32x96xf32> to vector<16x16xf32>
    %292 = arith.truncf %289 : vector<16x16xf32> to vector<16x16xbf16>
    %293 = arith.truncf %290 : vector<16x16xf32> to vector<16x16xbf16>
    %cst_89 = arith.constant dense<0.000000e+00> : vector<16x16xf32>
    %294 = tpu.matmul %292, %293, %cst_89 {dimension_numbers = #tpu.dot_dimension_numbers<[1], [1], [0], [0], [0, 0, 1, 0], [], []>} : vector<16x16xbf16>, vector<16x16xbf16>, vector<16x16xf32> -> vector<16x16xf32>
    %cst_90 = arith.constant -1.000000e+04 : f32
    %295 = vector.broadcast %cst_90 : f32 to vector<16x16xf32>
    %296 = arith.select %7, %294, %295 : vector<16x16xi1>, vector<16x16xf32>
    %cst_91 = arith.constant dense<0xFF800000> : vector<16xf32>
    %297 = vector.multi_reduction <maximumf>, %296, %cst_91 [1] : vector<16x16xf32> to vector<16xf32>
    %298 = vector.shape_cast %297 : vector<16xf32> to vector<16x1xf32>
    %299 = vector.broadcast %298 : vector<16x1xf32> to vector<16x16xf32>
    %300 = arith.subf %296, %299 : vector<16x16xf32>
    %301 = math.exp %300 : vector<16x16xf32>
    %cst_92 = arith.constant dense<0.000000e+00> : vector<16xf32>
    %302 = vector.multi_reduction <add>, %301, %cst_92 [1] : vector<16x16xf32> to vector<16xf32>
    %303 = vector.shape_cast %302 : vector<16xf32> to vector<16x1xf32>
    %304 = tpu.reciprocal %303 {approx = true} : vector<16x1xf32> -> vector<16x1xf32>
    %305 = vector.broadcast %304 : vector<16x1xf32> to vector<16x16xf32>
    %306 = arith.mulf %301, %305 : vector<16x16xf32>
    %307 = arith.truncf %306 : vector<16x16xf32> to vector<16x16xbf16>
    %308 = arith.truncf %291 : vector<16x16xf32> to vector<16x16xbf16>
    %cst_93 = arith.constant dense<0.000000e+00> : vector<16x16xf32>
    %309 = tpu.matmul %307, %308, %cst_93 {dimension_numbers = #tpu.dot_dimension_numbers<[1], [0], [0], [1], [0, 0, 1, 1], [], []>} : vector<16x16xbf16>, vector<16x16xbf16>, vector<16x16xf32> -> vector<16x16xf32>
    %310 = arith.truncf %309 : vector<16x16xf32> to vector<16x16xbf16>
    %311 = vector.extract_strided_slice %288 {offsets = [0, 0], sizes = [16, 32], strides = [1, 1]} : vector<32x32xbf16> to vector<16x32xbf16>
    %cst_94 = arith.constant dense<0.000000e+00> : vector<16x32xf32>
    %312 = tpu.matmul %310, %311, %cst_94 {dimension_numbers = #tpu.dot_dimension_numbers<[1], [0], [0], [1], [0, 0, 1, 1], [], []>} : vector<16x16xbf16>, vector<16x32xbf16>, vector<16x32xf32> -> vector<16x32xf32>
    %313 = vector.extract_strided_slice %286 {offsets = [0, 16], sizes = [16, 16], strides = [1, 1]} : vector<32x96xf32> to vector<16x16xf32>
    %314 = vector.extract_strided_slice %286 {offsets = [0, 48], sizes = [16, 16], strides = [1, 1]} : vector<32x96xf32> to vector<16x16xf32>
    %315 = vector.extract_strided_slice %286 {offsets = [0, 80], sizes = [16, 16], strides = [1, 1]} : vector<32x96xf32> to vector<16x16xf32>
    %316 = arith.truncf %313 : vector<16x16xf32> to vector<16x16xbf16>
    %317 = arith.truncf %314 : vector<16x16xf32> to vector<16x16xbf16>
    %cst_95 = arith.constant dense<0.000000e+00> : vector<16x16xf32>
    %318 = tpu.matmul %316, %317, %cst_95 {dimension_numbers = #tpu.dot_dimension_numbers<[1], [1], [0], [0], [0, 0, 1, 0], [], []>} : vector<16x16xbf16>, vector<16x16xbf16>, vector<16x16xf32> -> vector<16x16xf32>
    %cst_96 = arith.constant -1.000000e+04 : f32
    %319 = vector.broadcast %cst_96 : f32 to vector<16x16xf32>
    %320 = arith.select %7, %318, %319 : vector<16x16xi1>, vector<16x16xf32>
    %cst_97 = arith.constant dense<0xFF800000> : vector<16xf32>
    %321 = vector.multi_reduction <maximumf>, %320, %cst_97 [1] : vector<16x16xf32> to vector<16xf32>
    %322 = vector.shape_cast %321 : vector<16xf32> to vector<16x1xf32>
    %323 = vector.broadcast %322 : vector<16x1xf32> to vector<16x16xf32>
    %324 = arith.subf %320, %323 : vector<16x16xf32>
    %325 = math.exp %324 : vector<16x16xf32>
    %cst_98 = arith.constant dense<0.000000e+00> : vector<16xf32>
    %326 = vector.multi_reduction <add>, %325, %cst_98 [1] : vector<16x16xf32> to vector<16xf32>
    %327 = vector.shape_cast %326 : vector<16xf32> to vector<16x1xf32>
    %328 = tpu.reciprocal %327 {approx = true} : vector<16x1xf32> -> vector<16x1xf32>
    %329 = vector.broadcast %328 : vector<16x1xf32> to vector<16x16xf32>
    %330 = arith.mulf %325, %329 : vector<16x16xf32>
    %331 = arith.truncf %330 : vector<16x16xf32> to vector<16x16xbf16>
    %332 = arith.truncf %315 : vector<16x16xf32> to vector<16x16xbf16>
    %cst_99 = arith.constant dense<0.000000e+00> : vector<16x16xf32>
    %333 = tpu.matmul %331, %332, %cst_99 {dimension_numbers = #tpu.dot_dimension_numbers<[1], [0], [0], [1], [0, 0, 1, 1], [], []>} : vector<16x16xbf16>, vector<16x16xbf16>, vector<16x16xf32> -> vector<16x16xf32>
    %334 = arith.truncf %333 : vector<16x16xf32> to vector<16x16xbf16>
    %335 = vector.extract_strided_slice %288 {offsets = [16, 0], sizes = [16, 32], strides = [1, 1]} : vector<32x32xbf16> to vector<16x32xbf16>
    %cst_100 = arith.constant dense<0.000000e+00> : vector<16x32xf32>
    %336 = tpu.matmul %334, %335, %cst_100 {dimension_numbers = #tpu.dot_dimension_numbers<[1], [0], [0], [1], [0, 0, 1, 1], [], []>} : vector<16x16xbf16>, vector<16x32xbf16>, vector<16x32xf32> -> vector<16x32xf32>
    %337 = arith.addf %312, %336 : vector<16x32xf32>
    %338 = vector.extract_strided_slice %286 {offsets = [16, 0], sizes = [16, 16], strides = [1, 1]} : vector<32x96xf32> to vector<16x16xf32>
    %339 = vector.extract_strided_slice %286 {offsets = [16, 32], sizes = [16, 16], strides = [1, 1]} : vector<32x96xf32> to vector<16x16xf32>
    %340 = vector.extract_strided_slice %286 {offsets = [16, 64], sizes = [16, 16], strides = [1, 1]} : vector<32x96xf32> to vector<16x16xf32>
    %341 = arith.truncf %338 : vector<16x16xf32> to vector<16x16xbf16>
    %342 = arith.truncf %339 : vector<16x16xf32> to vector<16x16xbf16>
    %cst_101 = arith.constant dense<0.000000e+00> : vector<16x16xf32>
    %343 = tpu.matmul %341, %342, %cst_101 {dimension_numbers = #tpu.dot_dimension_numbers<[1], [1], [0], [0], [0, 0, 1, 0], [], []>} : vector<16x16xbf16>, vector<16x16xbf16>, vector<16x16xf32> -> vector<16x16xf32>
    %cst_102 = arith.constant -1.000000e+04 : f32
    %344 = vector.broadcast %cst_102 : f32 to vector<16x16xf32>
    %345 = arith.select %7, %343, %344 : vector<16x16xi1>, vector<16x16xf32>
    %cst_103 = arith.constant dense<0xFF800000> : vector<16xf32>
    %346 = vector.multi_reduction <maximumf>, %345, %cst_103 [1] : vector<16x16xf32> to vector<16xf32>
    %347 = vector.shape_cast %346 : vector<16xf32> to vector<16x1xf32>
    %348 = vector.broadcast %347 : vector<16x1xf32> to vector<16x16xf32>
    %349 = arith.subf %345, %348 : vector<16x16xf32>
    %350 = math.exp %349 : vector<16x16xf32>
    %cst_104 = arith.constant dense<0.000000e+00> : vector<16xf32>
    %351 = vector.multi_reduction <add>, %350, %cst_104 [1] : vector<16x16xf32> to vector<16xf32>
    %352 = vector.shape_cast %351 : vector<16xf32> to vector<16x1xf32>
    %353 = tpu.reciprocal %352 {approx = true} : vector<16x1xf32> -> vector<16x1xf32>
    %354 = vector.broadcast %353 : vector<16x1xf32> to vector<16x16xf32>
    %355 = arith.mulf %350, %354 : vector<16x16xf32>
    %356 = arith.truncf %355 : vector<16x16xf32> to vector<16x16xbf16>
    %357 = arith.truncf %340 : vector<16x16xf32> to vector<16x16xbf16>
    %cst_105 = arith.constant dense<0.000000e+00> : vector<16x16xf32>
    %358 = tpu.matmul %356, %357, %cst_105 {dimension_numbers = #tpu.dot_dimension_numbers<[1], [0], [0], [1], [0, 0, 1, 1], [], []>} : vector<16x16xbf16>, vector<16x16xbf16>, vector<16x16xf32> -> vector<16x16xf32>
    %359 = arith.truncf %358 : vector<16x16xf32> to vector<16x16xbf16>
    %360 = vector.extract_strided_slice %288 {offsets = [0, 0], sizes = [16, 32], strides = [1, 1]} : vector<32x32xbf16> to vector<16x32xbf16>
    %cst_106 = arith.constant dense<0.000000e+00> : vector<16x32xf32>
    %361 = tpu.matmul %359, %360, %cst_106 {dimension_numbers = #tpu.dot_dimension_numbers<[1], [0], [0], [1], [0, 0, 1, 1], [], []>} : vector<16x16xbf16>, vector<16x32xbf16>, vector<16x32xf32> -> vector<16x32xf32>
    %362 = vector.extract_strided_slice %286 {offsets = [16, 16], sizes = [16, 16], strides = [1, 1]} : vector<32x96xf32> to vector<16x16xf32>
    %363 = vector.extract_strided_slice %286 {offsets = [16, 48], sizes = [16, 16], strides = [1, 1]} : vector<32x96xf32> to vector<16x16xf32>
    %364 = vector.extract_strided_slice %286 {offsets = [16, 80], sizes = [16, 16], strides = [1, 1]} : vector<32x96xf32> to vector<16x16xf32>
    %365 = arith.truncf %362 : vector<16x16xf32> to vector<16x16xbf16>
    %366 = arith.truncf %363 : vector<16x16xf32> to vector<16x16xbf16>
    %cst_107 = arith.constant dense<0.000000e+00> : vector<16x16xf32>
    %367 = tpu.matmul %365, %366, %cst_107 {dimension_numbers = #tpu.dot_dimension_numbers<[1], [1], [0], [0], [0, 0, 1, 0], [], []>} : vector<16x16xbf16>, vector<16x16xbf16>, vector<16x16xf32> -> vector<16x16xf32>
    %cst_108 = arith.constant -1.000000e+04 : f32
    %368 = vector.broadcast %cst_108 : f32 to vector<16x16xf32>
    %369 = arith.select %7, %367, %368 : vector<16x16xi1>, vector<16x16xf32>
    %cst_109 = arith.constant dense<0xFF800000> : vector<16xf32>
    %370 = vector.multi_reduction <maximumf>, %369, %cst_109 [1] : vector<16x16xf32> to vector<16xf32>
    %371 = vector.shape_cast %370 : vector<16xf32> to vector<16x1xf32>
    %372 = vector.broadcast %371 : vector<16x1xf32> to vector<16x16xf32>
    %373 = arith.subf %369, %372 : vector<16x16xf32>
    %374 = math.exp %373 : vector<16x16xf32>
    %cst_110 = arith.constant dense<0.000000e+00> : vector<16xf32>
    %375 = vector.multi_reduction <add>, %374, %cst_110 [1] : vector<16x16xf32> to vector<16xf32>
    %376 = vector.shape_cast %375 : vector<16xf32> to vector<16x1xf32>
    %377 = tpu.reciprocal %376 {approx = true} : vector<16x1xf32> -> vector<16x1xf32>
    %378 = vector.broadcast %377 : vector<16x1xf32> to vector<16x16xf32>
    %379 = arith.mulf %374, %378 : vector<16x16xf32>
    %380 = arith.truncf %379 : vector<16x16xf32> to vector<16x16xbf16>
    %381 = arith.truncf %364 : vector<16x16xf32> to vector<16x16xbf16>
    %cst_111 = arith.constant dense<0.000000e+00> : vector<16x16xf32>
    %382 = tpu.matmul %380, %381, %cst_111 {dimension_numbers = #tpu.dot_dimension_numbers<[1], [0], [0], [1], [0, 0, 1, 1], [], []>} : vector<16x16xbf16>, vector<16x16xbf16>, vector<16x16xf32> -> vector<16x16xf32>
    %383 = arith.truncf %382 : vector<16x16xf32> to vector<16x16xbf16>
    %384 = vector.extract_strided_slice %288 {offsets = [16, 0], sizes = [16, 32], strides = [1, 1]} : vector<32x32xbf16> to vector<16x32xbf16>
    %cst_112 = arith.constant dense<0.000000e+00> : vector<16x32xf32>
    %385 = tpu.matmul %383, %384, %cst_112 {dimension_numbers = #tpu.dot_dimension_numbers<[1], [0], [0], [1], [0, 0, 1, 1], [], []>} : vector<16x16xbf16>, vector<16x32xbf16>, vector<16x32xf32> -> vector<16x32xf32>
    %386 = arith.addf %361, %385 : vector<16x32xf32>
    %387 = tpu.concatenate %337, %386 in 0 : vector<16x32xf32>, vector<16x32xf32> -> vector<32x32xf32>
    %388 = vector.broadcast %274 : vector<1x32xf32> to vector<32x32xf32>
    %389 = arith.addf %387, %388 : vector<32x32xf32>
    %390 = arith.addf %272, %389 : vector<32x32xf32>
    %cst_113 = arith.constant dense<0.000000e+00> : vector<32xf32>
    %391 = vector.multi_reduction <add>, %390, %cst_113 [1] : vector<32x32xf32> to vector<32xf32>
    %392 = vector.shape_cast %391 : vector<32xf32> to vector<32x1xf32>
    %cst_114 = arith.constant 3.200000e+01 : f32
    %393 = vector.broadcast %cst_114 : f32 to vector<32x1xf32>
    %394 = arith.divf %392, %393 : vector<32x1xf32>
    %395 = arith.mulf %390, %390 : vector<32x32xf32>
    %cst_115 = arith.constant dense<0.000000e+00> : vector<32xf32>
    %396 = vector.multi_reduction <add>, %395, %cst_115 [1] : vector<32x32xf32> to vector<32xf32>
    %397 = vector.shape_cast %396 : vector<32xf32> to vector<32x1xf32>
    %cst_116 = arith.constant 3.200000e+01 : f32
    %398 = vector.broadcast %cst_116 : f32 to vector<32x1xf32>
    %399 = arith.divf %397, %398 : vector<32x1xf32>
    %400 = arith.mulf %394, %394 : vector<32x1xf32>
    %401 = arith.subf %399, %400 : vector<32x1xf32>
    %cst_117 = arith.constant 0.000000e+00 : f32
    %402 = vector.broadcast %cst_117 : f32 to vector<32x1xf32>
    %403 = arith.maximumf %401, %402 : vector<32x1xf32>
    %404 = vector.broadcast %394 : vector<32x1xf32> to vector<32x32xf32>
    %405 = arith.subf %390, %404 : vector<32x32xf32>
    %cst_118 = arith.constant 9.99999974E-6 : f32
    %406 = vector.broadcast %cst_118 : f32 to vector<32x1xf32>
    %407 = arith.addf %403, %406 : vector<32x1xf32>
    %408 = math.rsqrt %407 : vector<32x1xf32>
    %409 = vector.broadcast %408 : vector<32x1xf32> to vector<32x32xf32>
    %410 = arith.mulf %405, %409 : vector<32x32xf32>
    %411 = vector.broadcast %275 : vector<1x32xf32> to vector<32x32xf32>
    %412 = arith.mulf %410, %411 : vector<32x32xf32>
    %413 = vector.broadcast %276 : vector<1x32xf32> to vector<32x32xf32>
    %414 = arith.addf %412, %413 : vector<32x32xf32>
    %415 = vector.broadcast %1 : vector<32x1xf32> to vector<32x32xf32>
    %416 = arith.mulf %414, %415 : vector<32x32xf32>
    %417 = arith.truncf %416 : vector<32x32xf32> to vector<32x32xbf16>
    %c5 = arith.constant 5 : index
    %c0_119 = arith.constant 0 : index
    %c0_120 = arith.constant 0 : index
    %418 = vector.load %arg4[%c5, %c0_119, %c0_120] : memref<6x32x64xbf16, #tpu.memory_space<vmem>>, vector<1x32x64xbf16>
    %419 = vector.shape_cast %418 : vector<1x32x64xbf16> to vector<32x64xbf16>
    %cst_121 = arith.constant dense<0.000000e+00> : vector<32x64xf32>
    %420 = tpu.matmul %417, %419, %cst_121 {dimension_numbers = #tpu.dot_dimension_numbers<[1], [0], [0], [1], [0, 0, 1, 1], [], []>} : vector<32x32xbf16>, vector<32x64xbf16>, vector<32x64xf32> -> vector<32x64xf32>
    %c1_i32_122 = arith.constant 1 : i32
    %421 = tpu.dynamic_rotate %416 by %c1_i32_122 dim 0 : vector<32x32xf32>, i32 -> vector<32x32xf32>
    %cst_123 = arith.constant 0.000000e+00 : f32
    %422 = vector.shape_cast %26 : vector<32x1xi1> to vector<32x1xi1>
    %423 = vector.broadcast %422 : vector<32x1xi1> to vector<32x32xi1>
    %424 = vector.broadcast %cst_123 : f32 to vector<32x32xf32>
    %425 = arith.select %423, %421, %424 : vector<32x32xi1>, vector<32x32xf32>
    %426 = arith.truncf %425 : vector<32x32xf32> to vector<32x32xbf16>
    %c4 = arith.constant 4 : index
    %c0_124 = arith.constant 0 : index
    %c0_125 = arith.constant 0 : index
    %427 = vector.load %arg4[%c4, %c0_124, %c0_125] : memref<6x32x64xbf16, #tpu.memory_space<vmem>>, vector<1x32x64xbf16>
    %428 = vector.shape_cast %427 : vector<1x32x64xbf16> to vector<32x64xbf16>
    %cst_126 = arith.constant dense<0.000000e+00> : vector<32x64xf32>
    %429 = tpu.matmul %426, %428, %cst_126 {dimension_numbers = #tpu.dot_dimension_numbers<[1], [0], [0], [1], [0, 0, 1, 1], [], []>} : vector<32x32xbf16>, vector<32x64xbf16>, vector<32x64xf32> -> vector<32x64xf32>
    %430 = arith.addf %420, %429 : vector<32x64xf32>
    %c2_i32_127 = arith.constant 2 : i32
    %431 = tpu.dynamic_rotate %416 by %c2_i32_127 dim 0 : vector<32x32xf32>, i32 -> vector<32x32xf32>
    %cst_128 = arith.constant 0.000000e+00 : f32
    %432 = vector.shape_cast %28 : vector<32x1xi1> to vector<32x1xi1>
    %433 = vector.broadcast %432 : vector<32x1xi1> to vector<32x32xi1>
    %434 = vector.broadcast %cst_128 : f32 to vector<32x32xf32>
    %435 = arith.select %433, %431, %434 : vector<32x32xi1>, vector<32x32xf32>
    %436 = arith.truncf %435 : vector<32x32xf32> to vector<32x32xbf16>
    %c3 = arith.constant 3 : index
    %c0_129 = arith.constant 0 : index
    %c0_130 = arith.constant 0 : index
    %437 = vector.load %arg4[%c3, %c0_129, %c0_130] : memref<6x32x64xbf16, #tpu.memory_space<vmem>>, vector<1x32x64xbf16>
    %438 = vector.shape_cast %437 : vector<1x32x64xbf16> to vector<32x64xbf16>
    %cst_131 = arith.constant dense<0.000000e+00> : vector<32x64xf32>
    %439 = tpu.matmul %436, %438, %cst_131 {dimension_numbers = #tpu.dot_dimension_numbers<[1], [0], [0], [1], [0, 0, 1, 1], [], []>} : vector<32x32xbf16>, vector<32x64xbf16>, vector<32x64xf32> -> vector<32x64xf32>
    %440 = arith.addf %430, %439 : vector<32x64xf32>
    %441 = vector.broadcast %278 : vector<1x64xf32> to vector<32x64xf32>
    %442 = arith.addf %440, %441 : vector<32x64xf32>
    %cst_132 = arith.constant 0.000000e+00 : f32
    %443 = vector.broadcast %cst_132 : f32 to vector<32x64xf32>
    %444 = arith.maximumf %442, %443 : vector<32x64xf32>
    %445 = vector.broadcast %1 : vector<32x1xf32> to vector<32x64xf32>
    %446 = arith.mulf %444, %445 : vector<32x64xf32>
    %447 = arith.truncf %446 : vector<32x64xf32> to vector<32x64xbf16>
    %c5_133 = arith.constant 5 : index
    %c0_134 = arith.constant 0 : index
    %c0_135 = arith.constant 0 : index
    %448 = vector.load %arg5[%c5_133, %c0_134, %c0_135] : memref<6x64x32xbf16, #tpu.memory_space<vmem>>, vector<1x64x32xbf16>
    %449 = vector.shape_cast %448 : vector<1x64x32xbf16> to vector<64x32xbf16>
    %cst_136 = arith.constant dense<0.000000e+00> : vector<32x32xf32>
    %450 = tpu.matmul %447, %449, %cst_136 {dimension_numbers = #tpu.dot_dimension_numbers<[1], [0], [0], [1], [0, 0, 1, 1], [], []>} : vector<32x64xbf16>, vector<64x32xbf16>, vector<32x32xf32> -> vector<32x32xf32>
    %c1_i32_137 = arith.constant 1 : i32
    %451 = tpu.dynamic_rotate %446 by %c1_i32_137 dim 0 : vector<32x64xf32>, i32 -> vector<32x64xf32>
    %cst_138 = arith.constant 0.000000e+00 : f32
    %452 = vector.shape_cast %26 : vector<32x1xi1> to vector<32x1xi1>
    %453 = vector.broadcast %452 : vector<32x1xi1> to vector<32x64xi1>
    %454 = vector.broadcast %cst_138 : f32 to vector<32x64xf32>
    %455 = arith.select %453, %451, %454 : vector<32x64xi1>, vector<32x64xf32>
    %456 = arith.truncf %455 : vector<32x64xf32> to vector<32x64xbf16>
    %c4_139 = arith.constant 4 : index
    %c0_140 = arith.constant 0 : index
    %c0_141 = arith.constant 0 : index
    %457 = vector.load %arg5[%c4_139, %c0_140, %c0_141] : memref<6x64x32xbf16, #tpu.memory_space<vmem>>, vector<1x64x32xbf16>
    %458 = vector.shape_cast %457 : vector<1x64x32xbf16> to vector<64x32xbf16>
    %cst_142 = arith.constant dense<0.000000e+00> : vector<32x32xf32>
    %459 = tpu.matmul %456, %458, %cst_142 {dimension_numbers = #tpu.dot_dimension_numbers<[1], [0], [0], [1], [0, 0, 1, 1], [], []>} : vector<32x64xbf16>, vector<64x32xbf16>, vector<32x32xf32> -> vector<32x32xf32>
    %460 = arith.addf %450, %459 : vector<32x32xf32>
    %c2_i32_143 = arith.constant 2 : i32
    %461 = tpu.dynamic_rotate %446 by %c2_i32_143 dim 0 : vector<32x64xf32>, i32 -> vector<32x64xf32>
    %cst_144 = arith.constant 0.000000e+00 : f32
    %462 = vector.shape_cast %28 : vector<32x1xi1> to vector<32x1xi1>
    %463 = vector.broadcast %462 : vector<32x1xi1> to vector<32x64xi1>
    %464 = vector.broadcast %cst_144 : f32 to vector<32x64xf32>
    %465 = arith.select %463, %461, %464 : vector<32x64xi1>, vector<32x64xf32>
    %466 = arith.truncf %465 : vector<32x64xf32> to vector<32x64xbf16>
    %c3_145 = arith.constant 3 : index
    %c0_146 = arith.constant 0 : index
    %c0_147 = arith.constant 0 : index
    %467 = vector.load %arg5[%c3_145, %c0_146, %c0_147] : memref<6x64x32xbf16, #tpu.memory_space<vmem>>, vector<1x64x32xbf16>
    %468 = vector.shape_cast %467 : vector<1x64x32xbf16> to vector<64x32xbf16>
    %cst_148 = arith.constant dense<0.000000e+00> : vector<32x32xf32>
    %469 = tpu.matmul %466, %468, %cst_148 {dimension_numbers = #tpu.dot_dimension_numbers<[1], [0], [0], [1], [0, 0, 1, 1], [], []>} : vector<32x64xbf16>, vector<64x32xbf16>, vector<32x32xf32> -> vector<32x32xf32>
    %470 = arith.addf %460, %469 : vector<32x32xf32>
    %471 = vector.broadcast %277 : vector<1x32xf32> to vector<32x32xf32>
    %472 = arith.addf %470, %471 : vector<32x32xf32>
    %473 = vector.broadcast %1 : vector<32x1xf32> to vector<32x32xf32>
    %474 = arith.mulf %472, %473 : vector<32x32xf32>
    %475 = arith.addf %414, %474 : vector<32x32xf32>
    %cst_149 = arith.constant dense<0.000000e+00> : vector<32xf32>
    %476 = vector.multi_reduction <add>, %475, %cst_149 [1] : vector<32x32xf32> to vector<32xf32>
    %477 = vector.shape_cast %476 : vector<32xf32> to vector<32x1xf32>
    %cst_150 = arith.constant 3.200000e+01 : f32
    %478 = vector.broadcast %cst_150 : f32 to vector<32x1xf32>
    %479 = arith.divf %477, %478 : vector<32x1xf32>
    %480 = arith.mulf %475, %475 : vector<32x32xf32>
    %cst_151 = arith.constant dense<0.000000e+00> : vector<32xf32>
    %481 = vector.multi_reduction <add>, %480, %cst_151 [1] : vector<32x32xf32> to vector<32xf32>
    %482 = vector.shape_cast %481 : vector<32xf32> to vector<32x1xf32>
    %cst_152 = arith.constant 3.200000e+01 : f32
    %483 = vector.broadcast %cst_152 : f32 to vector<32x1xf32>
    %484 = arith.divf %482, %483 : vector<32x1xf32>
    %485 = arith.mulf %479, %479 : vector<32x1xf32>
    %486 = arith.subf %484, %485 : vector<32x1xf32>
    %cst_153 = arith.constant 0.000000e+00 : f32
    %487 = vector.broadcast %cst_153 : f32 to vector<32x1xf32>
    %488 = arith.maximumf %486, %487 : vector<32x1xf32>
    %489 = vector.broadcast %479 : vector<32x1xf32> to vector<32x32xf32>
    %490 = arith.subf %475, %489 : vector<32x32xf32>
    %cst_154 = arith.constant 9.99999974E-6 : f32
    %491 = vector.broadcast %cst_154 : f32 to vector<32x1xf32>
    %492 = arith.addf %488, %491 : vector<32x1xf32>
    %493 = math.rsqrt %492 : vector<32x1xf32>
    %494 = vector.broadcast %493 : vector<32x1xf32> to vector<32x32xf32>
    %495 = arith.mulf %490, %494 : vector<32x32xf32>
    %496 = vector.broadcast %279 : vector<1x32xf32> to vector<32x32xf32>
    %497 = arith.mulf %495, %496 : vector<32x32xf32>
    %498 = vector.broadcast %280 : vector<1x32xf32> to vector<32x32xf32>
    %499 = arith.addf %497, %498 : vector<32x32xf32>
    %500 = vector.broadcast %1 : vector<32x1xf32> to vector<32x32xf32>
    %501 = arith.mulf %499, %500 : vector<32x32xf32>
    %502 = arith.addf %501, %45 : vector<32x32xf32>
    %503 = vector.extract_strided_slice %2 {offsets = [4, 0], sizes = [4, 32], strides = [1, 1]} : vector<14x128xf32> to vector<4x32xf32>
    %504 = vector.extract_strided_slice %2 {offsets = [3, 0], sizes = [1, 4], strides = [1, 1]} : vector<14x128xf32> to vector<1x4xf32>
    %cst_155 = arith.constant dense<0.000000e+00> : vector<32x4xf32>
    %505 = tpu.matmul %502, %503, %cst_155 {dimension_numbers = #tpu.dot_dimension_numbers<[1], [1], [0], [0], [0, 0, 1, 0], [], []>} : vector<32x32xf32>, vector<4x32xf32>, vector<32x4xf32> -> vector<32x4xf32>
    %506 = vector.broadcast %504 : vector<1x4xf32> to vector<32x4xf32>
    %507 = arith.addf %505, %506 : vector<32x4xf32>
    %508 = vector.broadcast %1 : vector<32x1xf32> to vector<32x4xf32>
    %509 = arith.mulf %507, %508 : vector<32x4xf32>
    %510 = vector.extract_strided_slice %509 {offsets = [0, 0], sizes = [32, 2], strides = [1, 1]} : vector<32x4xf32> to vector<32x2xf32>
    %511 = vector.extract_strided_slice %509 {offsets = [0, 2], sizes = [32, 2], strides = [1, 1]} : vector<32x4xf32> to vector<32x2xf32>
    %512 = math.exp %511 : vector<32x2xf32>
    %513 = arith.mulf %4, %512 : vector<32x2xf32>
    %514 = vector.broadcast %1 : vector<32x1xf32> to vector<32x2xf32>
    %515 = arith.mulf %513, %514 : vector<32x2xf32>
    %516 = arith.addf %510, %515 : vector<32x2xf32>
    %517 = tpu.concatenate %3, %516 in 1 : vector<32x2xf32>, vector<32x2xf32> -> vector<32x4xf32>
    %c0_156 = arith.constant 0 : index
    %c0_157 = arith.constant 0 : index
    %518 = vector.load %arg7[%c0_156, %c0_157] : memref<32x4xf32, #tpu.memory_space<vmem>>, vector<32x4xf32>
    tpu.vector_store %arg7[%c0_156, %c0_157], %517 {strides = array<i32>} : memref<32x4xf32, #tpu.memory_space<vmem>>, vector<32x4xf32>,
    return
  }
}

</mosaic_0001>

<bundles_post_ra>
// kernel: fft_coupling_forward.1
= control target key start
LH: loop header
LB: loop body
LE: loop exit
PB: predicated region body
PF: predicated region fallthrough
CT: control target
= control target key end

     0   :  { %v4215_v0 = vmov 1   ;;  %v4216_v1 = vmov 0   ;;  %v37_v12 = vlaneseq  ;;  %vm212_vm0 = vcmask 261120   ;;  %s4219_s24 = smov 80   ;;  %s4220_s25 = smov 96   ;;  %s5181_s0 = inlined_call_operand.vmem [shape: f32[32,4], index: 0, kind: input, shape index: {}, may-alias: {0,7}]   ;;  %s5182_s1 = inlined_call_operand.vmem [shape: f32[32,1], index: 1, kind: input, shape index: {}]   ;;  %s5183_s2 = inlined_call_operand.vmem [shape: bf16[2,32,96], index: 2, kind: input, shape index: {}]   ;;  %s5184_s6 = inlined_call_operand.vmem [shape: f32[14,128], index: 6, kind: input, shape index: {}]   ;;  %s5185_s3 = inlined_call_operand.vmem [shape: bf16[2,32,32], index: 3, kind: input, shape index: {}]   ;;  %s5186_s4 = inlined_call_operand.vmem [shape: bf16[6,32,64], index: 4, kind: input, shape index: {}]   ;;  %s5187_s5 = inlined_call_operand.vmem [shape: bf16[6,64,32], index: 5, kind: input, shape index: {}]   ;;  %s5188_s7 = inlined_call_operand.vmem [shape: f32[32,4], index: 7, kind: output, shape index: {}, may-alias: {0,7}]  }
   0x1   :  { %4054 = vset.pattern.permute.xlu1 %v4215_v0  ;;  %4053 = vset.pattern.permute.xlu0 %v4216_v1  ;;  %v27_v2 = vld [vmem:[%s5181_s0] sm:$0xff]  ;;  %v28_v3 = vld [vmem:[%s5181_s0 + $0x8] sm:$0xff]  ;;  %v29_v4 = vld [vmem:[%s5181_s0 + $0x10] sm:$0xff]  ;;  %v4217_v56 = vmov 0.0   ;;  %vm4218_vm1 = vmmov 0   ;;  %s4221_s26 = smov 112  }
   0x2   :  { %131 = vperm.xlu1 %4054, %v27_v2   ;;  %104 = vperm.xlu0 %4053, %v27_v2   ;;  %v30_v5 = vld [vmem:[%s5181_s0 + $0x18] sm:$0xff]  ;;  %v32_v6 = vld [vmem:[%s5182_s1 + $0x8] sm:$0xff]  ;;  %v31_v7 = vld [vmem:[%s5182_s1] sm:$0xff]  ;;  %v4298_v13 = vshrl.u32 %v37_v12, 7  ;;  %vm276_vm2 = vcmask 130048   ;;  %s4222_s27 = smov 48  }
   0x3   :  { %v33_v8 = vld [vmem:[%s5182_s1 + $0x10] sm:$0xff]  ;;  %v4060_v9 = vld [vmem:[%s5183_s2] sm:$0xff]   ;;  %v34_v10 = vld [vmem:[%s5182_s1 + $0x18] sm:$0xff]  ;;  %3735 = vmatprep.subr.bf16.mxu0 %v4217_v56  ;;  %3737 = vmatprep.mubr.msk.bf16.mxu0 %vm4218_vm1, %v4217_v56  ;;  %s4223_s28 = smov 64   ;;  %s4224_s13 = smov 32   ;;  %vm1394_vm11 = vcmask 523264  }
   0x4   :  { %3721 = vmatprep.subr.bf16.mxu1 %v4060_v9  ;;  %v4061_v11 = vld [vmem:[%s5183_s2 + $0x8] sm:$0xff]   ;;  %v148_v16 = vsub.s32 1, %v4298_v13  ;;  %v124_v17 = vsub.s32 0, %v4298_v13  ;;  %v35_v18 = vld [vmem:[%s5184_s6] sm:$0xff]  ;;  %v160_v28 = vsub.s32 2, %v4298_v13  ;;  %vm1064_vm5 = vcmp.lt.s32.totalorder %v4298_v13, 1 }
   0x5   :  { %3722 = vmatpush3.bf16.msra.mxu1 %v4060_v9  ;;  %v4339_v55 = vld [vmem:[%s5184_s6 + $0x8] sm:$0x3f]  ;;  %v41_v9 = vand.u32 127, %v37_v12  ;;  %vm1226_vm8 = vcmp.lt.s32.totalorder %v4298_v13, 2  ;;  %s4225_s9 = smov 126   ;;  %s4226_s15 = smov 2  }
   0x6   :  { %135 = vperm.xlu1 %4054, %v28_v3   ;;  %109 = vperm.xlu0 %4053, %v28_v3   ;;  %v149_v21 = vrot.slane %v35_v18, %v148_v16  ;;  %v125_v22 = vrot.slane %v35_v18, %v124_v17  ;;  %v161_v32 = vrot.slane %v35_v18, %v160_v28  ;;  %vm3417_vm12 = vcmask 15360  }
   0x7   :  { %3723 = vmatprep.subr.bf16.mxu1 %v4061_v11  ;;  %v199_v57 = vrot.slane %v4339_v55, %v124_v17  ;;  %vm4372_vm3 = vcmp.le.s32.totalorder %v41_v9, %v4298_v13  ;;  %vm3422_vm13 = vcmask 31744  }
   0x9   :  { %3724 = vmatpush3.bf16.msra.mxu1 %v4061_v11 }
   0xa   :  { %4055 = vset.pattern.permute.xlu1 %v4216_v1  ;;  %114 = vperm.xlu0 %4053, %v29_v4  }
   0xb   :  { %119 = vperm.xlu1 %4055, %v30_v5   ;;  %3729 = vmatprep.subr.bf16.mxu1 %v4217_v56 }
   0xe   :  { %4056 = vset.pattern.permute.xlu0 %v4215_v0 }
   0xf   :  { %4057 = vset.pattern.permute.xlu1 %v4215_v0  ;;  %139 = vperm.xlu0 %4056, %v29_v4  }
  0x10   :  { %143 = vperm.xlu1 %4057, %v30_v5  }
  0x13   :  { %4059 = vset.pattern.permute.xlu0 %v4216_v1 }
  0x14   :  { %4058 = vset.pattern.permute.xlu1 %v4216_v1  ;;  %173 = vperm.xlu0 %4059, %v32_v6  }
  0x15   :  { %168 = vperm.xlu1 %4058, %v31_v7  }
  0x19   :  { %178 = vperm.xlu1 %4058, %v33_v8  }
  0x1d   :  { %183 = vperm.xlu1 %4058, %v34_v10   ;;  %v39_v10 = vadd.s32 8, %v4298_v13 }
  0x1f   :  { %vm4376_vm4 = vcmp.le.s32.totalorder %v41_v9, %v39_v10 }
  0x81   :  { %v132_v14 = vpop.permute.xlu1 %131  ;;  %v105_v15 = vpop.permute.xlu0 %104 }
  0x82   :  { %v150_v27 = vmul.f32 %v149_v21, %v132_v14  ;;  %v126_v29 = vmul.f32 %v125_v22, %v105_v15 }
  0x84   :  { %v154_v33 = vadd.f32 %v150_v27, %v126_v29 }
  0x85   :  { %v136_v19 = vpop.permute.xlu1 %135  ;;  %v110_v20 = vpop.permute.xlu0 %109 }
  0x86   :  { %v151_v24 = vmul.f32 %v149_v21, %v136_v19  ;;  %v127_v25 = vmul.f32 %v125_v22, %v110_v20  ;;  %v162_v36 = vadd.f32 %v161_v32, %v154_v33 }
  0x88   :  { %v155_v30 = vadd.f32 %v151_v24, %v127_v25 }
  0x89   :  { %v115_v23 = vpop.permute.xlu0 %114 }
  0x8a   :  { %v120_v26 = vpop.permute.xlu1 %119  ;;  %v163_v35 = vadd.f32 %v161_v32, %v155_v30  ;;  %v128_v42 = vmul.f32 %v125_v22, %v115_v23 }
  0x8b   :  { %v129_v43 = vmul.f32 %v125_v22, %v120_v26 }
  0x8e   :  { %v140_v31 = vpop.permute.xlu0 %139 }
  0x8f   :  { %v144_v34 = vpop.permute.xlu1 %143  ;;  %v152_v37 = vmul.f32 %v149_v21, %v140_v31 }
  0x90   :  { %v153_v38 = vmul.f32 %v149_v21, %v144_v34 }
  0x91   :  { %v156_v45 = vadd.f32 %v152_v37, %v128_v42 }
  0x92   :  { %v157_v46 = vadd.f32 %v153_v38, %v129_v43 }
  0x93   :  { %v4310_v39 = vpop.permute.xlu0 %173  ;;  %v164_v49 = vadd.f32 %v161_v32, %v156_v45 }
  0x94   :  { %v4312_v40 = vpop.permute.xlu1 %168  ;;  %v4315_v41 = vmul.f32 %v4310_v39, %v163_v35  ;;  %v165_v50 = vadd.f32 %v161_v32, %v157_v46 }
  0x95   :  { %v4318_v44 = vmul.f32 %v4312_v40, %v162_v36 }
  0x97   :  { %v190_v47 = vpack.c.bf16 %v4315_v41, %v4318_v44 }
  0x98   :  { %v4322_v48 = vpop.permute.xlu1 %178 }
  0x99   :  { %3725 = vmatprep.mubr.msk.bf16.mxu1 %vm212_vm0, %v190_v47  ;;  %v4328_v52 = vmul.f32 %v4322_v48, %v164_v49 }
  0x9c   :  { %v4325_v51 = vpop.permute.xlu1 %183 }
  0x9d   :  { %v4331_v53 = vmul.f32 %v4325_v51, %v165_v50 }
  0x9f   :  { %v191_v54 = vpack.c.bf16 %v4331_v53, %v4328_v52 }
  0xa1   :  { %3726 = vmatmul.mubr.msk.bf16.vlgmr.msra.gmra.mrb[0].mxu1 %vm212_vm0, %v191_v54 }
  0xa2   :  { %3731 = vmatprep.mubr.msk.bf16.mxu1 %vm4218_vm1, %v4217_v56 }
 0x174   :  { %v3727_v58 = vpop.f32.mrb[0].mxu1 }
 0x175   :  { %v262_v59 = vadd.f32 %v3727_v58, %v199_v57  ;;  %v253_v60 = vpop.f32.mrb[1].mxu1 }
 0x176   :  { %v254_v61 = vadd.f32 %v253_v60, %v199_v57  ;;  %v3728_v62 = vpop.f32.mrb[2].mxu1 }
 0x177   :  { %v265_v63 = vadd.f32 %v3728_v62, %v199_v57  ;;  %v256_v0 = vpop.f32.mrb[3].mxu1 }
 0x178   :  { %v257_v1 = vadd.f32 %v256_v0, %v199_v57 }
 0x179   :  { %v4348_v2 = vpack.c.bf16 %v265_v63, %v262_v59 }
 0x17a   :  { %v4350_v3 = vpack.c.bf16 %v257_v1, %v254_v61 }
 0x17c   :  { %399 = vrot.lane.b32.xlu1 %v4350_v3, %s4219_s24  ;;  %274 = vrot.lane.b32.xlu0 %v4350_v3, %s4220_s25 }
 0x180   :  { %397 = vrot.lane.b32.xlu0 %v4350_v3, %s4221_s26 }
 0x1ee   :  { %v275_v4 = vpop.permute.xlu0 %274  ;;  %v400_v6 = vpop.permute.xlu1 %399 }
 0x1ef   :  { %v281_v5 = vsel %vm276_vm2, %v275_v4, 0  ;;  %v405_v7 = vsel %vm276_vm2, %v400_v6, 0 }
 0x1f0   :  { %3730 = vmatpush3.bf16.xpose.msra.mxu1 %v281_v5 }
 0x1f1   :  { %3741 = vmatprep.subr.bf16.mxu1 %v4217_v56 }
 0x1f2   :  { %v398_v8 = vpop.permute.xlu0 %397 }
 0x1f7   :  { %3732 = vmatmul.mubr.msk.bf16.vlgmr.msra.gmra.mrb[4].mxu1 %vm276_vm2, %v4350_v3 }
 0x1f8   :  { %3742 = vmatpush3.bf16.xpose.msra.mxu1 %v405_v7  ;;  %3743 = vmatprep.mubr.msk.bf16.mxu1 %vm4218_vm1, %v4217_v56 }
 0x1f9   :  { %3753 = vmatprep.subr.bf16.mxu1 %v4217_v56 }
 0x1ff   :  { %3744 = vmatmul.mubr.msk.bf16.vlgmr.msra.gmra.mrb[8].mxu1 %vm276_vm2, %v398_v8 }
 0x200   :  { %3755 = vmatprep.mubr.msk.bf16.mxu1 %vm4218_vm1, %v4217_v56 }
 0x2ca   :  { %v317_v14 = vpop.f32.mrb[4].mxu1 }
 0x2cb   :  { %v324_v17 = vsel %vm4372_vm3, %v317_v14, -10000.0  ;;  %v3733_v18 = vpop.f32.mrb[5].mxu1 }
 0x2cc   :  { %v320_v19 = vpop.f32.mrb[6].mxu1  ;;  %v326_v20 = vsel %vm276_vm2, %v324_v17, -inf }
 0x2cd   :  { %v325_v12 = vsel %vm4376_vm4, %v320_v19, -10000.0  ;;  %327 = vmax.xlane.f32.xlu1 %v326_v20  ;;  %v3734_v21 = vpop.f32.mrb[7].mxu1  ;;  %v4417_v20 = vld [vmem:[%s5185_s3] sm:$0xff]  }
 0x2ce   :  { %v329_v22 = vsel %vm276_vm2, %v325_v12, -inf }
 0x2cf   :  { %330 = vmax.xlane.f32.xlu0 %v329_v22 }
 0x2d2   :  { %v441_v23 = vpop.f32.mrb[8].mxu1 }
 0x2d3   :  { %v448_v24 = vsel %vm4372_vm3, %v441_v23, -10000.0  ;;  %v3745_v25 = vpop.f32.mrb[9].mxu1 }
 0x2d4   :  { %v444_v26 = vpop.f32.mrb[10].mxu1  ;;  %v450_v27 = vsel %vm276_vm2, %v448_v24, -inf }
 0x2d5   :  { %v449_v29 = vsel %vm4376_vm4, %v444_v26, -10000.0  ;;  %451 = vmax.xlane.f32.xlu0 %v450_v27  ;;  %v3746_v30 = vpop.f32.mrb[11].mxu1 }
 0x2d6   :  { %v453_v31 = vsel %vm276_vm2, %v449_v29, -inf }
 0x2d7   :  { %454 = vmax.xlane.f32.xlu1 %v453_v31 }
 0x35a   :  { %v328_v32 = vpop.xlane.xlu1 %327 }
 0x35b   :  { %v332_v33 = vsub.f32 %v324_v17, %v328_v32 }
 0x35c   :  { %v331_v34 = vpop.xlane.xlu0 %330 }
 0x35d   :  { %v334_v35 = vmul.f32 1.442695, %v332_v33  ;;  %v333_v36 = vsub.f32 %v325_v12, %v331_v34  ;;  %v4063_v12 = vld [vmem:[%s5185_s3 + $0x8] sm:$0xff]  }
 0x35e   :  { %3754 = vmatpush3.bf16.msra.mxu1 %v4063_v12 }
 0x35f   :  { %4104 = vpow2.f32 %v334_v35  ;;  %v336_v37 = vmul.f32 1.442695, %v333_v36  ;;  %3765 = vmatprep.subr.bf16.mxu1 %v4217_v56 }
 0x361   :  { %4106 = vpow2.f32 %v336_v37 }
 0x362   :  { %v452_v38 = vpop.xlane.xlu0 %451 }
 0x363   :  { %v456_v42 = vsub.f32 %v448_v24, %v452_v38 }
 0x364   :  { %v455_v43 = vpop.xlane.xlu1 %454 }
 0x365   :  { %v458_v45 = vmul.f32 1.442695, %v456_v42  ;;  %v457_v46 = vsub.f32 %v449_v29, %v455_v43 }
 0x367   :  { %4108 = vpow2.f32 %v458_v45  ;;  %v460_v47 = vmul.f32 1.442695, %v457_v46 }
 0x369   :  { %v4105_v49 = vpop.eup %4104  ;;  %4110 = vpow2.f32 %v460_v47 }
 0x36a   :  { %v338_v50 = vsel %vm276_vm2, %v4105_v49, 0.0 }
 0x36b   :  { %v4107_v54 = vpop.eup %4106  ;;  %339 = vadd.xlane.f32.xlu0 %v338_v50 }
 0x36c   :  { %v341_v57 = vsel %vm276_vm2, %v4107_v54, 0.0 }
 0x36d   :  { %342 = vadd.xlane.f32.xlu1 %v341_v57 }
 0x371   :  { %v4109_v58 = vpop.eup %4108 }
 0x372   :  { %v462_v59 = vsel %vm276_vm2, %v4109_v58, 0.0 }
 0x373   :  { %v4111_v60 = vpop.eup %4110  ;;  %463 = vadd.xlane.f32.xlu0 %v462_v59 }
 0x374   :  { %v465_v61 = vsel %vm276_vm2, %v4111_v60, 0.0 }
 0x375   :  { %466 = vadd.xlane.f32.xlu1 %v465_v61 }
 0x386   :  { %473 = vrot.lane.b32.xlu1 %v4350_v3, %s4222_s27 }
 0x389   :  { %349 = vrot.lane.b32.xlu0 %v4350_v3, %s4223_s28 }
 0x38a   :  { %623 = vrot.lane.b32.xlu1 %v4348_v2, %s4220_s25 }
 0x38d   :  { %747 = vrot.lane.b32.xlu0 %v4348_v2, %s4219_s24 }
 0x38e   :  { %745 = vrot.lane.b32.xlu1 %v4348_v2, %s4221_s26 }
 0x3f8   :  { %v340_v62 = vpop.xlane.xlu0 %339 }
 0x3f9   :  { %4112 = vrcp.f32 %v340_v62 }
 0x3fa   :  { %v343_v63 = vpop.xlane.xlu1 %342 }
 0x3fb   :  { %4114 = vrcp.f32 %v343_v63 }
 0x400   :  { %v464_v0 = vpop.xlane.xlu0 %463 }
 0x401   :  { %4116 = vrcp.f32 %v464_v0 }
 0x402   :  { %v467_v1 = vpop.xlane.xlu1 %466 }
 0x403   :  { %v4113_v4 = vpop.eup %4112  ;;  %4118 = vrcp.f32 %v467_v1 }
 0x404   :  { %v350_v5 = vpop.permute.xlu0 %349  ;;  %v346_v6 = vmul.f32 %v4113_v4, %v4105_v49 }
 0x405   :  { %v4115_v3 = vpop.eup %4114  ;;  %3736 = vmatpush3.bf16.msra.mxu0 %v350_v5 }
 0x406   :  { %3747 = vmatprep.subr.bf16.mxu0 %v4217_v56  ;;  %v347_v7 = vmul.f32 %v4115_v3, %v4107_v54  ;;  %v474_v9 = vpop.permute.xlu1 %473 }
 0x408   :  { %v348_v8 = vpack.c.bf16 %v347_v7, %v346_v6  ;;  %v748_v34 = vpop.permute.xlu0 %747 }
 0x409   :  { %v753_v35 = vsel %vm276_vm2, %v748_v34, 0 }
 0x40a   :  { %3738 = vmatmul.mubr.msk.bf16.vlgmr.msra.gmra.mrb[0].mxu0 %vm276_vm2, %v348_v8  ;;  %v624_v29 = vpop.permute.xlu1 %623 }
 0x40b   :  { %v4117_v10 = vpop.eup %4116  ;;  %3748 = vmatpush3.bf16.msra.mxu0 %v474_v9  ;;  %3749 = vmatprep.mubr.msk.bf16.mxu0 %vm4218_vm1, %v4217_v56  ;;  %v629_v33 = vsel %vm276_vm2, %v624_v29, 0 }
 0x40c   :  { %3759 = vmatprep.subr.bf16.mxu0 %v4217_v56  ;;  %v470_v17 = vmul.f32 %v4117_v10, %v4109_v58 }
 0x40d   :  { %v4119_v14 = vpop.eup %4118 }
 0x40e   :  { %v471_v18 = vmul.f32 %v4119_v14, %v4111_v60  ;;  %v746_v36 = vpop.permute.xlu1 %745 }
 0x410   :  { %v472_v19 = vpack.c.bf16 %v471_v18, %v470_v17 }
 0x412   :  { %3750 = vmatmul.mubr.msk.bf16.vlgmr.msra.gmra.mrb[4].mxu0 %vm276_vm2, %v472_v19 }
 0x413   :  { %3761 = vmatprep.mubr.msk.bf16.mxu0 %vm4218_vm1, %v4217_v56  ;;  %3760 = vmatpush3.bf16.msra.mxu0 %v4417_v20 }
 0x414   :  { %3771 = vmatprep.subr.bf16.mxu0 %v4217_v56 }
 0x4dd   :  { %v389_v21 = vpop.f32.mrb[0].mxu0 }
 0x4de   :  { %v3739_v22 = vpop.f32.mrb[1].mxu0 }
 0x4df   :  { %v392_v23 = vpop.f32.mrb[2].mxu0 }
 0x4e0   :  { %v396_v24 = vpack.c.bf16 %v392_v23, %v389_v21  ;;  %v3740_v25 = vpop.f32.mrb[3].mxu0 }
 0x4e2   :  { %3762 = vmatmul.mubr.msk.bf16.vlgmr.msra.gmra.mrb[8].mxu0 %vm276_vm2, %v396_v24 }
 0x4e3   :  { %3773 = vmatprep.mubr.msk.bf16.mxu0 %vm4218_vm1, %v4217_v56 }
 0x4e5   :  { %v513_v26 = vpop.f32.mrb[4].mxu0 }
 0x4e6   :  { %v3751_v27 = vpop.f32.mrb[5].mxu0 }
 0x4e7   :  { %v516_v30 = vpop.f32.mrb[6].mxu0 }
 0x4e8   :  { %v520_v31 = vpack.c.bf16 %v516_v30, %v513_v26  ;;  %v3752_v32 = vpop.f32.mrb[7].mxu0 }
 0x4ea   :  { %3756 = vmatmul.mubr.msk.bf16.vlgmr.msra.gmra.mrb[12].mxu1 %vm276_vm2, %v520_v31 }
 0x4eb   :  { %3766 = vmatpush3.bf16.xpose.msra.mxu1 %v629_v33  ;;  %3767 = vmatprep.mubr.msk.bf16.mxu1 %vm4218_vm1, %v4217_v56 }
 0x4ec   :  { %3777 = vmatprep.subr.bf16.mxu1 %v4217_v56 }
 0x4f2   :  { %3768 = vmatmul.mubr.msk.bf16.vlgmr.msra.gmra.mrb[16].mxu1 %vm276_vm2, %v4348_v2 }
 0x4f3   :  { %3778 = vmatpush3.bf16.xpose.msra.mxu1 %v753_v35  ;;  %3779 = vmatprep.mubr.msk.bf16.mxu1 %vm4218_vm1, %v4217_v56 }
 0x4f4   :  { %3789 = vmatprep.subr.bf16.mxu1 %v4217_v56 }
 0x4fa   :  { %3780 = vmatmul.mubr.msk.bf16.vlgmr.msra.gmra.mrb[20].mxu1 %vm276_vm2, %v746_v36  ;;  %v4465_v36 = vrot.slane %v4339_v55, %v148_v16 }
 0x4fb   :  { %3790 = vmatpush3.bf16.msra.mxu1 %v4063_v12  ;;  %3791 = vmatprep.mubr.msk.bf16.mxu1 %vm4218_vm1, %v4217_v56 }
 0x5b5   :  { %v614_v37 = vpop.f32.mrb[8].mxu0 }
 0x5b6   :  { %v3763_v38 = vpop.f32.mrb[9].mxu0 }
 0x5b7   :  { %v617_v42 = vpop.f32.mrb[10].mxu0 }
 0x5b8   :  { %v3764_v43 = vpop.f32.mrb[11].mxu0 }
 0x5bd   :  { %v564_v45 = vpop.f32.mrb[12].mxu1 }
 0x5be   :  { %v615_v46 = vadd.f32 %v614_v37, %v564_v45  ;;  %v3757_v47 = vpop.f32.mrb[13].mxu1 }
 0x5bf   :  { %v567_v49 = vpop.f32.mrb[14].mxu1 }
 0x5c0   :  { %v618_v50 = vadd.f32 %v617_v42, %v567_v49  ;;  %v3758_v54 = vpop.f32.mrb[15].mxu1  ;;  %v961_v37 = vadd.f32 %v4465_v36, %v615_v46 }
 0x5c2   :  { %v4469_v38 = vadd.f32 %v961_v37, %v4318_v44  ;;  %v962_v42 = vadd.f32 %v4465_v36, %v618_v50 }
 0x5c4   :  { %v4473_v43 = vadd.f32 %v962_v42, %v4315_v41  ;;  %v969_v45 = vsel %vm212_vm0, %v4469_v38, 0.0  ;;  %v986_v16 = vmul.f32 %v4469_v38, %v4469_v38 }
 0x5c5   :  { %v665_v57 = vpop.f32.mrb[16].mxu1 }
 0x5c6   :  { %v672_v58 = vsel %vm4372_vm3, %v665_v57, -10000.0  ;;  %v3769_v59 = vpop.f32.mrb[17].mxu1  ;;  %v990_v55 = vsel %vm212_vm0, %v986_v16, 0.0  ;;  %v987_v46 = vmul.f32 %v4473_v43, %v4473_v43 }
 0x5c7   :  { %v668_v60 = vpop.f32.mrb[18].mxu1  ;;  %v674_v61 = vsel %vm276_vm2, %v672_v58, -inf }
 0x5c8   :  { %v673_v62 = vsel %vm4376_vm4, %v668_v60, -10000.0  ;;  %675 = vmax.xlane.f32.xlu0 %v674_v61  ;;  %v3770_v63 = vpop.f32.mrb[19].mxu1  ;;  %v993_v47 = vsel %vm212_vm0, %v987_v46, 0.0  ;;  %v4064_v46 = vld [vmem:[%s5186_s4 + $0x10] sm:$0xff]  }
 0x5c9   :  { %v677_v0 = vsel %vm276_vm2, %v673_v62, -inf  ;;  %3801 = vmatprep.subr.bf16.mxu1 %v4064_v46 }
 0x5ca   :  { %678 = vmax.xlane.f32.xlu1 %v677_v0 }
 0x5cd   :  { %v789_v1 = vpop.f32.mrb[20].mxu1 }
 0x5ce   :  { %v796_v4 = vsel %vm4372_vm3, %v789_v1, -10000.0  ;;  %v3781_v5 = vpop.f32.mrb[21].mxu1 }
 0x5cf   :  { %v792_v3 = vpop.f32.mrb[22].mxu1  ;;  %v798_v6 = vsel %vm276_vm2, %v796_v4, -inf }
 0x5d0   :  { %v797_v7 = vsel %vm4376_vm4, %v792_v3, -10000.0  ;;  %799 = vmax.xlane.f32.xlu0 %v798_v6  ;;  %v3782_v8 = vpop.f32.mrb[23].mxu1 }
 0x5d1   :  { %v801_v9 = vsel %vm276_vm2, %v797_v7, -inf }
 0x5d4   :  { %802 = vmax.xlane.f32.xlu0 %v801_v9 }
 0x655   :  { %v676_v10 = vpop.xlane.xlu0 %675 }
 0x656   :  { %v680_v14 = vsub.f32 %v672_v58, %v676_v10 }
 0x657   :  { %v679_v17 = vpop.xlane.xlu1 %678 }
 0x658   :  { %v682_v18 = vmul.f32 1.442695, %v680_v14  ;;  %v681_v19 = vsub.f32 %v673_v62, %v679_v17 }
 0x65a   :  { %4120 = vpow2.f32 %v682_v18  ;;  %v684_v12 = vmul.f32 1.442695, %v681_v19 }
 0x65c   :  { %4122 = vpow2.f32 %v684_v12 }
 0x65d   :  { %v800_v21 = vpop.xlane.xlu0 %799 }
 0x65e   :  { %v804_v22 = vsub.f32 %v796_v4, %v800_v21 }
 0x660   :  { %v806_v23 = vmul.f32 1.442695, %v804_v22 }
 0x661   :  { %v803_v24 = vpop.xlane.xlu0 %802 }
 0x662   :  { %4124 = vpow2.f32 %v806_v23  ;;  %v805_v25 = vsub.f32 %v797_v7, %v803_v24 }
 0x664   :  { %v4121_v26 = vpop.eup %4120  ;;  %v808_v27 = vmul.f32 1.442695, %v805_v25 }
 0x665   :  { %v686_v29 = vsel %vm276_vm2, %v4121_v26, 0.0 }
 0x666   :  { %v4123_v30 = vpop.eup %4122  ;;  %4126 = vpow2.f32 %v808_v27  ;;  %687 = vadd.xlane.f32.xlu1 %v686_v29 }
 0x667   :  { %v689_v31 = vsel %vm276_vm2, %v4123_v30, 0.0 }
 0x668   :  { %690 = vadd.xlane.f32.xlu0 %v689_v31 }
 0x66c   :  { %v4125_v32 = vpop.eup %4124 }
 0x66d   :  { %v810_v33 = vsel %vm276_vm2, %v4125_v32, 0.0 }
 0x66e   :  { %811 = vadd.xlane.f32.xlu1 %v810_v33 }
 0x670   :  { %v4127_v34 = vpop.eup %4126 }
 0x671   :  { %v813_v35 = vsel %vm276_vm2, %v4127_v34, 0.0 }
 0x672   :  { %814 = vadd.xlane.f32.xlu0 %v813_v35 }
 0x67f   :  { %697 = vrot.lane.b32.xlu1 %v4348_v2, %s4223_s28 }
 0x688   :  { %821 = vrot.lane.b32.xlu0 %v4348_v2, %s4222_s27  ;;  %v972_v2 = vsel %vm212_vm0, %v4473_v43, 0.0 }
 0x6a3   :  { %970 = vadd.xlane.f32.xlu1 %v969_v45 }
 0x6a7   :  { %973 = vadd.xlane.f32.xlu1 %v972_v2 }
 0x6ab   :  { %991 = vadd.xlane.f32.xlu1 %v990_v55 }
 0x6af   :  { %994 = vadd.xlane.f32.xlu1 %v993_v47  ;;  %v4065_v47 = vld [vmem:[%s5186_s4 + $0x18] sm:$0xff]  }
 0x6c0   :  { %1035 = vrot.lane.b32.xlu1 %v4465_v36, %s4220_s25 }
 0x6c4   :  { %1634 = vrot.lane.b32.xlu1 %v4465_v36, %s4224_s13 }
 0x6f3   :  { %v688_v49 = vpop.xlane.xlu1 %687 }
 0x6f4   :  { %4128 = vrcp.f32 %v688_v49  ;;  %v4527_v49 = vld [vmem:[%s5186_s4 + $0x20] sm:$0xff]  }
 0x6f5   :  { %v691_v50 = vpop.xlane.xlu0 %690 }
 0x6f6   :  { %4130 = vrcp.f32 %v691_v50  ;;  %v4070_v50 = vld [vmem:[%s5187_s5 + $0x20] sm:$0xff]  }
 0x6fb   :  { %v812_v54 = vpop.xlane.xlu1 %811 }
 0x6fc   :  { %4132 = vrcp.f32 %v812_v54 }
 0x6fe   :  { %v4129_v57 = vpop.eup %4128 }
 0x6ff   :  { %v698_v58 = vpop.permute.xlu1 %697  ;;  %v815_v59 = vpop.xlane.xlu0 %814  ;;  %v694_v61 = vmul.f32 %v4129_v57, %v4121_v26 }
 0x700   :  { %v4131_v60 = vpop.eup %4130  ;;  %4134 = vrcp.f32 %v815_v59  ;;  %3772 = vmatpush3.bf16.msra.mxu0 %v698_v58 }
 0x701   :  { %v695_v62 = vmul.f32 %v4131_v60, %v4123_v30  ;;  %3783 = vmatprep.subr.bf16.mxu0 %v4217_v56 }
 0x703   :  { %v822_v63 = vpop.permute.xlu0 %821  ;;  %v696_v0 = vpack.c.bf16 %v695_v62, %v694_v61 }
 0x705   :  { %3774 = vmatmul.mubr.msk.bf16.vlgmr.msra.gmra.mrb[12].mxu0 %vm276_vm2, %v696_v0 }
 0x706   :  { %3784 = vmatpush3.bf16.msra.mxu0 %v822_v63  ;;  %3785 = vmatprep.mubr.msk.bf16.mxu0 %vm4218_vm1, %v4217_v56  ;;  %v4133_v1 = vpop.eup %4132 }
 0x707   :  { %3795 = vmatprep.subr.bf16.mxu0 %v4217_v56  ;;  %v818_v5 = vmul.f32 %v4133_v1, %v4125_v32 }
 0x70a   :  { %v4135_v4 = vpop.eup %4134 }
 0x70b   :  { %v819_v3 = vmul.f32 %v4135_v4, %v4127_v34 }
 0x70d   :  { %v820_v6 = vpack.c.bf16 %v819_v3, %v818_v5 }
 0x70f   :  { %3786 = vmatmul.mubr.msk.bf16.vlgmr.msra.gmra.mrb[16].mxu0 %vm276_vm2, %v820_v6 }
 0x710   :  { %3796 = vmatpush3.bf16.msra.mxu0 %v4417_v20  ;;  %3797 = vmatprep.mubr.msk.bf16.mxu0 %vm4218_vm1, %v4217_v56 }
 0x711   :  { %3825 = vmatprep.subr.bf16.mxu0 %v4070_v50 }
 0x730   :  { %v971_v54 = vpop.xlane.xlu1 %970 }
 0x731   :  { %v982_v59 = vmul.f32 0.03125, %v971_v54 }
 0x733   :  { %v1006_v0 = vmul.f32 %v982_v59, %v982_v59 }
 0x734   :  { %v974_v57 = vpop.xlane.xlu1 %973 }
 0x735   :  { %v983_v61 = vmul.f32 0.03125, %v974_v57 }
 0x737   :  { %v1007_v1 = vmul.f32 %v983_v61, %v983_v61 }
 0x738   :  { %v992_v58 = vpop.xlane.xlu1 %991 }
 0x739   :  { %v1002_v62 = vmul.f32 0.03125, %v992_v58 }
 0x73b   :  { %v1010_v4 = vsub.f32 %v1002_v62, %v1006_v0 }
 0x73c   :  { %v995_v60 = vpop.xlane.xlu1 %994 }
 0x73d   :  { %v1003_v63 = vmul.f32 0.03125, %v995_v60  ;;  %v1014_v3 = vmax.f32 %v1010_v4, 0.0 }
 0x73f   :  { %v1011_v5 = vsub.f32 %v1003_v63, %v1007_v1  ;;  %v44_v63 = vadd.s32 16, %v4298_v13 }
 0x741   :  { %v1015_v6 = vmax.f32 %v1011_v5, 0.0 }
 0x7d8   :  { %v737_v7 = vpop.f32.mrb[12].mxu0 }
 0x7d9   :  { %v3775_v8 = vpop.f32.mrb[13].mxu0 }
 0x7da   :  { %v740_v9 = vpop.f32.mrb[14].mxu0  ;;  %v1022_v8 = vadd.f32 1e-05, %v1014_v3 }
 0x7db   :  { %v744_v10 = vpack.c.bf16 %v740_v9, %v737_v7  ;;  %v3776_v14 = vpop.f32.mrb[15].mxu0  ;;  %v1023_v9 = vadd.f32 1e-05, %v1015_v6 }
 0x7dc   :  { %4136 = vrsqrt.f32 %v1022_v8 }
 0x7dd   :  { %3798 = vmatmul.mubr.msk.bf16.vlgmr.msra.gmra.mrb[20].mxu0 %vm276_vm2, %v744_v10  ;;  %4138 = vrsqrt.f32 %v1023_v9 }
 0x7de   :  { %3826 = vmatpush3.bf16.msra.mxu0 %v4070_v50 }
 0x7e2   :  { %v861_v17 = vpop.f32.mrb[16].mxu0 }
 0x7e3   :  { %v3787_v18 = vpop.f32.mrb[17].mxu0 }
 0x7e4   :  { %v864_v19 = vpop.f32.mrb[18].mxu0 }
 0x7e5   :  { %v868_v12 = vpack.c.bf16 %v864_v19, %v861_v17  ;;  %v3788_v21 = vpop.f32.mrb[19].mxu0 }
 0x7e7   :  { %3792 = vmatmul.mubr.msk.bf16.vlgmr.msra.gmra.mrb[24].mxu1 %vm276_vm2, %v868_v12 }
 0x7e8   :  { %3802 = vmatpush3.bf16.msra.mxu1 %v4064_v46 }
 0x7e9   :  { %3803 = vmatprep.subr.bf16.mxu1 %v4065_v47 }
 0x7ec   :  { %3804 = vmatpush3.bf16.msra.mxu1 %v4065_v47 }
 0x7ed   :  { %3809 = vmatprep.subr.bf16.mxu1 %v4527_v49 }
 0x8b0   :  { %v950_v22 = vpop.f32.mrb[20].mxu0 }
 0x8b1   :  { %v3799_v23 = vpop.f32.mrb[21].mxu0 }
 0x8b2   :  { %v953_v20 = vpop.f32.mrb[22].mxu0 }
 0x8b3   :  { %v3800_v24 = vpop.f32.mrb[23].mxu0 }
 0x8ba   :  { %v906_v25 = vpop.f32.mrb[24].mxu1 }
 0x8bb   :  { %v951_v26 = vadd.f32 %v950_v22, %v906_v25  ;;  %v3793_v27 = vpop.f32.mrb[25].mxu1 }
 0x8bc   :  { %v909_v29 = vpop.f32.mrb[26].mxu1  ;;  %v4137_v27 = vpop.eup %4136 }
 0x8bd   :  { %v963_v30 = vadd.f32 %v4465_v36, %v951_v26  ;;  %v954_v31 = vadd.f32 %v953_v20, %v909_v29  ;;  %v3794_v32 = vpop.f32.mrb[27].mxu1 }
 0x8be   :  { %v1019_v32 = vsub.f32 %v4473_v43, %v983_v61 }
 0x8bf   :  { %v4500_v33 = vadd.f32 %v963_v30, %v4328_v52  ;;  %v964_v34 = vadd.f32 %v4465_v36, %v954_v31  ;;  %v4139_v30 = vpop.eup %4138  ;;  %v1018_v31 = vsub.f32 %v4469_v38, %v982_v59 }
 0x8c1   :  { %v4504_v35 = vadd.f32 %v964_v34, %v4331_v53  ;;  %v975_v37 = vsel %vm212_vm0, %v4500_v33, 0.0  ;;  %v988_v16 = vmul.f32 %v4500_v33, %v4500_v33 }
 0x8c2   :  { %976 = vadd.xlane.f32.xlu0 %v975_v37  ;;  %v1030_v37 = vmul.f32 %v4137_v27, %v1018_v31 }
 0x8c3   :  { %v978_v42 = vsel %vm212_vm0, %v4504_v35, 0.0  ;;  %v989_v45 = vmul.f32 %v4504_v35, %v4504_v35  ;;  %v996_v55 = vsel %vm212_vm0, %v988_v16, 0.0 }
 0x8c5   :  { %v999_v2 = vsel %vm212_vm0, %v989_v45, 0.0  ;;  %v1036_v45 = vpop.permute.xlu1 %1035 }
 0x8c6   :  { %979 = vadd.xlane.f32.xlu0 %v978_v42  ;;  %v1031_v42 = vmul.f32 %v4139_v30, %v1019_v32  ;;  %v1038_v16 = vmul.f32 %v1036_v45, %v1030_v37  ;;  %v4069_v37 = vld [vmem:[%s5186_s4 + $0x8] sm:$0xff]  }
 0x8ca   :  { %1000 = vadd.xlane.f32.xlu0 %v999_v2 }
 0x8ce   :  { %997 = vadd.xlane.f32.xlu0 %v996_v55  ;;  %v1039_v55 = vmul.f32 %v1036_v45, %v1031_v42 }
 0x8e4   :  { %1042 = vrot.lane.b32.xlu0 %v4465_v36, %s4223_s28 }
 0x94f   :  { %v977_v7 = vpop.xlane.xlu0 %976 }
 0x950   :  { %v984_v18 = vmul.f32 0.03125, %v977_v7  ;;  %v64_v7 = vand.u32 15, %v44_v63 }
 0x952   :  { %v1008_v23 = vmul.f32 %v984_v18, %v984_v18  ;;  %v1020_v38 = vsub.f32 %v4500_v33, %v984_v18  ;;  %vm4566_vm7 = vcmp.ge.s32.totalorder %v64_v7, 1  ;;  %vm4602_vm10 = vcmp.ge.s32.totalorder %v64_v7, 2 }
 0x953   :  { %v980_v10 = vpop.xlane.xlu0 %979 }
 0x954   :  { %v985_v14 = vmul.f32 0.03125, %v980_v10 }
 0x956   :  { %v1009_v19 = vmul.f32 %v985_v14, %v985_v14  ;;  %v1021_v46 = vsub.f32 %v4504_v35, %v985_v14  ;;  %v50_v35 = vand.u32 15, %v4298_v13 }
 0x957   :  { %v1001_v17 = vpop.xlane.xlu0 %1000 }
 0x958   :  { %v1005_v12 = vmul.f32 0.03125, %v1001_v17  ;;  %vm4554_vm6 = vcmp.ge.s32.totalorder %v50_v35, 1  ;;  %vm4587_vm9 = vcmp.ge.s32.totalorder %v50_v35, 2 }
 0x95a   :  { %v1013_v21 = vsub.f32 %v1005_v12, %v1009_v19  ;;  %v4098_v19 = vld [vmem:[%s5187_s5 + $0xb0] sm:$0xff]  }
 0x95b   :  { %v998_v22 = vpop.xlane.xlu0 %997 }
 0x95c   :  { %v1017_v20 = vmax.f32 %v1013_v21, 0.0  ;;  %v1004_v24 = vmul.f32 0.03125, %v998_v22 }
 0x95e   :  { %v1025_v25 = vadd.f32 1e-05, %v1017_v20  ;;  %v1012_v26 = vsub.f32 %v1004_v24, %v1008_v23  ;;  %v4067_v20 = vld [vmem:[%s5186_s4 + $0x28] sm:$0xff]  }
 0x95f   :  { %v1043_v2 = vpop.permute.xlu0 %1042 }
 0x960   :  { %4140 = vrsqrt.f32 %v1025_v25  ;;  %v1016_v29 = vmax.f32 %v1012_v26, 0.0  ;;  %v4536_v50 = vadd.f32 %v1043_v2, %v1038_v16  ;;  %v4538_v54 = vadd.f32 %v1043_v2, %v1039_v55  ;;  %v4068_v26 = vld [vmem:[%s5186_s4] sm:$0xff]  }
 0x962   :  { %v1024_v34 = vadd.f32 1e-05, %v1016_v29  ;;  %v1049_v59 = vmul.f32 %v4536_v50, %v4312_v40  ;;  %v1050_v60 = vmul.f32 %v4538_v54, %v4310_v39  ;;  %v4099_v29 = vld [vmem:[%s5187_s5 + $0xb8] sm:$0xff]  }
 0x964   :  { %4142 = vrsqrt.f32 %v1024_v34  ;;  %v1060_v33 = vrot.slane %v1049_v59, 7  ;;  %v1061_v4 = vrot.slane %v1050_v60, 7  ;;  %v1053_v24 = vpack.c.bf16 %v1050_v60, %v1049_v59 }
 0x965   :  { %v1222_v27 = vrot.slane %v1049_v59, 6  ;;  %v1223_v31 = vrot.slane %v1050_v60, 6  ;;  %v4630_v59 = vld [vmem:[%s5184_s6 + $0x8] sm:$0x3f] }
 0x966   :  { %v1067_v10 = vsel %vm1064_vm5, %v1060_v33, %v1061_v4  ;;  %v4635_v60 = vrot.slane %v4630_v59, %v160_v28 }
 0x967   :  { %v1229_v34 = vsel %vm1226_vm8, %v1222_v27, %v1223_v31 }
 0x96a   :  { %v4141_v47 = vpop.eup %4140 }
 0x96b   :  { %v1033_v57 = vmul.f32 %v4141_v47, %v1021_v46 }
 0x96d   :  { %v1041_v58 = vmul.f32 %v1036_v45, %v1033_v57  ;;  %v4071_v57 = vld [vmem:[%s5187_s5 + $0x28] sm:$0xff]  }
 0x96e   :  { %v4143_v43 = vpop.eup %4142  ;;  %3827 = vmatprep.subr.bf16.mxu0 %v4071_v57 }
 0x96f   :  { %v1032_v61 = vmul.f32 %v4143_v43, %v1020_v38  ;;  %v4545_v62 = vadd.f32 %v1043_v2, %v1041_v58  ;;  %3828 = vmatpush3.bf16.msra.mxu0 %v4071_v57  ;;  %v4072_v38 = vld [vmem:[%s5187_s5 + $0x30] sm:$0xff]   ;;  %v4073_v58 = vld [vmem:[%s5187_s5 + $0x38] sm:$0xff]   ;;  %v4074_v43 = vld [vmem:[%s5187_s5 + $0x40] sm:$0xff]  }
 0x970   :  { %3829 = vmatprep.subr.bf16.mxu0 %v4072_v38 }
 0x971   :  { %v1040_v0 = vmul.f32 %v1036_v45, %v1032_v61  ;;  %v1052_v1 = vmul.f32 %v4545_v62, %v4325_v51 }
 0x973   :  { %v4552_v5 = vadd.f32 %v1043_v2, %v1040_v0  ;;  %v1063_v3 = vrot.slane %v1052_v1, 7  ;;  %v1225_v25 = vrot.slane %v1052_v1, 6  ;;  %3830 = vmatpush3.bf16.msra.mxu0 %v4072_v38  ;;  %v4075_v38 = vld [vmem:[%s5187_s5 + $0x48] sm:$0xff]   ;;  %v4100_v2 = vld [vmem:[%s5187_s5 + $0x60] sm:$0xff]  }
 0x974   :  { %3831 = vmatprep.subr.bf16.mxu0 %v4073_v58 }
 0x975   :  { %v1051_v8 = vmul.f32 %v4552_v5, %v4322_v48  ;;  %v1068_v9 = vsel %vm1064_vm5, %v1063_v3, %v1060_v33  ;;  %v1230_v30 = vsel %vm1226_vm8, %v1225_v25, %v1222_v27 }
 0x976   :  { %v1077_v14 = vsel %vm4554_vm6, %v1068_v9, 0.0 }
 0x977   :  { %v1062_v17 = vrot.slane %v1051_v8, 7  ;;  %v1081_v18 = vpack.c.bf16 %v1067_v10, %v1077_v14  ;;  %v1054_v32 = vpack.c.bf16 %v1052_v1, %v1051_v8  ;;  %v1224_v45 = vrot.slane %v1051_v8, 6  ;;  %3832 = vmatpush3.bf16.msra.mxu0 %v4073_v58 }
 0x978   :  { %3837 = vmatprep.subr.bf16.mxu0 %v4074_v43 }
 0x979   :  { %3805 = vmatprep.mubr.msk.bf16.mxu1 %vm212_vm0, %v1081_v18  ;;  %v1065_v12 = vsel %vm1064_vm5, %v1062_v17, %v1063_v3  ;;  %v1066_v21 = vsel %vm1064_vm5, %v1061_v4, %v1062_v17  ;;  %v1228_v16 = vsel %vm1226_vm8, %v1223_v31, %v1224_v45  ;;  %v1227_v55 = vsel %vm1226_vm8, %v1224_v45, %v1225_v25 }
 0x97a   :  { %v1079_v22 = vsel %vm4566_vm7, %v1066_v21, 0.0  ;;  %v1241_v46 = vsel %vm4602_vm10, %v1228_v16, 0.0 }
 0x97b   :  { %v1082_v23 = vpack.c.bf16 %v1065_v12, %v1079_v22  ;;  %v1244_v47 = vpack.c.bf16 %v1227_v55, %v1241_v46 }
 0x97d   :  { %3806 = vmatmul.mubr.msk.bf16.vlgmr.msra.gmra.mrb[28].mxu1 %vm212_vm0, %v1082_v23 }
 0x97e   :  { %3813 = vmatprep.mubr.msk.bf16.mxu1 %vm212_vm0, %v1053_v24  ;;  %3810 = vmatpush3.bf16.msra.mxu1 %v4527_v49  ;;  %v1239_v49 = vsel %vm4587_vm9, %v1230_v30, 0.0 }
 0x97f   :  { %3811 = vmatprep.subr.bf16.mxu1 %v4067_v20  ;;  %v1243_v42 = vpack.c.bf16 %v1229_v34, %v1239_v49 }
 0x982   :  { %3812 = vmatpush3.bf16.msra.mxu1 %v4067_v20 }
 0x983   :  { %3817 = vmatprep.subr.bf16.mxu1 %v4068_v26 }
 0x989   :  { %3814 = vmatmul.mubr.msk.bf16.vlgmr.msra.gmra.mrb[28].mxu1 %vm212_vm0, %v1054_v32 }
 0x98a   :  { %3821 = vmatprep.mubr.msk.bf16.mxu1 %vm212_vm0, %v1243_v42  ;;  %3818 = vmatpush3.bf16.msra.mxu1 %v4068_v26 }
 0x98b   :  { %3819 = vmatprep.subr.bf16.mxu1 %v4069_v37 }
 0x98e   :  { %3820 = vmatpush3.bf16.msra.mxu1 %v4069_v37 }
 0x995   :  { %3822 = vmatmul.mubr.msk.bf16.vlgmr.msra.gmra.mrb[28].mxu1 %vm212_vm0, %v1244_v47 }
 0xa68   :  { %v3823_v61 = vpop.f32.mrb[28].mxu1 }
 0xa69   :  { %v1326_v35 = vadd.f32 %v3823_v61, %v4635_v60  ;;  %v1301_v63 = vpop.f32.mrb[29].mxu1 }
 0xa6a   :  { %v1324_v0 = vadd.f32 %v4635_v60, %v1301_v63  ;;  %v3824_v1 = vpop.f32.mrb[30].mxu1  ;;  %v4076_v63 = vld [vmem:[%s5187_s5 + $0x50] sm:$0xff]  }
 0xa6b   :  { %v1330_v33 = vmax.f32 %v1326_v35, 0.0  ;;  %v1327_v36 = vadd.f32 %v3824_v1, %v4635_v60  ;;  %v1304_v4 = vpop.f32.mrb[31].mxu1  ;;  %v4078_v1 = vld [vmem:[%s5187_s5] sm:$0xff]  }
 0xa6c   :  { %v1328_v3 = vmax.f32 %v1324_v0, 0.0  ;;  %v1325_v7 = vadd.f32 %v4635_v60, %v1304_v4  ;;  %v4077_v0 = vld [vmem:[%s5187_s5 + $0x58] sm:$0xff]   ;;  %v1635_v4 = vpop.permute.xlu1 %1634 }
 0xa6d   :  { %v1334_v8 = vmul.f32 %v1330_v33, %v4322_v48  ;;  %v1331_v9 = vmax.f32 %v1327_v36, 0.0  ;;  %v4080_v33 = vld [vmem:[%s5187_s5 + $0x10] sm:$0xff]   ;;  %v4081_v36 = vld [vmem:[%s5187_s5 + $0x18] sm:$0xff]  }
 0xa6e   :  { %v1332_v28 = vmul.f32 %v1328_v3, %v4312_v40  ;;  %v1329_v10 = vmax.f32 %v1325_v7, 0.0 }
 0xa6f   :  { %v1335_v14 = vmul.f32 %v1331_v9, %v4325_v51  ;;  %v1349_v17 = vrot.slane %v1334_v8, 7  ;;  %v1531_v22 = vrot.slane %v1334_v8, 6 }
 0xa70   :  { %v1347_v18 = vrot.slane %v1332_v28, 7  ;;  %v1529_v12 = vrot.slane %v1332_v28, 6  ;;  %v1333_v21 = vmul.f32 %v1329_v10, %v4310_v39 }
 0xa71   :  { %v1337_v23 = vpack.c.bf16 %v1335_v14, %v1334_v8  ;;  %v1350_v20 = vrot.slane %v1335_v14, 7  ;;  %v1532_v24 = vrot.slane %v1335_v14, 6 }
 0xa72   :  { %v1348_v25 = vrot.slane %v1333_v21, 7  ;;  %v1530_v26 = vrot.slane %v1333_v21, 6  ;;  %v1336_v27 = vpack.c.bf16 %v1333_v21, %v1332_v28 }
 0xa73   :  { %v1351_v30 = vsel %vm1064_vm5, %v1349_v17, %v1350_v20  ;;  %v1533_v31 = vsel %vm1226_vm8, %v1531_v22, %v1532_v24  ;;  %v1354_v49 = vsel %vm1064_vm5, %v1350_v20, %v1347_v18  ;;  %v1536_v32 = vsel %vm1226_vm8, %v1532_v24, %v1529_v12 }
 0xa74   :  { %v1352_v34 = vsel %vm1064_vm5, %v1348_v25, %v1349_v17  ;;  %v1534_v37 = vsel %vm1226_vm8, %v1530_v26, %v1531_v22  ;;  %v1353_v42 = vsel %vm1064_vm5, %v1347_v18, %v1348_v25  ;;  %v1355_v45 = vsel %vm4554_vm6, %v1354_v49, 0.0 }
 0xa75   :  { %v1359_v16 = vpack.c.bf16 %v1353_v42, %v1355_v45  ;;  %v1357_v55 = vsel %vm4566_vm7, %v1352_v34, 0.0  ;;  %v1535_v46 = vsel %vm1226_vm8, %v1529_v12, %v1530_v26  ;;  %v1537_v47 = vsel %vm4587_vm9, %v1536_v32, 0.0  ;;  %v4082_v42 = vld [vmem:[%s5183_s2 + $0x10] sm:$0xff]   ;;  %v4083_v45 = vld [vmem:[%s5183_s2 + $0x18] sm:$0xff]  }
 0xa76   :  { %v1360_v57 = vpack.c.bf16 %v1351_v30, %v1357_v55  ;;  %v1541_v58 = vpack.c.bf16 %v1535_v46, %v1537_v47  ;;  %v1539_v61 = vsel %vm4602_vm10, %v1534_v37, 0.0  ;;  %3861 = vmatprep.subr.bf16.mxu1 %v4082_v42 }
 0xa77   :  { %3833 = vmatprep.mubr.msk.bf16.mxu0 %vm1394_vm11, %v1359_v16  ;;  %v1542_v35 = vpack.c.bf16 %v1533_v31, %v1539_v61  ;;  %3862 = vmatpush3.bf16.msra.mxu1 %v4082_v42 }
 0xa78   :  { %3834 = vmatmul.mubr.msk.bf16.vlgmr.msra.gmra.mrb[24].mxu0 %vm1394_vm11, %v1360_v57  ;;  %3863 = vmatprep.subr.bf16.mxu1 %v4083_v45 }
 0xa79   :  { %3838 = vmatpush3.bf16.msra.mxu0 %v4074_v43  ;;  %3845 = vmatprep.mubr.msk.bf16.mxu0 %vm1394_vm11, %v1336_v27  ;;  %v4079_v43 = vld [vmem:[%s5187_s5 + $0x8] sm:$0xff]  }
 0xa7a   :  { %3839 = vmatprep.subr.bf16.mxu0 %v4075_v38 }
 0xa7b   :  { %3864 = vmatpush3.bf16.msra.mxu1 %v4083_v45 }
 0xa7c   :  { %3869 = vmatprep.subr.bf16.mxu1 %v4217_v56 }
 0xa7d   :  { %3840 = vmatpush3.bf16.msra.mxu0 %v4075_v38 }
 0xa7e   :  { %3841 = vmatprep.subr.bf16.mxu0 %v4076_v63 }
 0xa81   :  { %3842 = vmatpush3.bf16.msra.mxu0 %v4076_v63 }
 0xa82   :  { %3843 = vmatprep.subr.bf16.mxu0 %v4077_v0 }
 0xa85   :  { %3844 = vmatpush3.bf16.msra.mxu0 %v4077_v0 }
 0xa86   :  { %3849 = vmatprep.subr.bf16.mxu0 %v4078_v1 }
 0xa88   :  { %3846 = vmatmul.mubr.msk.bf16.vlgmr.msra.gmra.mrb[24].mxu0 %vm1394_vm11, %v1337_v23 }
 0xa89   :  { %3850 = vmatpush3.bf16.msra.mxu0 %v4078_v1  ;;  %3857 = vmatprep.mubr.msk.bf16.mxu0 %vm1394_vm11, %v1541_v58 }
 0xa8a   :  { %3851 = vmatprep.subr.bf16.mxu0 %v4079_v43 }
 0xa8d   :  { %3852 = vmatpush3.bf16.msra.mxu0 %v4079_v43 }
 0xa8e   :  { %3853 = vmatprep.subr.bf16.mxu0 %v4080_v33 }
 0xa91   :  { %3854 = vmatpush3.bf16.msra.mxu0 %v4080_v33 }
 0xa92   :  { %3855 = vmatprep.subr.bf16.mxu0 %v4081_v36 }
 0xa95   :  { %3856 = vmatpush3.bf16.msra.mxu0 %v4081_v36 }
 0xa96   :  { %3887 = vmatprep.subr.bf16.mxu0 %v4217_v56 }
 0xa98   :  { %3858 = vmatmul.mubr.msk.bf16.vlgmr.msra.gmra.mrb[24].mxu0 %vm1394_vm11, %v1542_v35 }
 0xa99   :  { %3889 = vmatprep.mubr.msk.bf16.mxu0 %vm4218_vm1, %v4217_v56 }
 0xb6b   :  { %v3859_v3 = vpop.f32.mrb[24].mxu0 }
 0xb6c   :  { %v1639_v7 = vadd.f32 %v3859_v3, %v1635_v4  ;;  %v1615_v8 = vpop.f32.mrb[25].mxu0 }
 0xb6d   :  { %v1637_v9 = vadd.f32 %v1635_v4, %v1615_v8  ;;  %v3860_v28 = vpop.f32.mrb[26].mxu0 }
 0xb6e   :  { %v1643_v10 = vmul.f32 %v1639_v7, %v4322_v48  ;;  %v1640_v14 = vadd.f32 %v3860_v28, %v1635_v4  ;;  %v1618_v17 = vpop.f32.mrb[27].mxu0 }
 0xb6f   :  { %v1641_v18 = vmul.f32 %v1637_v9, %v4312_v40  ;;  %v1638_v12 = vadd.f32 %v1635_v4, %v1618_v17 }
 0xb70   :  { %v4702_v21 = vadd.f32 %v1643_v10, %v4552_v5  ;;  %v1644_v22 = vmul.f32 %v1640_v14, %v4325_v51 }
 0xb71   :  { %v4706_v23 = vadd.f32 %v1641_v18, %v4536_v50  ;;  %v1642_v20 = vmul.f32 %v1638_v12, %v4310_v39 }
 0xb72   :  { %v1655_v24 = vsel %vm212_vm0, %v4702_v21, 0.0  ;;  %v4712_v25 = vadd.f32 %v1644_v22, %v4545_v62  ;;  %v1667_v31 = vmul.f32 %v4702_v21, %v4702_v21 }
 0xb73   :  { %v4715_v26 = vadd.f32 %v1642_v20, %v4538_v54  ;;  %1656 = vadd.xlane.f32.xlu0 %v1655_v24  ;;  %v1649_v5 = vsel %vm212_vm0, %v4706_v23, 0.0  ;;  %v1665_v27 = vmul.f32 %v4706_v23, %v4706_v23 }
 0xb74   :  { %1650 = vadd.xlane.f32.xlu1 %v1649_v5  ;;  %v1658_v30 = vsel %vm212_vm0, %v4712_v25, 0.0  ;;  %v1668_v32 = vmul.f32 %v4712_v25, %v4712_v25  ;;  %v1675_v34 = vsel %vm212_vm0, %v1667_v31, 0.0 }
 0xb75   :  { %v1652_v50 = vsel %vm212_vm0, %v4715_v26, 0.0  ;;  %v1666_v62 = vmul.f32 %v4715_v26, %v4715_v26  ;;  %v1669_v54 = vsel %vm212_vm0, %v1665_v27, 0.0 }
 0xb76   :  { %v1678_v37 = vsel %vm212_vm0, %v1668_v32, 0.0 }
 0xb77   :  { %1653 = vadd.xlane.f32.xlu0 %v1652_v50  ;;  %v1672_v49 = vsel %vm212_vm0, %v1666_v62, 0.0 }
 0xb78   :  { %1659 = vadd.xlane.f32.xlu1 %v1658_v30 }
 0xb7b   :  { %1670 = vadd.xlane.f32.xlu0 %v1669_v54 }
 0xb7c   :  { %1673 = vadd.xlane.f32.xlu1 %v1672_v49 }
 0xb7f   :  { %1676 = vadd.xlane.f32.xlu0 %v1675_v34 }
 0xb80   :  { %1679 = vadd.xlane.f32.xlu1 %v1678_v37 }
 0xb91   :  { %1721 = vrot.lane.b32.xlu1 %v4635_v60, %s4224_s13 }
 0xb95   :  { %1714 = vrot.lane.b32.xlu0 %v4635_v60, %s4223_s28 }
 0xc00   :  { %v1657_v16 = vpop.xlane.xlu0 %1656 }
 0xc01   :  { %v1651_v55 = vpop.xlane.xlu1 %1650  ;;  %v1663_v58 = vmul.f32 0.03125, %v1657_v16 }
 0xc02   :  { %v1661_v47 = vmul.f32 0.03125, %v1651_v55 }
 0xc03   :  { %v1687_v3 = vmul.f32 %v1663_v58, %v1663_v58  ;;  %v1699_v37 = vsub.f32 %v4702_v21, %v1663_v58  ;;  %v1737_v58 = vsub.s32 3, %v4298_v13 }
 0xc04   :  { %v1654_v46 = vpop.xlane.xlu0 %1653  ;;  %v1685_v61 = vmul.f32 %v1661_v47, %v1661_v47  ;;  %v1697_v27 = vsub.f32 %v4706_v23, %v1661_v47 }
 0xc05   :  { %v1660_v57 = vpop.xlane.xlu1 %1659  ;;  %v1662_v60 = vmul.f32 0.03125, %v1654_v46 }
 0xc06   :  { %v1664_v1 = vmul.f32 0.03125, %v1660_v57 }
 0xc07   :  { %v1686_v0 = vmul.f32 %v1662_v60, %v1662_v60  ;;  %v1698_v62 = vsub.f32 %v4715_v26, %v1662_v60 }
 0xc08   :  { %v1671_v38 = vpop.xlane.xlu0 %1670  ;;  %v1688_v28 = vmul.f32 %v1664_v1, %v1664_v1  ;;  %v1700_v16 = vsub.f32 %v4712_v25, %v1664_v1 }
 0xc09   :  { %v1681_v35 = vmul.f32 0.03125, %v1671_v38  ;;  %v1674_v63 = vpop.xlane.xlu1 %1673 }
 0xc0a   :  { %v1682_v43 = vmul.f32 0.03125, %v1674_v63  ;;  %v1738_v63 = vrot.slane %v4630_v59, %v1737_v58 }
 0xc0b   :  { %v1689_v33 = vsub.f32 %v1681_v35, %v1685_v61 }
 0xc0c   :  { %v1690_v36 = vsub.f32 %v1682_v43, %v1686_v0  ;;  %v1677_v4 = vpop.xlane.xlu0 %1676 }
 0xc0d   :  { %v1693_v7 = vmax.f32 %v1689_v33, 0.0  ;;  %v1683_v8 = vmul.f32 0.03125, %v1677_v4  ;;  %v1680_v9 = vpop.xlane.xlu1 %1679 }
 0xc0e   :  { %v1694_v10 = vmax.f32 %v1690_v36, 0.0  ;;  %v1684_v14 = vmul.f32 0.03125, %v1680_v9 }
 0xc0f   :  { %v1701_v17 = vadd.f32 1e-05, %v1693_v7  ;;  %v1691_v18 = vsub.f32 %v1683_v8, %v1687_v3 }
 0xc10   :  { %v1702_v12 = vadd.f32 1e-05, %v1694_v10  ;;  %v1692_v22 = vsub.f32 %v1684_v14, %v1688_v28  ;;  %v1715_v54 = vpop.permute.xlu0 %1714 }
 0xc11   :  { %4144 = vrsqrt.f32 %v1701_v17  ;;  %v1695_v20 = vmax.f32 %v1691_v18, 0.0  ;;  %v1722_v34 = vpop.permute.xlu1 %1721 }
 0xc12   :  { %4146 = vrsqrt.f32 %v1702_v12  ;;  %v1696_v24 = vmax.f32 %v1692_v22, 0.0 }
 0xc13   :  { %v1703_v5 = vadd.f32 1e-05, %v1695_v20 }
 0xc14   :  { %v1704_v50 = vadd.f32 1e-05, %v1696_v24 }
 0xc15   :  { %4148 = vrsqrt.f32 %v1703_v5 }
 0xc16   :  { %4150 = vrsqrt.f32 %v1704_v50 }
 0xc1b   :  { %v4145_v30 = vpop.eup %4144 }
 0xc1c   :  { %v4147_v31 = vpop.eup %4146  ;;  %v1709_v49 = vmul.f32 %v4145_v30, %v1697_v27 }
 0xc1d   :  { %v1710_v32 = vmul.f32 %v4147_v31, %v1698_v62 }
 0xc1e   :  { %v1717_v42 = vmul.f32 %v1715_v54, %v1709_v49 }
 0xc1f   :  { %v4149_v45 = vpop.eup %4148  ;;  %v1718_v55 = vmul.f32 %v1715_v54, %v1710_v32 }
 0xc20   :  { %v4151_v46 = vpop.eup %4150  ;;  %v1711_v57 = vmul.f32 %v4149_v45, %v1699_v37  ;;  %v4750_v38 = vadd.f32 %v1722_v34, %v1717_v42 }
 0xc21   :  { %v1712_v23 = vmul.f32 %v4151_v46, %v1700_v16  ;;  %v4752_v47 = vadd.f32 %v1722_v34, %v1718_v55 }
 0xc22   :  { %v1719_v26 = vmul.f32 %v1715_v54, %v1711_v57 }
 0xc23   :  { %v1720_v60 = vmul.f32 %v1715_v54, %v1712_v23  ;;  %v1728_v61 = vpack.c.bf16 %v4752_v47, %v4750_v38 }
 0xc24   :  { %v4756_v35 = vadd.f32 %v1722_v34, %v1719_v26 }
 0xc25   :  { %v4758_v21 = vadd.f32 %v1722_v34, %v1720_v60  ;;  %3865 = vmatprep.mubr.msk.bf16.mxu1 %vm212_vm0, %v1728_v61 }
 0xc27   :  { %v1729_v25 = vpack.c.bf16 %v4758_v21, %v4756_v35 }
 0xc29   :  { %3866 = vmatmul.mubr.msk.bf16.vlgmr.msra.gmra.mrb[32].mxu1 %vm212_vm0, %v1729_v25 }
 0xc2a   :  { %3871 = vmatprep.mubr.msk.bf16.mxu1 %vm4218_vm1, %v4217_v56 }
 0xcfc   :  { %v3867_v0 = vpop.f32.mrb[32].mxu1 }
 0xcfd   :  { %v1800_v1 = vadd.f32 %v3867_v0, %v1738_v63  ;;  %v1791_v43 = vpop.f32.mrb[33].mxu1 }
 0xcfe   :  { %v3868_v33 = vpop.f32.mrb[34].mxu1  ;;  %v1792_v3 = vadd.f32 %v1791_v43, %v1738_v63 }
 0xcff   :  { %v1803_v36 = vadd.f32 %v3868_v33, %v1738_v63  ;;  %v1794_v4 = vpop.f32.mrb[35].mxu1 }
 0xd00   :  { %v1795_v7 = vadd.f32 %v1794_v4, %v1738_v63 }
 0xd01   :  { %v4770_v8 = vpack.c.bf16 %v1803_v36, %v1800_v1 }
 0xd02   :  { %v4772_v9 = vpack.c.bf16 %v1795_v7, %v1792_v3 }
 0xd04   :  { %1813 = vrot.lane.b32.xlu1 %v4772_v9, %s4220_s25 }
 0xd76   :  { %v1814_v28 = vpop.permute.xlu1 %1813 }
 0xd77   :  { %v1819_v10 = vsel %vm276_vm2, %v1814_v28, 0 }
 0xd78   :  { %3870 = vmatpush3.bf16.xpose.msra.mxu1 %v1819_v10 }
 0xd79   :  { %3875 = vmatprep.subr.bf16.mxu1 %v4217_v56 }
 0xd7f   :  { %3872 = vmatmul.mubr.msk.bf16.vlgmr.msra.gmra.mrb[36].mxu1 %vm276_vm2, %v4772_v9 }
 0xd80   :  { %3877 = vmatprep.mubr.msk.bf16.mxu1 %vm4218_vm1, %v4217_v56 }
 0xe52   :  { %v1855_v14 = vpop.f32.mrb[36].mxu1 }
 0xe53   :  { %v1862_v17 = vsel %vm4372_vm3, %v1855_v14, -10000.0  ;;  %v3873_v18 = vpop.f32.mrb[37].mxu1 }
 0xe54   :  { %v1858_v12 = vpop.f32.mrb[38].mxu1  ;;  %v1864_v22 = vsel %vm276_vm2, %v1862_v17, -inf }
 0xe55   :  { %v1863_v20 = vsel %vm4376_vm4, %v1858_v12, -10000.0  ;;  %1865 = vmax.xlane.f32.xlu0 %v1864_v22  ;;  %v3874_v24 = vpop.f32.mrb[39].mxu1 }
 0xe56   :  { %v1867_v5 = vsel %vm276_vm2, %v1863_v20, -inf }
 0xe57   :  { %1868 = vmax.xlane.f32.xlu1 %v1867_v5 }
 0xe68   :  { %1887 = vrot.lane.b32.xlu1 %v4772_v9, %s4223_s28 }
 0xe6c   :  { %1935 = vrot.lane.b32.xlu1 %v4772_v9, %s4221_s26 }
 0xee2   :  { %v1866_v50 = vpop.xlane.xlu0 %1865 }
 0xee3   :  { %v1870_v27 = vsub.f32 %v1862_v17, %v1866_v50 }
 0xee4   :  { %v1869_v30 = vpop.xlane.xlu1 %1868 }
 0xee5   :  { %v1872_v62 = vmul.f32 1.442695, %v1870_v27  ;;  %v1871_v54 = vsub.f32 %v1863_v20, %v1869_v30 }
 0xee7   :  { %4152 = vpow2.f32 %v1872_v62  ;;  %v1874_v31 = vmul.f32 1.442695, %v1871_v54  ;;  %v4085_v54 = vld [vmem:[%s5185_s3 + $0x18] sm:$0xff]  }
 0xee8   :  { %v1888_v49 = vpop.permute.xlu1 %1887 }
 0xee9   :  { %4154 = vpow2.f32 %v1874_v31  ;;  %3876 = vmatpush3.bf16.msra.mxu1 %v1888_v49 }
 0xeea   :  { %3881 = vmatprep.subr.bf16.mxu1 %v4217_v56 }
 0xeec   :  { %v1936_v25 = vpop.permute.xlu1 %1935 }
 0xef1   :  { %v4153_v32 = vpop.eup %4152 }
 0xef2   :  { %v1876_v34 = vsel %vm276_vm2, %v4153_v32, 0.0 }
 0xef3   :  { %v4155_v37 = vpop.eup %4154  ;;  %1877 = vadd.xlane.f32.xlu0 %v1876_v34 }
 0xef4   :  { %v1879_v42 = vsel %vm276_vm2, %v4155_v37, 0.0 }
 0xef7   :  { %1880 = vadd.xlane.f32.xlu0 %v1879_v42 }
 0xf0d   :  { %1937 = vrot.lane.b32.xlu0 %v4772_v9, %s4219_s24 }
 0xf80   :  { %v1878_v45 = vpop.xlane.xlu0 %1877 }
 0xf81   :  { %4156 = vrcp.f32 %v1878_v45  ;;  %v4829_v45 = vld [vmem:[%s5185_s3 + $0x10] sm:$0xff]  }
 0xf84   :  { %v1881_v16 = vpop.xlane.xlu0 %1880 }
 0xf85   :  { %4158 = vrcp.f32 %v1881_v16 }
 0xf88   :  { %v1938_v26 = vpop.permute.xlu0 %1937 }
 0xf89   :  { %v1943_v61 = vsel %vm276_vm2, %v1938_v26, 0 }
 0xf8b   :  { %v4157_v55 = vpop.eup %4156 }
 0xf8c   :  { %v1884_v57 = vmul.f32 %v4157_v55, %v4153_v32 }
 0xf8f   :  { %v4159_v46 = vpop.eup %4158 }
 0xf90   :  { %v1885_v23 = vmul.f32 %v4159_v46, %v4155_v37 }
 0xf92   :  { %v1886_v60 = vpack.c.bf16 %v1885_v23, %v1884_v57 }
 0xf94   :  { %3878 = vmatmul.mubr.msk.bf16.vlgmr.msra.gmra.mrb[40].mxu1 %vm276_vm2, %v1886_v60 }
 0xf95   :  { %3882 = vmatpush3.bf16.xpose.msra.mxu1 %v1943_v61  ;;  %3883 = vmatprep.mubr.msk.bf16.mxu1 %vm4218_vm1, %v4217_v56 }
 0xf96   :  { %3893 = vmatprep.subr.bf16.mxu1 %v4217_v56 }
 0xf9c   :  { %3884 = vmatmul.mubr.msk.bf16.vlgmr.msra.gmra.mrb[44].mxu1 %vm276_vm2, %v1936_v25 }
 0xf9d   :  { %3895 = vmatprep.mubr.msk.bf16.mxu1 %vm4218_vm1, %v4217_v56  ;;  %3894 = vmatpush3.bf16.msra.mxu1 %v4085_v54 }
 0xf9e   :  { %3905 = vmatprep.subr.bf16.mxu1 %v4217_v56 }
0x1067   :  { %v1927_v63 = vpop.f32.mrb[40].mxu1 }
0x1068   :  { %v3879_v0 = vpop.f32.mrb[41].mxu1 }
0x1069   :  { %v1930_v1 = vpop.f32.mrb[42].mxu1 }
0x106a   :  { %v1934_v43 = vpack.c.bf16 %v1930_v1, %v1927_v63  ;;  %v3880_v33 = vpop.f32.mrb[43].mxu1 }
0x106f   :  { %v1979_v36 = vpop.f32.mrb[44].mxu1 }
0x1070   :  { %v1986_v4 = vsel %vm4372_vm3, %v1979_v36, -10000.0  ;;  %v3885_v3 = vpop.f32.mrb[45].mxu1 }
0x1071   :  { %v1982_v7 = vpop.f32.mrb[46].mxu1  ;;  %v1988_v28 = vsel %vm276_vm2, %v1986_v4, -inf }
0x1072   :  { %v1987_v10 = vsel %vm4376_vm4, %v1982_v7, -10000.0  ;;  %1989 = vmax.xlane.f32.xlu1 %v1988_v28  ;;  %v3886_v14 = vpop.f32.mrb[47].mxu1 }
0x1073   :  { %v1991_v17 = vsel %vm276_vm2, %v1987_v10, -inf }
0x1074   :  { %1992 = vmax.xlane.f32.xlu0 %v1991_v17 }
0x10ff   :  { %v1990_v18 = vpop.xlane.xlu1 %1989 }
0x1100   :  { %v1994_v12 = vsub.f32 %v1986_v4, %v1990_v18 }
0x1101   :  { %v1993_v22 = vpop.xlane.xlu0 %1992 }
0x1102   :  { %v1996_v20 = vmul.f32 1.442695, %v1994_v12  ;;  %v1995_v24 = vsub.f32 %v1987_v10, %v1993_v22 }
0x1104   :  { %4160 = vpow2.f32 %v1996_v20  ;;  %v1998_v5 = vmul.f32 1.442695, %v1995_v24 }
0x1106   :  { %4162 = vpow2.f32 %v1998_v5 }
0x110e   :  { %v4161_v50 = vpop.eup %4160 }
0x110f   :  { %v2000_v27 = vsel %vm276_vm2, %v4161_v50, 0.0 }
0x1110   :  { %v4163_v30 = vpop.eup %4162  ;;  %2001 = vadd.xlane.f32.xlu0 %v2000_v27 }
0x1111   :  { %v2003_v62 = vsel %vm276_vm2, %v4163_v30, 0.0 }
0x1112   :  { %2004 = vadd.xlane.f32.xlu1 %v2003_v62 }
0x1123   :  { %2161 = vrot.lane.b32.xlu1 %v4770_v8, %s4220_s25 }
0x1126   :  { %2011 = vrot.lane.b32.xlu0 %v4772_v9, %s4222_s27 }
0x1127   :  { %2285 = vrot.lane.b32.xlu1 %v4770_v8, %s4219_s24 }
0x112a   :  { %2283 = vrot.lane.b32.xlu0 %v4770_v8, %s4221_s26 }
0x119d   :  { %v2002_v31 = vpop.xlane.xlu0 %2001 }
0x119e   :  { %4164 = vrcp.f32 %v2002_v31 }
0x119f   :  { %v2005_v49 = vpop.xlane.xlu1 %2004 }
0x11a0   :  { %4166 = vrcp.f32 %v2005_v49 }
0x11a1   :  { %v2012_v32 = vpop.permute.xlu0 %2011 }
0x11a2   :  { %3888 = vmatpush3.bf16.msra.mxu0 %v2012_v32 }
0x11a3   :  { %3899 = vmatprep.subr.bf16.mxu0 %v4217_v56  ;;  %v2162_v57 = vpop.permute.xlu1 %2161 }
0x11a4   :  { %v2167_v61 = vsel %vm276_vm2, %v2162_v57, 0 }
0x11a5   :  { %v2284_v36 = vpop.permute.xlu0 %2283 }
0x11a7   :  { %v2286_v0 = vpop.permute.xlu1 %2285 }
0x11a8   :  { %v4165_v9 = vpop.eup %4164  ;;  %v2291_v33 = vsel %vm276_vm2, %v2286_v0, 0 }
0x11a9   :  { %v2008_v37 = vmul.f32 %v4165_v9, %v4161_v50 }
0x11aa   :  { %v4167_v34 = vpop.eup %4166 }
0x11ab   :  { %v2009_v42 = vmul.f32 %v4167_v34, %v4163_v30 }
0x11ad   :  { %v2010_v16 = vpack.c.bf16 %v2009_v42, %v2008_v37 }
0x11af   :  { %3890 = vmatmul.mubr.msk.bf16.vlgmr.msra.gmra.mrb[28].mxu0 %vm276_vm2, %v2010_v16 }
0x11b0   :  { %3900 = vmatpush3.bf16.msra.mxu0 %v4829_v45  ;;  %3901 = vmatprep.mubr.msk.bf16.mxu0 %vm4218_vm1, %v4217_v56 }
0x11b1   :  { %3911 = vmatprep.subr.bf16.mxu0 %v4217_v56 }
0x11b7   :  { %3902 = vmatmul.mubr.msk.bf16.vlgmr.msra.gmra.mrb[32].mxu0 %vm276_vm2, %v1934_v43 }
0x11b8   :  { %3913 = vmatprep.mubr.msk.bf16.mxu0 %vm4218_vm1, %v4217_v56 }
0x1282   :  { %v2051_v55 = vpop.f32.mrb[28].mxu0 }
0x1283   :  { %v3891_v46 = vpop.f32.mrb[29].mxu0 }
0x1284   :  { %v2054_v23 = vpop.f32.mrb[30].mxu0 }
0x1285   :  { %v2058_v26 = vpack.c.bf16 %v2054_v23, %v2051_v55  ;;  %v3892_v60 = vpop.f32.mrb[31].mxu0 }
0x1287   :  { %3896 = vmatmul.mubr.msk.bf16.vlgmr.msra.gmra.mrb[48].mxu1 %vm276_vm2, %v2058_v26 }
0x1288   :  { %3906 = vmatpush3.bf16.xpose.msra.mxu1 %v2167_v61  ;;  %3907 = vmatprep.mubr.msk.bf16.mxu1 %vm4218_vm1, %v4217_v56 }
0x1289   :  { %3917 = vmatprep.subr.bf16.mxu1 %v4217_v56 }
0x128a   :  { %v2152_v25 = vpop.f32.mrb[32].mxu0 }
0x128b   :  { %v3903_v63 = vpop.f32.mrb[33].mxu0 }
0x128c   :  { %v2155_v1 = vpop.f32.mrb[34].mxu0 }
0x128d   :  { %v3904_v43 = vpop.f32.mrb[35].mxu0 }
0x128f   :  { %3908 = vmatmul.mubr.msk.bf16.vlgmr.msra.gmra.mrb[52].mxu1 %vm276_vm2, %v4770_v8 }
0x1290   :  { %3918 = vmatpush3.bf16.xpose.msra.mxu1 %v2291_v33  ;;  %3919 = vmatprep.mubr.msk.bf16.mxu1 %vm4218_vm1, %v4217_v56 }
0x1291   :  { %3929 = vmatprep.subr.bf16.mxu1 %v4217_v56 }
0x1297   :  { %3920 = vmatmul.mubr.msk.bf16.vlgmr.msra.gmra.mrb[56].mxu1 %vm276_vm2, %v2284_v36 }
0x1298   :  { %3930 = vmatpush3.bf16.msra.mxu1 %v4085_v54  ;;  %3931 = vmatprep.mubr.msk.bf16.mxu1 %vm4218_vm1, %v4217_v56 }
0x135a   :  { %v2102_v4 = vpop.f32.mrb[48].mxu1 }
0x135b   :  { %v2153_v3 = vadd.f32 %v2152_v25, %v2102_v4  ;;  %v3897_v7 = vpop.f32.mrb[49].mxu1  ;;  %v2497_v4 = vsub.s32 4, %v4298_v13 }
0x135c   :  { %v2105_v28 = vpop.f32.mrb[50].mxu1 }
0x135d   :  { %v2156_v10 = vadd.f32 %v2155_v1, %v2105_v28  ;;  %v3898_v14 = vpop.f32.mrb[51].mxu1  ;;  %v4875_v7 = vrot.slane %v4630_v59, %v2497_v4 }
0x135f   :  { %v2499_v28 = vadd.f32 %v4875_v7, %v2153_v3  ;;  %v2500_v14 = vadd.f32 %v4875_v7, %v2156_v10 }
0x1362   :  { %v2203_v17 = vpop.f32.mrb[52].mxu1 }
0x1363   :  { %v2210_v18 = vsel %vm4372_vm3, %v2203_v17, -10000.0  ;;  %v3909_v12 = vpop.f32.mrb[53].mxu1  ;;  %v4880_v17 = vadd.f32 %v2499_v28, %v4750_v38 }
0x1364   :  { %v2206_v22 = vpop.f32.mrb[54].mxu1  ;;  %v2212_v20 = vsel %vm276_vm2, %v2210_v18, -inf }
0x1365   :  { %v2211_v24 = vsel %vm4376_vm4, %v2206_v22, -10000.0  ;;  %2213 = vmax.xlane.f32.xlu1 %v2212_v20  ;;  %v3910_v5 = vpop.f32.mrb[55].mxu1  ;;  %v2507_v59 = vsel %vm212_vm0, %v4880_v17, 0.0 }
0x1366   :  { %v2215_v50 = vsel %vm276_vm2, %v2211_v24, -inf }
0x1367   :  { %2216 = vmax.xlane.f32.xlu0 %v2215_v50 }
0x136a   :  { %v2327_v27 = vpop.f32.mrb[56].mxu1 }
0x136b   :  { %v2334_v30 = vsel %vm4372_vm3, %v2327_v27, -10000.0  ;;  %v3921_v62 = vpop.f32.mrb[57].mxu1 }
0x136c   :  { %v2330_v54 = vpop.f32.mrb[58].mxu1  ;;  %v2336_v31 = vsel %vm276_vm2, %v2334_v30, -inf }
0x136d   :  { %v2335_v49 = vsel %vm4376_vm4, %v2330_v54, -10000.0  ;;  %2337 = vmax.xlane.f32.xlu0 %v2336_v31  ;;  %v3922_v32 = vpop.f32.mrb[59].mxu1 }
0x136e   :  { %v2339_v9 = vsel %vm276_vm2, %v2335_v49, -inf }
0x136f   :  { %2340 = vmax.xlane.f32.xlu1 %v2339_v9 }
0x13f2   :  { %v2214_v34 = vpop.xlane.xlu1 %2213 }
0x13f3   :  { %v2218_v37 = vsub.f32 %v2210_v18, %v2214_v34  ;;  %v4883_v18 = vadd.f32 %v2500_v14, %v4752_v47 }
0x13f4   :  { %v2217_v42 = vpop.xlane.xlu0 %2216 }
0x13f5   :  { %v2220_v16 = vmul.f32 1.442695, %v2218_v37  ;;  %v2219_v55 = vsub.f32 %v2211_v24, %v2217_v42  ;;  %v2510_v12 = vsel %vm212_vm0, %v4883_v18, 0.0 }
0x13f7   :  { %4168 = vpow2.f32 %v2220_v16  ;;  %v2222_v11 = vmul.f32 1.442695, %v2219_v55 }
0x13f9   :  { %4170 = vpow2.f32 %v2222_v11 }
0x13fa   :  { %v2338_v46 = vpop.xlane.xlu0 %2337 }
0x13fb   :  { %v2342_v57 = vsub.f32 %v2334_v30, %v2338_v46 }
0x13fc   :  { %v2341_v23 = vpop.xlane.xlu1 %2340 }
0x13fd   :  { %v2344_v26 = vmul.f32 1.442695, %v2342_v57  ;;  %v2343_v60 = vsub.f32 %v2335_v49, %v2341_v23 }
0x13ff   :  { %4172 = vpow2.f32 %v2344_v26  ;;  %v2346_v15 = vmul.f32 1.442695, %v2343_v60 }
0x1401   :  { %v4169_v61 = vpop.eup %4168  ;;  %4174 = vpow2.f32 %v2346_v15 }
0x1402   :  { %v2224_v25 = vsel %vm276_vm2, %v4169_v61, 0.0 }
0x1403   :  { %v4171_v63 = vpop.eup %4170  ;;  %2225 = vadd.xlane.f32.xlu0 %v2224_v25 }
0x1404   :  { %v2227_v0 = vsel %vm276_vm2, %v4171_v63, 0.0 }
0x1405   :  { %2228 = vadd.xlane.f32.xlu1 %v2227_v0 }
0x1409   :  { %v4173_v1 = vpop.eup %4172 }
0x140a   :  { %v2348_v43 = vsel %vm276_vm2, %v4173_v1, 0.0 }
0x140b   :  { %v4175_v33 = vpop.eup %4174  ;;  %2349 = vadd.xlane.f32.xlu0 %v2348_v43 }
0x140c   :  { %v2351_v36 = vsel %vm276_vm2, %v4175_v33, 0.0 }
0x140d   :  { %2352 = vadd.xlane.f32.xlu1 %v2351_v36 }
0x141e   :  { %2359 = vrot.lane.b32.xlu1 %v4770_v8, %s4222_s27 }
0x1421   :  { %2235 = vrot.lane.b32.xlu0 %v4770_v8, %s4223_s28  ;;  %v2523_v8 = vmul.f32 %v4880_v17, %v4880_v17 }
0x1423   :  { %v2527_v3 = vsel %vm212_vm0, %v2523_v8, 0.0 }
0x1440   :  { %2511 = vadd.xlane.f32.xlu0 %v2510_v12 }
0x1442   :  { %2508 = vadd.xlane.f32.xlu1 %v2507_v59  ;;  %v2524_v59 = vmul.f32 %v4883_v18, %v4883_v18 }
0x1444   :  { %2528 = vadd.xlane.f32.xlu0 %v2527_v3  ;;  %v2530_v3 = vsel %vm212_vm0, %v2524_v59, 0.0 }
0x1490   :  { %v2226_v10 = vpop.xlane.xlu0 %2225 }
0x1491   :  { %4176 = vrcp.f32 %v2226_v10 }
0x1492   :  { %v2229_v38 = vpop.xlane.xlu1 %2228 }
0x1493   :  { %4178 = vrcp.f32 %v2229_v38  ;;  %v4086_v38 = vld [vmem:[%s5186_s4 + $0x40] sm:$0xff]  }
0x1494   :  { %3941 = vmatprep.subr.bf16.mxu1 %v4086_v38 }
0x1498   :  { %v2350_v47 = vpop.xlane.xlu0 %2349 }
0x1499   :  { %4180 = vrcp.f32 %v2350_v47  ;;  %v4087_v47 = vld [vmem:[%s5186_s4 + $0x48] sm:$0xff]  }
0x149a   :  { %v2353_v22 = vpop.xlane.xlu1 %2352 }
0x149b   :  { %v4177_v20 = vpop.eup %4176  ;;  %4182 = vrcp.f32 %v2353_v22  ;;  %v4939_v22 = vld [vmem:[%s5186_s4 + $0x50] sm:$0xff]  }
0x149c   :  { %v2236_v24 = vpop.permute.xlu0 %2235  ;;  %v2232_v50 = vmul.f32 %v4177_v20, %v4169_v61 }
0x149d   :  { %v4179_v5 = vpop.eup %4178  ;;  %3912 = vmatpush3.bf16.msra.mxu0 %v2236_v24 }
0x149e   :  { %v2233_v27 = vmul.f32 %v4179_v5, %v4171_v63  ;;  %3923 = vmatprep.subr.bf16.mxu0 %v4217_v56  ;;  %v2360_v62 = vpop.permute.xlu1 %2359 }
0x14a0   :  { %v2234_v30 = vpack.c.bf16 %v2233_v27, %v2232_v50 }
0x14a2   :  { %3914 = vmatmul.mubr.msk.bf16.vlgmr.msra.gmra.mrb[36].mxu0 %vm276_vm2, %v2234_v30 }
0x14a3   :  { %v4181_v54 = vpop.eup %4180  ;;  %3924 = vmatpush3.bf16.msra.mxu0 %v2360_v62  ;;  %3925 = vmatprep.mubr.msk.bf16.mxu0 %vm4218_vm1, %v4217_v56 }
0x14a4   :  { %3935 = vmatprep.subr.bf16.mxu0 %v4217_v56  ;;  %v2356_v49 = vmul.f32 %v4181_v54, %v4173_v1 }
0x14a5   :  { %v4183_v31 = vpop.eup %4182 }
0x14a6   :  { %v2357_v32 = vmul.f32 %v4183_v31, %v4175_v33 }
0x14a8   :  { %v2358_v9 = vpack.c.bf16 %v2357_v32, %v2356_v49 }
0x14aa   :  { %3926 = vmatmul.mubr.msk.bf16.vlgmr.msra.gmra.mrb[40].mxu0 %vm276_vm2, %v2358_v9 }
0x14ab   :  { %3936 = vmatpush3.bf16.msra.mxu0 %v4829_v45  ;;  %3937 = vmatprep.mubr.msk.bf16.mxu0 %vm4218_vm1, %v4217_v56 }
0x14cd   :  { %v2512_v20 = vpop.xlane.xlu0 %2511 }
0x14ce   :  { %v2520_v9 = vmul.f32 0.03125, %v2512_v20 }
0x14cf   :  { %v2509_v24 = vpop.xlane.xlu1 %2508 }
0x14d0   :  { %v2519_v5 = vmul.f32 0.03125, %v2509_v24 }
0x14d1   :  { %v2529_v50 = vpop.xlane.xlu0 %2528 }
0x14d2   :  { %v2543_v27 = vmul.f32 %v2519_v5, %v2519_v5  ;;  %v2539_v30 = vmul.f32 0.03125, %v2529_v50 }
0x14d4   :  { %v2547_v62 = vsub.f32 %v2539_v30, %v2543_v27 }
0x14d6   :  { %v2551_v54 = vmax.f32 %v2547_v62, 0.0 }
0x14d8   :  { %v2559_v49 = vadd.f32 1e-05, %v2551_v54 }
0x14da   :  { %4184 = vrsqrt.f32 %v2559_v49 }
0x1575   :  { %v2275_v34 = vpop.f32.mrb[36].mxu0 }
0x1576   :  { %v3915_v37 = vpop.f32.mrb[37].mxu0 }
0x1577   :  { %v2278_v42 = vpop.f32.mrb[38].mxu0 }
0x1578   :  { %v2282_v16 = vpack.c.bf16 %v2278_v42, %v2275_v34  ;;  %v3916_v55 = vpop.f32.mrb[39].mxu0 }
0x157a   :  { %3938 = vmatmul.mubr.msk.bf16.vlgmr.msra.gmra.mrb[44].mxu0 %vm276_vm2, %v2282_v16 }
0x157d   :  { %v2399_v11 = vpop.f32.mrb[40].mxu0 }
0x157e   :  { %v3927_v46 = vpop.f32.mrb[41].mxu0 }
0x157f   :  { %v2402_v57 = vpop.f32.mrb[42].mxu0  ;;  %v2544_v46 = vmul.f32 %v2520_v9, %v2520_v9 }
0x1580   :  { %v2406_v23 = vpack.c.bf16 %v2402_v57, %v2399_v11  ;;  %v3928_v26 = vpop.f32.mrb[43].mxu0 }
0x1582   :  { %3932 = vmatmul.mubr.msk.bf16.vlgmr.msra.gmra.mrb[60].mxu1 %vm276_vm2, %v2406_v23 }
0x1583   :  { %3942 = vmatpush3.bf16.msra.mxu1 %v4086_v38 }
0x1584   :  { %3943 = vmatprep.subr.bf16.mxu1 %v4087_v47 }
0x1587   :  { %3944 = vmatpush3.bf16.msra.mxu1 %v4087_v47 }
0x1588   :  { %3949 = vmatprep.subr.bf16.mxu1 %v4939_v22 }
0x164d   :  { %v2488_v60 = vpop.f32.mrb[44].mxu0 }
0x164e   :  { %v3939_v15 = vpop.f32.mrb[45].mxu0 }
0x164f   :  { %v2491_v45 = vpop.f32.mrb[46].mxu0 }
0x1650   :  { %v3940_v61 = vpop.f32.mrb[47].mxu0 }
0x1655   :  { %v2444_v25 = vpop.f32.mrb[60].mxu1 }
0x1656   :  { %v2489_v56 = vadd.f32 %v2488_v60, %v2444_v25  ;;  %v3933_v63 = vpop.f32.mrb[61].mxu1 }
0x1657   :  { %v2447_v0 = vpop.f32.mrb[62].mxu1 }
0x1658   :  { %v2501_v1 = vadd.f32 %v4875_v7, %v2489_v56  ;;  %v2492_v43 = vadd.f32 %v2491_v45, %v2447_v0  ;;  %v3934_v33 = vpop.f32.mrb[63].mxu1 }
0x165a   :  { %v4905_v36 = vadd.f32 %v2501_v1, %v4756_v35  ;;  %v2502_v4 = vadd.f32 %v4875_v7, %v2492_v43  ;;  %v4185_v43 = vpop.eup %4184 }
0x165c   :  { %v4909_v28 = vadd.f32 %v2502_v4, %v4758_v21  ;;  %v2513_v14 = vsel %vm212_vm0, %v4905_v36, 0.0  ;;  %v2525_v21 = vmul.f32 %v4905_v36, %v4905_v36  ;;  %v2555_v4 = vsub.f32 %v4880_v17, %v2519_v5 }
0x165d   :  { %2514 = vadd.xlane.f32.xlu1 %v2513_v14 }
0x165e   :  { %v2516_v12 = vsel %vm212_vm0, %v4909_v28, 0.0  ;;  %v2526_v8 = vmul.f32 %v4909_v28, %v4909_v28  ;;  %v2533_v10 = vsel %vm212_vm0, %v2525_v21, 0.0 }
0x165f   :  { %2517 = vadd.xlane.f32.xlu0 %v2516_v12  ;;  %v2567_v12 = vmul.f32 %v4185_v43, %v2555_v4 }
0x1660   :  { %v2536_v35 = vsel %vm212_vm0, %v2526_v8, 0.0 }
0x1661   :  { %2537 = vadd.xlane.f32.xlu1 %v2536_v35 }
0x1663   :  { %2531 = vadd.xlane.f32.xlu0 %v2530_v3  ;;  %v2556_v3 = vsub.f32 %v4883_v18, %v2520_v9 }
0x1665   :  { %2534 = vadd.xlane.f32.xlu1 %v2533_v10 }
0x1676   :  { %2579 = vrot.lane.b32.xlu1 %v4875_v7, %s4223_s28 }
0x1679   :  { %2572 = vrot.lane.b32.xlu0 %v4875_v7, %s4220_s25 }
0x167a   :  { %3154 = vrot.lane.b32.xlu1 %v4875_v7, %s4224_s13  ;;  %v4092_v7 = vld [vmem:[%s5187_s5 + $0x80] sm:$0xff]  }
0x167b   :  { %3965 = vmatprep.subr.bf16.mxu0 %v4092_v7 }
0x167c   :  { %3966 = vmatpush3.bf16.msra.mxu0 %v4092_v7 }
0x16ea   :  { %v2515_v31 = vpop.xlane.xlu1 %2514 }
0x16eb   :  { %v2521_v42 = vmul.f32 0.03125, %v2515_v31 }
0x16ec   :  { %v2518_v32 = vpop.xlane.xlu0 %2517 }
0x16ed   :  { %v2522_v34 = vmul.f32 0.03125, %v2518_v32  ;;  %v2545_v60 = vmul.f32 %v2521_v42, %v2521_v42  ;;  %v2557_v7 = vsub.f32 %v4905_v36, %v2521_v42 }
0x16ee   :  { %v2538_v37 = vpop.xlane.xlu1 %2537 }
0x16ef   :  { %v2546_v16 = vmul.f32 %v2522_v34, %v2522_v34  ;;  %v2542_v55 = vmul.f32 0.03125, %v2538_v37  ;;  %v2558_v35 = vsub.f32 %v4909_v28, %v2522_v34 }
0x16f0   :  { %v2532_v11 = vpop.xlane.xlu0 %2531 }
0x16f1   :  { %v2550_v57 = vsub.f32 %v2542_v55, %v2546_v16  ;;  %v2540_v23 = vmul.f32 0.03125, %v2532_v11 }
0x16f2   :  { %v2535_v26 = vpop.xlane.xlu1 %2534 }
0x16f3   :  { %v2554_v15 = vmax.f32 %v2550_v57, 0.0  ;;  %v2548_v45 = vsub.f32 %v2540_v23, %v2544_v46  ;;  %v2541_v61 = vmul.f32 0.03125, %v2535_v26  ;;  %v4089_v26 = vld [vmem:[%s5186_s4 + $0x58] sm:$0xff]  }
0x16f4   :  { %v2573_v14 = vpop.permute.xlu0 %2572 }
0x16f5   :  { %v2562_v25 = vadd.f32 1e-05, %v2554_v15  ;;  %v2552_v56 = vmax.f32 %v2548_v45, 0.0  ;;  %v2549_v63 = vsub.f32 %v2541_v61, %v2545_v60  ;;  %v2575_v8 = vmul.f32 %v2573_v14, %v2567_v12  ;;  %v4090_v45 = vld [vmem:[%s5186_s4 + $0x30] sm:$0xff]  }
0x16f6   :  { %v2580_v59 = vpop.permute.xlu1 %2579 }
0x16f7   :  { %4186 = vrsqrt.f32 %v2562_v25  ;;  %v2560_v0 = vadd.f32 1e-05, %v2552_v56  ;;  %v2553_v1 = vmax.f32 %v2549_v63, 0.0  ;;  %v4948_v38 = vadd.f32 %v2580_v59, %v2575_v8 }
0x16f9   :  { %4188 = vrsqrt.f32 %v2560_v0  ;;  %v2561_v33 = vadd.f32 1e-05, %v2553_v1  ;;  %v2586_v30 = vmul.f32 %v4948_v38, %v4312_v40 }
0x16fb   :  { %4190 = vrsqrt.f32 %v2561_v33  ;;  %v2597_v31 = vrot.slane %v2586_v30, 7  ;;  %v2750_v61 = vrot.slane %v2586_v30, 6 }
0x1701   :  { %v4187_v21 = vpop.eup %4186 }
0x1702   :  { %v2570_v10 = vmul.f32 %v4187_v21, %v2558_v35  ;;  %v4094_v35 = vld [vmem:[%s5187_s5 + $0x90] sm:$0xff]   ;;  %v4095_v21 = vld [vmem:[%s5187_s5 + $0x98] sm:$0xff]  }
0x1703   :  { %v4189_v47 = vpop.eup %4188 }
0x1704   :  { %v2568_v20 = vmul.f32 %v4189_v47, %v2556_v3  ;;  %v2578_v24 = vmul.f32 %v2573_v14, %v2570_v10  ;;  %v4096_v3 = vld [vmem:[%s5187_s5 + $0xa0] sm:$0xff]   ;;  %v2842_v10 = vsub.s32 5, %v4298_v13  ;;  %v4209_v47 = vld [vmem:[%s5184_s6 + $0x8] sm:$0x3f] }
0x1705   :  { %v4191_v50 = vpop.eup %4190 }
0x1706   :  { %v2569_v17 = vmul.f32 %v4191_v50, %v2557_v7  ;;  %v2576_v5 = vmul.f32 %v2573_v14, %v2568_v20  ;;  %v4951_v27 = vadd.f32 %v2580_v59, %v2578_v24  ;;  %v5021_v7 = vrot.slane %v4209_v47, %v2842_v10  ;;  %v4102_v10 = vld [vmem:[%s5187_s5 + $0x70] sm:$0xff]   ;;  %v4103_v47 = vld [vmem:[%s5187_s5 + $0x78] sm:$0xff]  }
0x1708   :  { %v2577_v28 = vmul.f32 %v2573_v14, %v2569_v17  ;;  %v4955_v62 = vadd.f32 %v2580_v59, %v2576_v5  ;;  %v2589_v18 = vmul.f32 %v4951_v27, %v4325_v51 }
0x170a   :  { %v4959_v54 = vadd.f32 %v2580_v59, %v2577_v28  ;;  %v2587_v36 = vmul.f32 %v4955_v62, %v4310_v39  ;;  %v2600_v49 = vrot.slane %v2589_v18, 7  ;;  %v2753_v15 = vrot.slane %v2589_v18, 6  ;;  %v4093_v59 = vld [vmem:[%s5187_s5 + $0x88] sm:$0xff]  }
0x170b   :  { %3967 = vmatprep.subr.bf16.mxu0 %v4093_v59 }
0x170c   :  { %v2588_v32 = vmul.f32 %v4959_v54, %v4322_v48  ;;  %v2598_v9 = vrot.slane %v2587_v36, 7  ;;  %v2604_v34 = vsel %vm1064_vm5, %v2600_v49, %v2597_v31  ;;  %v2590_v60 = vpack.c.bf16 %v2587_v36, %v2586_v30  ;;  %3968 = vmatpush3.bf16.msra.mxu0 %v4093_v59  ;;  %v4097_v59 = vld [vmem:[%s5187_s5 + $0xa8] sm:$0xff]  }
0x170d   :  { %v2605_v37 = vsel %vm4554_vm6, %v2604_v34, 0.0  ;;  %v2751_v25 = vrot.slane %v2587_v36, 6  ;;  %v2757_v56 = vsel %vm1226_vm8, %v2753_v15, %v2750_v61  ;;  %3969 = vmatprep.subr.bf16.mxu0 %v4094_v35 }
0x170e   :  { %v2599_v42 = vrot.slane %v2588_v32, 7  ;;  %v2603_v16 = vsel %vm1064_vm5, %v2597_v31, %v2598_v9  ;;  %v2758_v0 = vsel %vm4587_vm9, %v2757_v56, 0.0  ;;  %v2591_v1 = vpack.c.bf16 %v2589_v18, %v2588_v32 }
0x170f   :  { %v2609_v55 = vpack.c.bf16 %v2603_v16, %v2605_v37  ;;  %v2756_v63 = vsel %vm1226_vm8, %v2750_v61, %v2751_v25  ;;  %v2752_v33 = vrot.slane %v2588_v32, 6 }
0x1710   :  { %v2601_v11 = vsel %vm1064_vm5, %v2599_v42, %v2600_v49  ;;  %v2602_v46 = vsel %vm1064_vm5, %v2598_v9, %v2599_v42  ;;  %v2762_v43 = vpack.c.bf16 %v2756_v63, %v2758_v0  ;;  %3970 = vmatpush3.bf16.msra.mxu0 %v4094_v35 }
0x1711   :  { %3945 = vmatprep.mubr.msk.bf16.mxu1 %vm212_vm0, %v2609_v55  ;;  %v2607_v57 = vsel %vm4566_vm7, %v2602_v46, 0.0  ;;  %v2755_v4 = vsel %vm1226_vm8, %v2751_v25, %v2752_v33  ;;  %v2754_v14 = vsel %vm1226_vm8, %v2752_v33, %v2753_v15  ;;  %3971 = vmatprep.subr.bf16.mxu0 %v4095_v21 }
0x1712   :  { %v2610_v23 = vpack.c.bf16 %v2601_v11, %v2607_v57  ;;  %v2760_v12 = vsel %vm4602_vm10, %v2755_v4, 0.0 }
0x1713   :  { %v2763_v8 = vpack.c.bf16 %v2754_v14, %v2760_v12 }
0x1714   :  { %3946 = vmatmul.mubr.msk.bf16.vlgmr.msra.gmra.mrb[64].mxu1 %vm212_vm0, %v2610_v23  ;;  %3972 = vmatpush3.bf16.msra.mxu0 %v4095_v21 }
0x1715   :  { %3953 = vmatprep.mubr.msk.bf16.mxu1 %vm212_vm0, %v2590_v60  ;;  %3950 = vmatpush3.bf16.msra.mxu1 %v4939_v22  ;;  %v4091_v22 = vld [vmem:[%s5186_s4 + $0x38] sm:$0xff]  }
0x1716   :  { %3951 = vmatprep.subr.bf16.mxu1 %v4089_v26  ;;  %3977 = vmatprep.subr.bf16.mxu0 %v4096_v3 }
0x1719   :  { %3952 = vmatpush3.bf16.msra.mxu1 %v4089_v26 }
0x171a   :  { %3957 = vmatprep.subr.bf16.mxu1 %v4090_v45 }
0x1720   :  { %3954 = vmatmul.mubr.msk.bf16.vlgmr.msra.gmra.mrb[64].mxu1 %vm212_vm0, %v2591_v1 }
0x1721   :  { %3961 = vmatprep.mubr.msk.bf16.mxu1 %vm212_vm0, %v2762_v43  ;;  %3958 = vmatpush3.bf16.msra.mxu1 %v4090_v45 }
0x1722   :  { %3959 = vmatprep.subr.bf16.mxu1 %v4091_v22 }
0x1725   :  { %3960 = vmatpush3.bf16.msra.mxu1 %v4091_v22 }
0x172c   :  { %3962 = vmatmul.mubr.msk.bf16.vlgmr.msra.gmra.mrb[64].mxu1 %vm212_vm0, %v2763_v8 }
0x17ff   :  { %v3963_v20 = vpop.f32.mrb[64].mxu1 }
0x1800   :  { %v2846_v24 = vadd.f32 %v3963_v20, %v5021_v7  ;;  %v2821_v50 = vpop.f32.mrb[65].mxu1  ;;  %v3155_v20 = vpop.permute.xlu1 %3154 }
0x1801   :  { %v2844_v17 = vadd.f32 %v5021_v7, %v2821_v50  ;;  %v3964_v5 = vpop.f32.mrb[66].mxu1 }
0x1802   :  { %v2850_v30 = vmax.f32 %v2846_v24, 0.0  ;;  %v2847_v28 = vadd.f32 %v3964_v5, %v5021_v7  ;;  %v2824_v18 = vpop.f32.mrb[67].mxu1 }
0x1803   :  { %v2848_v36 = vmax.f32 %v2844_v17, 0.0  ;;  %v2845_v31 = vadd.f32 %v5021_v7, %v2824_v18 }
0x1804   :  { %v2854_v49 = vmul.f32 %v2850_v30, %v4322_v48  ;;  %v2851_v32 = vmax.f32 %v2847_v28, 0.0 }
0x1805   :  { %v2852_v9 = vmul.f32 %v2848_v36, %v4312_v40  ;;  %v2849_v34 = vmax.f32 %v2845_v31, 0.0 }
0x1806   :  { %v2855_v37 = vmul.f32 %v2851_v32, %v4325_v51  ;;  %v2869_v42 = vrot.slane %v2854_v49, 7  ;;  %v3050_v46 = vrot.slane %v2854_v49, 6 }
0x1807   :  { %v2867_v16 = vrot.slane %v2852_v9, 7  ;;  %v3048_v55 = vrot.slane %v2852_v9, 6  ;;  %v2853_v11 = vmul.f32 %v2849_v34, %v4310_v39 }
0x1808   :  { %v2857_v57 = vpack.c.bf16 %v2855_v37, %v2854_v49  ;;  %v2870_v23 = vrot.slane %v2855_v37, 7  ;;  %v3051_v26 = vrot.slane %v2855_v37, 6 }
0x1809   :  { %v2868_v60 = vrot.slane %v2853_v11, 7  ;;  %v3049_v15 = vrot.slane %v2853_v11, 6  ;;  %v2856_v45 = vpack.c.bf16 %v2853_v11, %v2852_v9 }
0x180a   :  { %v2871_v61 = vsel %vm1064_vm5, %v2869_v42, %v2870_v23  ;;  %v3052_v25 = vsel %vm1226_vm8, %v3050_v46, %v3051_v26  ;;  %v2874_v56 = vsel %vm1064_vm5, %v2870_v23, %v2867_v16  ;;  %v3055_v63 = vsel %vm1226_vm8, %v3051_v26, %v3048_v55 }
0x180b   :  { %v2872_v0 = vsel %vm1064_vm5, %v2868_v60, %v2869_v42  ;;  %v3053_v1 = vsel %vm1226_vm8, %v3049_v15, %v3050_v46  ;;  %v2873_v22 = vsel %vm1064_vm5, %v2867_v16, %v2868_v60  ;;  %v2875_v43 = vsel %vm4554_vm6, %v2874_v56, 0.0 }
0x180c   :  { %v2879_v33 = vpack.c.bf16 %v2873_v22, %v2875_v43  ;;  %v2877_v4 = vsel %vm4566_vm7, %v2872_v0, 0.0  ;;  %v3054_v14 = vsel %vm1226_vm8, %v3048_v55, %v3049_v15  ;;  %v3056_v12 = vsel %vm4587_vm9, %v3055_v63, 0.0 }
0x180d   :  { %v2880_v8 = vpack.c.bf16 %v2871_v61, %v2877_v4  ;;  %v3060_v35 = vpack.c.bf16 %v3054_v14, %v3056_v12  ;;  %v3058_v6 = vsel %vm4602_vm10, %v3053_v1, 0.0 }
0x180e   :  { %3973 = vmatprep.mubr.msk.bf16.mxu0 %vm1394_vm11, %v2879_v33  ;;  %v3061_v21 = vpack.c.bf16 %v3052_v25, %v3058_v6 }
0x180f   :  { %3974 = vmatmul.mubr.msk.bf16.vlgmr.msra.gmra.mrb[48].mxu0 %vm1394_vm11, %v2880_v8 }
0x1810   :  { %3978 = vmatpush3.bf16.msra.mxu0 %v4096_v3  ;;  %3985 = vmatprep.mubr.msk.bf16.mxu0 %vm1394_vm11, %v2856_v45  ;;  %v4101_v3 = vld [vmem:[%s5187_s5 + $0x68] sm:$0xff]   ;;  %v5125_v45 = vld [vmem:[%s5184_s6] sm:$0xff] }
0x1811   :  { %3979 = vmatprep.subr.bf16.mxu0 %v4097_v59  ;;  %v3261_v61 = vrot.slane %v5125_v45, 4 }
0x1813   :  { %4001 = vmatprep.subr.msk.mxu1 %vm212_vm0, %v3261_v61 }
0x1814   :  { %3980 = vmatpush3.bf16.msra.mxu0 %v4097_v59  ;;  %4002 = vmatpush3.xpose.msk.msra.mxu1 %vm212_vm0, %v3261_v61 }
0x1815   :  { %3981 = vmatprep.subr.bf16.mxu0 %v4098_v19 }
0x1818   :  { %3982 = vmatpush3.bf16.msra.mxu0 %v4098_v19 }
0x1819   :  { %3983 = vmatprep.subr.bf16.mxu0 %v4099_v29 }
0x181c   :  { %3984 = vmatpush3.bf16.msra.mxu0 %v4099_v29 }
0x181d   :  { %3989 = vmatprep.subr.bf16.mxu0 %v4100_v2 }
0x181f   :  { %3986 = vmatmul.mubr.msk.bf16.vlgmr.msra.gmra.mrb[48].mxu0 %vm1394_vm11, %v2857_v57 }
0x1820   :  { %3990 = vmatpush3.bf16.msra.mxu0 %v4100_v2  ;;  %3997 = vmatprep.mubr.msk.bf16.mxu0 %vm1394_vm11, %v3060_v35 }
0x1821   :  { %3991 = vmatprep.subr.bf16.mxu0 %v4101_v3 }
0x1824   :  { %3992 = vmatpush3.bf16.msra.mxu0 %v4101_v3 }
0x1825   :  { %3993 = vmatprep.subr.bf16.mxu0 %v4102_v10 }
0x1828   :  { %3994 = vmatpush3.bf16.msra.mxu0 %v4102_v10 }
0x1829   :  { %3995 = vmatprep.subr.bf16.mxu0 %v4103_v47 }
0x182c   :  { %3996 = vmatpush3.bf16.msra.mxu0 %v4103_v47 }
0x182f   :  { %3998 = vmatmul.mubr.msk.bf16.vlgmr.msra.gmra.mrb[48].mxu0 %vm1394_vm11, %v3061_v21 }
0x1902   :  { %v3999_v24 = vpop.f32.mrb[48].mxu0 }
0x1903   :  { %v3159_v50 = vadd.f32 %v3999_v24, %v3155_v20  ;;  %v3135_v17 = vpop.f32.mrb[49].mxu0 }
0x1904   :  { %v3157_v5 = vadd.f32 %v3155_v20, %v3135_v17  ;;  %v4000_v30 = vpop.f32.mrb[50].mxu0 }
0x1905   :  { %v3163_v28 = vmul.f32 %v3159_v50, %v4322_v48  ;;  %v3160_v18 = vadd.f32 %v4000_v30, %v3155_v20  ;;  %v3138_v36 = vpop.f32.mrb[51].mxu0 }
0x1906   :  { %v3161_v31 = vmul.f32 %v3157_v5, %v4312_v40  ;;  %v3158_v49 = vadd.f32 %v3155_v20, %v3138_v36 }
0x1907   :  { %v5085_v32 = vadd.f32 %v3163_v28, %v4959_v54  ;;  %v3164_v9 = vmul.f32 %v3160_v18, %v4325_v51 }
0x1908   :  { %v5089_v34 = vadd.f32 %v3161_v31, %v4948_v38  ;;  %v3162_v37 = vmul.f32 %v3158_v49, %v4310_v39 }
0x1909   :  { %v3175_v42 = vsel %vm212_vm0, %v5085_v32, 0.0  ;;  %v3187_v16 = vmul.f32 %v5085_v32, %v5085_v32  ;;  %v5097_v55 = vadd.f32 %v3164_v9, %v4951_v27 }
0x190a   :  { %3176 = vadd.xlane.f32.xlu1 %v3175_v42  ;;  %v3169_v54 = vsel %vm212_vm0, %v5089_v34, 0.0  ;;  %v5102_v11 = vadd.f32 %v3162_v37, %v4955_v62  ;;  %v3185_v57 = vmul.f32 %v5089_v34, %v5089_v34 }
0x190b   :  { %3170 = vadd.xlane.f32.xlu0 %v3169_v54  ;;  %v3195_v38 = vsel %vm212_vm0, %v3187_v16, 0.0  ;;  %v3178_v46 = vsel %vm212_vm0, %v5097_v55, 0.0  ;;  %v3188_v60 = vmul.f32 %v5097_v55, %v5097_v55 }
0x190c   :  { %v3172_v27 = vsel %vm212_vm0, %v5102_v11, 0.0  ;;  %v3189_v23 = vsel %vm212_vm0, %v3185_v57, 0.0  ;;  %v3186_v62 = vmul.f32 %v5102_v11, %v5102_v11 }
0x190d   :  { %v3198_v15 = vsel %vm212_vm0, %v3188_v60, 0.0 }
0x190e   :  { %3196 = vadd.xlane.f32.xlu1 %v3195_v38  ;;  %v3192_v26 = vsel %vm212_vm0, %v3186_v62, 0.0 }
0x190f   :  { %3179 = vadd.xlane.f32.xlu0 %v3178_v46 }
0x1912   :  { %3173 = vadd.xlane.f32.xlu1 %v3172_v27 }
0x1913   :  { %3190 = vadd.xlane.f32.xlu0 %v3189_v23 }
0x1917   :  { %3193 = vadd.xlane.f32.xlu0 %v3192_v26 }
0x191b   :  { %3199 = vadd.xlane.f32.xlu0 %v3198_v15 }
0x1923   :  { %3234 = vrot.lane.b32.xlu1 %v5021_v7, %s4223_s28 }
0x1931   :  { %3241 = vrot.lane.b32.xlu0 %v5021_v7, %s4224_s13 }
0x1997   :  { %v3177_v25 = vpop.xlane.xlu1 %3176 }
0x1998   :  { %v3183_v56 = vmul.f32 0.03125, %v3177_v25  ;;  %v3171_v63 = vpop.xlane.xlu0 %3170 }
0x1999   :  { %v3181_v33 = vmul.f32 0.03125, %v3171_v63 }
0x199a   :  { %v3207_v1 = vmul.f32 %v3183_v56, %v3183_v56  ;;  %v3219_v31 = vsub.f32 %v5085_v32, %v3183_v56 }
0x199b   :  { %v3197_v0 = vpop.xlane.xlu1 %3196  ;;  %v3205_v8 = vmul.f32 %v3181_v33, %v3181_v33  ;;  %v3217_v37 = vsub.f32 %v5089_v34, %v3181_v33 }
0x199c   :  { %v3203_v22 = vmul.f32 0.03125, %v3197_v0  ;;  %v3180_v43 = vpop.xlane.xlu0 %3179 }
0x199d   :  { %v3184_v29 = vmul.f32 0.03125, %v3180_v43 }
0x199e   :  { %v3211_v7 = vsub.f32 %v3203_v22, %v3207_v1 }
0x199f   :  { %v3174_v4 = vpop.xlane.xlu1 %3173  ;;  %v3208_v50 = vmul.f32 %v3184_v29, %v3184_v29  ;;  %v3220_v15 = vsub.f32 %v5097_v55, %v3184_v29 }
0x19a0   :  { %v3215_v14 = vmax.f32 %v3211_v7, 0.0  ;;  %v3191_v12 = vpop.xlane.xlu0 %3190  ;;  %v3182_v59 = vmul.f32 0.03125, %v3174_v4  ;;  %v3259_v7 = vrot.slane %v5125_v45, %v1737_v58 }
0x19a1   :  { %v3201_v35 = vmul.f32 0.03125, %v3191_v12 }
0x19a2   :  { %v3223_v6 = vadd.f32 1e-05, %v3215_v14  ;;  %v3206_v2 = vmul.f32 %v3182_v59, %v3182_v59  ;;  %v3218_v46 = vsub.f32 %v5102_v11, %v3182_v59 }
0x19a3   :  { %v3209_v21 = vsub.f32 %v3201_v35, %v3205_v8  ;;  %v3235_v42 = vpop.permute.xlu1 %3234 }
0x19a4   :  { %4192 = vrsqrt.f32 %v3223_v6  ;;  %v3194_v19 = vpop.xlane.xlu0 %3193 }
0x19a5   :  { %v3213_v3 = vmax.f32 %v3209_v21, 0.0  ;;  %v3202_v10 = vmul.f32 0.03125, %v3194_v19 }
0x19a7   :  { %v3221_v47 = vadd.f32 1e-05, %v3213_v3  ;;  %v3210_v20 = vsub.f32 %v3202_v10, %v3206_v2  ;;  %v4211_v10 = vld [vmem:[%s5181_s0 + $0x8] sm:$0xff] }
0x19a8   :  { %v3200_v24 = vpop.xlane.xlu0 %3199 }
0x19a9   :  { %4194 = vrsqrt.f32 %v3221_v47  ;;  %v3214_v17 = vmax.f32 %v3210_v20, 0.0  ;;  %v3204_v5 = vmul.f32 0.03125, %v3200_v24  ;;  %v4212_v24 = vld [vmem:[%s5181_s0] sm:$0xff] }
0x19ab   :  { %v3222_v30 = vadd.f32 1e-05, %v3214_v17  ;;  %v3212_v28 = vsub.f32 %v3204_v5, %v3208_v50 }
0x19ac   :  { %v3242_v27 = vpop.permute.xlu0 %3241 }
0x19ad   :  { %4196 = vrsqrt.f32 %v3222_v30  ;;  %v3216_v18 = vmax.f32 %v3212_v28, 0.0  ;;  %v4213_v30 = vld [vmem:[%s5181_s0 + $0x10] sm:$0xff] }
0x19ae   :  { %v4193_v36 = vpop.eup %4192 }
0x19af   :  { %v3224_v49 = vadd.f32 1e-05, %v3216_v18  ;;  %v3231_v9 = vmul.f32 %v4193_v36, %v3219_v31 }
0x19b1   :  { %4198 = vrsqrt.f32 %v3224_v49  ;;  %v3239_v38 = vmul.f32 %v3235_v42, %v3231_v9 }
0x19b3   :  { %v4195_v16 = vpop.eup %4194  ;;  %v3246_v60 = vadd.f32 %v3242_v27, %v3239_v38 }
0x19b4   :  { %v3229_v54 = vmul.f32 %v4195_v16, %v3217_v37 }
0x19b5   :  { %v3250_v0 = vmul.f32 %v3246_v60, %v4322_v48 }
0x19b6   :  { %v3237_v57 = vmul.f32 %v3235_v42, %v3229_v54 }
0x19b7   :  { %v4197_v23 = vpop.eup %4196  ;;  %v3254_v55 = vadd.f32 %v3250_v0, %v4328_v52 }
0x19b8   :  { %v3230_v62 = vmul.f32 %v4197_v23, %v3218_v46  ;;  %v3244_v26 = vadd.f32 %v3242_v27, %v3237_v57 }
0x19ba   :  { %v3238_v32 = vmul.f32 %v3235_v42, %v3230_v62  ;;  %v3248_v61 = vmul.f32 %v3244_v26, %v4312_v40 }
0x19bb   :  { %v4199_v25 = vpop.eup %4198 }
0x19bc   :  { %v3232_v56 = vmul.f32 %v4199_v25, %v3220_v15  ;;  %v3245_v34 = vadd.f32 %v3242_v27, %v3238_v32  ;;  %v3252_v63 = vadd.f32 %v3248_v61, %v4318_v44 }
0x19be   :  { %v3240_v1 = vmul.f32 %v3235_v42, %v3232_v56  ;;  %v3249_v11 = vmul.f32 %v3245_v34, %v4310_v39  ;;  %4003 = vmatprep.mubr.msk.f32.mxu1 %vm212_vm0, %v3252_v63 }
0x19c0   :  { %v3247_v22 = vadd.f32 %v3242_v27, %v3240_v1  ;;  %v3253_v43 = vadd.f32 %v3249_v11, %v4315_v41 }
0x19c2   :  { %v3251_v33 = vmul.f32 %v3247_v22, %v4325_v51  ;;  %4004 = vmatmul.mubr.msk.f32.vlgmr.msra.gmra.mrb[68].mxu1 %vm212_vm0, %v3253_v43 }
0x19c3   :  { %4006 = vmatprep.mubr.msk.f32.mxu1 %vm212_vm0, %v3254_v55 }
0x19c4   :  { %v3255_v44 = vadd.f32 %v3251_v33, %v4331_v53 }
0x19c6   :  { %4007 = vmatmul.mubr.msk.f32.gmra.mrb[70].mxu1 %vm212_vm0, %v3255_v44 }
0x1a95   :  { %v4005_v4 = vpop.f32.mrb[68].mxu1 }
0x1a96   :  { %v3348_v14 = vadd.f32 %v4005_v4, %v3259_v7  ;;  %v3342_v12 = vpop.f32.mrb[69].mxu1 }
0x1a97   :  { %v3343_v41 = vadd.f32 %v3342_v12, %v3259_v7 }
0x1a98   :  { %v3362_v52 = vmul.f32 %v3348_v14, %v4310_v39 }
0x1a99   :  { %v3361_v8 = vmul.f32 %v3343_v41, %v4312_v40  ;;  %v4008_v59 = vpop.f32.mrb[70].mxu1 }
0x1a9a   :  { %v3367_v35 = vmul.f32 1.442695, %v3362_v52  ;;  %v3358_v6 = vadd.f32 %v4008_v59, %v3259_v7  ;;  %v3352_v21 = vpop.f32.mrb[71].mxu1 }
0x1a9b   :  { %v3365_v19 = vmul.f32 1.442695, %v3361_v8  ;;  %v3353_v53 = vadd.f32 %v3352_v21, %v3259_v7 }
0x1a9c   :  { %4200 = vpow2.f32 %v3367_v35  ;;  %v3364_v29 = vmul.f32 %v3358_v6, %v4325_v51 }
0x1a9d   :  { %4202 = vpow2.f32 %v3365_v19  ;;  %v3363_v13 = vmul.f32 %v3353_v53, %v4322_v48 }
0x1a9e   :  { %v3371_v58 = vmul.f32 1.442695, %v3364_v29 }
0x1a9f   :  { %v3369_v45 = vmul.f32 1.442695, %v3363_v13 }
0x1aa0   :  { %4204 = vpow2.f32 %v3371_v58 }
0x1aa1   :  { %4206 = vpow2.f32 %v3369_v45 }
0x1aa6   :  { %v4201_v2 = vpop.eup %4200 }
0x1aa7   :  { %v4203_v3 = vpop.eup %4202  ;;  %v3374_v47 = vmul.f32 %v4211_v10, %v4201_v2 }
0x1aa8   :  { %v3373_v50 = vmul.f32 %v4212_v24, %v4203_v3 }
0x1aa9   :  { %v3378_v20 = vmul.f32 %v3374_v47, %v4310_v39  ;;  %v4214_v39 = vld [vmem:[%s5181_s0 + $0x18] sm:$0xff] }
0x1aaa   :  { %v4205_v17 = vpop.eup %4204  ;;  %v3377_v18 = vmul.f32 %v3373_v50, %v4312_v40 }
0x1aab   :  { %v4207_v5 = vpop.eup %4206  ;;  %3387 = vrot.lane.b32.xlu1 %v3378_v20, %s4225_s9  ;;  %v3376_v36 = vmul.f32 %v4214_v39, %v4205_v17 }
0x1aac   :  { %v3375_v28 = vmul.f32 %v4213_v30, %v4207_v5 }
0x1aad   :  { %v3380_v49 = vmul.f32 %v3376_v36, %v4325_v51 }
0x1aae   :  { %v3379_v31 = vmul.f32 %v3375_v28, %v4322_v48 }
0x1aaf   :  { %3385 = vrot.lane.b32.xlu1 %v3377_v18, %s4225_s9 }
0x1ab0   :  { %3389 = vrot.lane.b32.xlu0 %v3379_v31, %s4225_s9 }
0x1ab3   :  { %3391 = vrot.lane.b32.xlu1 %v3380_v49, %s4225_s9 }
0x1b1d   :  { %v3388_v9 = vpop.permute.xlu1 %3387 }
0x1b1e   :  { %v3398_v37 = vadd.f32 %v3388_v9, %v3362_v52 }
0x1b20   :  { %3407 = vrot.lane.b32.xlu1 %v3398_v37, %s4226_s15 }
0x1b21   :  { %v3386_v42 = vpop.permute.xlu1 %3385 }
0x1b22   :  { %v3397_v16 = vadd.f32 %v3386_v42, %v3361_v8  ;;  %v3390_v54 = vpop.permute.xlu0 %3389 }
0x1b23   :  { %v3399_v38 = vadd.f32 %v3390_v54, %v3363_v13 }
0x1b24   :  { %3405 = vrot.lane.b32.xlu0 %v3397_v16, %s4226_s15 }
0x1b25   :  { %v3392_v40 = vpop.permute.xlu1 %3391 }
0x1b26   :  { %v3400_v46 = vadd.f32 %v3392_v40, %v3364_v29 }
0x1b28   :  { %3409 = vrot.lane.b32.xlu0 %v3399_v38, %s4226_s15  ;;  %3411 = vrot.lane.b32.xlu1 %v3400_v46, %s4226_s15 }
0x1b92   :  { %v3408_v48 = vpop.permute.xlu1 %3407 }
0x1b93   :  { %v3419_v57 = vsel %vm3417_vm12, %v4211_v10, %v3408_v48 }
0x1b94   :  { %3424 = vst.msk [vmem:[%s5188_s7 + $0x8] sm:$0xff] %vm3422_vm13, %v3419_v57 }
0x1b96   :  { %v3406_v51 = vpop.permute.xlu0 %3405 }
0x1b97   :  { %v3418_v27 = vsel %vm3417_vm12, %v4212_v24, %v3406_v51 }
0x1b98   :  { %3423 = vst.msk [vmem:[%s5188_s7] sm:$0xff] %vm3422_vm13, %v3418_v27 }
0x1b9a   :  { %v3410_v23 = vpop.permute.xlu0 %3409  ;;  %v3412_v62 = vpop.permute.xlu1 %3411 }
0x1b9b   :  { %v3420_v26 = vsel %vm3417_vm12, %v4213_v30, %v3410_v23  ;;  %v3421_v60 = vsel %vm3417_vm12, %v4214_v39, %v3412_v62 }
0x1b9c   :  { %3425 = vst.msk [vmem:[%s5188_s7 + $0x10] sm:$0xff] %vm3422_vm13, %v3420_v26  ;;  %3426 = vst.msk [vmem:[%s5188_s7 + $0x18] sm:$0xff] %vm3422_vm13, %v3421_v60 }

</bundles_post_ra>
